<compile_context>
chip_gen: v7x
topology: tpu7x:2x2x1
jax: 0.10.0
libtpu: 0.0.40
codegen_flags: <defaults>
</compile_context>

<pallas_src>
import functools

import jax
import jax.numpy as jnp
import numpy as np
from jax import lax
from jax.experimental import pallas as pl
from jax.experimental.pallas import tpu as pltpu


def _round_up(x, m):
    return ((x + m - 1) // m) * m


def _pad_gates(w, H, Hp):
    """Pad the last dim (4H, PyTorch gate order [i,f,g,o]) per-gate to 4*Hp."""
    lead = w.shape[:-1]
    w4 = w.reshape(*lead, 4, H)
    w4 = jnp.pad(w4, [(0, 0)] * len(lead) + [(0, 0), (0, Hp - H)])
    return w4.reshape(*lead, 4 * Hp)


def _pad_rows(w, H, Hp):
    return jnp.pad(w, ((0, Hp - H), (0, 0)))


# --------------------------------------------------------------------------- #
# Batched matmul + bias kernel (vocab FC).                                     #
# --------------------------------------------------------------------------- #
def _matmul_bias_kernel(x_ref, w_ref, b_ref, o_ref):
    o_ref[...] = (
        jnp.dot(x_ref[...], w_ref[...], preferred_element_type=jnp.float32)
        + b_ref[...]
    ).astype(o_ref.dtype)


def _pick_matmul_tiles(M, K, N, x_item, w_item, budget_bytes):
    tm_cands = [c for c in (512, 256, 128, 64, 32, 16, 8) if c <= M and M % c == 0] or [M]
    tn_cands = [c for c in (2048, 1024, 512, 256, 128) if c <= N and N % c == 0] or [N]
    for tn in tn_cands:              # prefer wide W slabs (reused across row tiles)
        for tm in tm_cands:
            vmem = 2 * (tm * K * x_item + K * tn * w_item + tn * 4 + tm * tn * 4)
            if vmem <= budget_bytes:
                return tm, tn
    return tm_cands[-1], tn_cands[-1]


def _matmul_bias(x, w, b, *, out_dtype=jnp.float32, budget_bytes=12 << 20):
    """out = x @ w + b   (x: (M,K) bf16, w: (K,N) bf16, b: (1,N) f32).

    Grid is (N//tn, M//tm) with rows fastest-varying so the (K, tn) weight block
    index is constant across row tiles -> W is streamed from HBM only once.
    """
    M, K = x.shape
    _, N = w.shape
    tm, tn = _pick_matmul_tiles(M, K, N, x.dtype.itemsize, w.dtype.itemsize,
                                budget_bytes)
    return pl.pallas_call(
        _matmul_bias_kernel,
        out_shape=jax.ShapeDtypeStruct((M, N), out_dtype),
        grid_spec=pltpu.PrefetchScalarGridSpec(
            num_scalar_prefetch=0,
            grid=(N // tn, M // tm),
            in_specs=[
                pl.BlockSpec((tm, K), lambda j, i: (i, 0)),
                pl.BlockSpec((K, tn), lambda j, i: (0, j)),   # constant over i
                pl.BlockSpec((1, tn), lambda j, i: (0, j)),
            ],
            out_specs=pl.BlockSpec((tm, tn), lambda j, i: (i, j)),
        ),
        compiler_params=pltpu.CompilerParams(
            dimension_semantics=("parallel", "arbitrary"),
            vmem_limit_bytes=32 << 20,       # v5e default scoped (16 MiB) is too low
        ),
    )(x, w, b)


# --------------------------------------------------------------------------- #
# Recurrent (time-serial) LSTM kernel.                                         #
# --------------------------------------------------------------------------- #
def _make_recurrent_kernel(*, n_layer, B, H, Tc, unroll):
    G = 4 * H
    n_w = 3 * n_layer   # wih0, whh0, b0, then (wih_l, whh_l, b_l) per extra layer

    def cell(gates, c_prev):
        # PyTorch gate order [i, f, g, o]; H is padded to a multiple of 128 so
        # every slice below is lane-block aligned. Elementwise math stays f32.
        i_g = jax.nn.sigmoid(gates[:, 0 * H:1 * H])
        f_g = jax.nn.sigmoid(gates[:, 1 * H:2 * H])
        g_g = jnp.tanh(gates[:, 2 * H:3 * H])
        o_g = jax.nn.sigmoid(gates[:, 3 * H:4 * H])
        c_new = f_g * c_prev + i_g * g_g
        h_new = o_g * jnp.tanh(c_new)
        return h_new, c_new

    def kernel(x_ref, *refs):
        w_hbm = refs[:n_w]                                    # pl.ANY (HBM) refs
        h_out_ref = refs[n_w]
        hN_ref = refs[n_w + 1]
        cN_ref = refs[n_w + 2]
        pre_ref = refs[n_w + 3]                               # (Tc*B, G) f32 scratch
        w_vmem = refs[n_w + 4: 2 * n_w + 4]                   # staged weights
        copy_sem = refs[2 * n_w + 4]

        @pl.when(pl.program_id(0) == 0)
        def _init():
            # h/c state lives directly in the resident output blocks.
            hN_ref[...] = jnp.zeros_like(hN_ref)
            cN_ref[...] = jnp.zeros_like(cN_ref)
            # Stage every weight exactly once into single-buffered VMEM scratch
            # (constant across the whole grid -> no double-buffered BlockSpecs).
            for src, dst in zip(w_hbm, w_vmem):
                cp = pltpu.make_async_copy(src, dst, copy_sem)
                cp.start()
                cp.wait()

        wih0 = w_vmem[0][...]                                 # (D_in, G) bf16
        whh0 = w_vmem[1][...]                                 # (H, G)    bf16
        b0 = w_vmem[2][...]                                   # (1, G)    f32
        wihs = [w_vmem[3 * l + 0][...] for l in range(1, n_layer)]
        whhs = [w_vmem[3 * l + 1][...] for l in range(1, n_layer)]
        # Hoist the (1,G)->(B,G) bias broadcasts out of the time loop.
        biases = [jnp.broadcast_to(w_vmem[3 * l + 2][...], (B, G))
                  for l in range(1, n_layer)]

        # ---- fused "pass 1": layer-0 input projection for the whole time block
        # as one lane-dense MXU gemm into VMEM scratch (no HBM intermediate).
        pre_ref[...] = (
            jnp.dot(x_ref[...], wih0, preferred_element_type=jnp.float32) + b0
        )

        def step(t, carry):
            hs, cs = carry
            row = pl.multiple_of(t * B, B)          # B is a multiple of 8
            # ---- layer 0: precomputed x-part + recurrent part ----
            gates = pre_ref[pl.ds(row, B), :] + jnp.dot(
                hs[0].astype(jnp.bfloat16), whh0,
                preferred_element_type=jnp.float32)
            h_new, c_new = cell(gates, cs[0])
            new_h, new_c = [h_new], [c_new]
            inp = h_new
            # ---- layers 1..L-1: two dots per layer (no activation concat) ----
            for l in range(1, n_layer):
                gates = (
                    jnp.dot(inp.astype(jnp.bfloat16), wihs[l - 1],
                            preferred_element_type=jnp.float32)
                    + jnp.dot(hs[l].astype(jnp.bfloat16), whhs[l - 1],
                              preferred_element_type=jnp.float32)
                    + biases[l - 1])
                h_new, c_new = cell(gates, cs[l])
                new_h.append(h_new)
                new_c.append(c_new)
                inp = h_new
            h_out_ref[pl.ds(row, B), :] = inp.astype(h_out_ref.dtype)
            return tuple(new_h), tuple(new_c)

        # h/c state is carried in vregs for the whole time block; the hN/cN refs
        # are read once here and written back once after the loop.
        init = (tuple(hN_ref[l] for l in range(n_layer)),
                tuple(cN_ref[l] for l in range(n_layer)))
        hs, cs = lax.fori_loop(0, Tc, step, init, unroll=unroll)
        for l in range(n_layer):
            hN_ref[l] = hs[l]
            cN_ref[l] = cs[l]

    return kernel


# --------------------------------------------------------------------------- #
# Forward wrapper (matches PyTorch LSTMDecoder.forward, teacher-forced path).  #
# --------------------------------------------------------------------------- #
def lstm_decoder_forward(emb, input_seq_emb, params, *, n_layer, d_hidden):
    """emb: (B, T, d_input), input_seq_emb: (B, T, d_wordvec).
    Returns (logits (B, T, V), (h_n, c_n) each (n_layer, B, H))."""
    B, T, _ = input_seq_emb.shape
    H = d_hidden
    V = params["wfc"].shape[1]
    Bp = _round_up(B, 8)         # sublane alignment for every (B, .) tile
    Hp = _round_up(H, 128)       # lane alignment for gate slices / h stores
    Vp = _round_up(V, 128)       # lane-dense logits store
    G = 4 * Hp

    # ---- glue: concat, pad batch, time-major flatten, bf16 for the MXU ----
    x = jnp.concatenate([input_seq_emb, emb], axis=-1).astype(jnp.float32)
    D_in = x.shape[-1]
    if Bp != B:
        x = jnp.pad(x, ((0, Bp - B), (0, 0), (0, 0)))
    x_tm = jnp.transpose(x, (1, 0, 2)).reshape(T * Bp, D_in).astype(jnp.bfloat16)

    # ---- padded / pre-transposed weights (padding is exact: zero weights) ----
    wih0, whh0, b0 = params["layers"][0]
    weight_args = [
        _pad_gates(wih0, H, Hp).astype(jnp.bfloat16),                     # (D_in, G)
        _pad_gates(_pad_rows(whh0, H, Hp), H, Hp).astype(jnp.bfloat16),   # (Hp, G)
        _pad_gates(b0, H, Hp),                                            # (1, G) f32
    ]
    for l in range(1, n_layer):
        wih, whh, b = params["layers"][l]
        weight_args += [
            _pad_gates(_pad_rows(wih, H, Hp), H, Hp).astype(jnp.bfloat16),
            _pad_gates(_pad_rows(whh, H, Hp), H, Hp).astype(jnp.bfloat16),
            _pad_gates(b, H, Hp),
        ]
    n_w = len(weight_args)

    # ---- VMEM-aware time-block size ----
    w_bytes = sum(int(np.prod(a.shape)) * a.dtype.itemsize for a in weight_args)
    state_bytes = 2 * 2 * n_layer * Bp * Hp * 4            # hN + cN (x2 safety)
    per_t_bytes = Bp * (2 * D_in * 2        # x block, double-buffered bf16
                        + 2 * Hp * 2        # h_out block, double-buffered bf16
                        + G * 4)            # pre scratch, f32
    budget = 28 << 20
    avail = max(budget - w_bytes - state_bytes, per_t_bytes)
    tc_cap = max(1, min(128, avail // per_t_bytes))
    Tc = max(d for d in range(1, min(T, tc_cap) + 1) if T % d == 0)
    unroll = Tc if Tc <= 8 else 8
    est = w_bytes + state_bytes + per_t_bytes * Tc + (2 << 20)
    vmem_limit = int(min(max(est, 32 << 20), 64 << 20))

    kernel = _make_recurrent_kernel(n_layer=n_layer, B=Bp, H=Hp, Tc=Tc,
                                    unroll=unroll)

    in_specs = [pl.BlockSpec((Tc * Bp, D_in), lambda i: (i, 0))]
    in_specs += [pl.BlockSpec(memory_space=pl.ANY)] * n_w     # weights: raw HBM refs
    scratch_shapes = [pltpu.VMEM((Tc * Bp, G), jnp.float32)]  # layer-0 preacts
    scratch_shapes += [pltpu.VMEM(a.shape, a.dtype) for a in weight_args]
    scratch_shapes += [pltpu.SemaphoreType.DMA]               # weight-staging DMA

    h_out, h_n, c_n = pl.pallas_call(
        kernel,
        out_shape=(
            jax.ShapeDtypeStruct((T * Bp, Hp), jnp.bfloat16),   # h_out in bf16
            jax.ShapeDtypeStruct((n_layer, Bp, Hp), jnp.float32),
            jax.ShapeDtypeStruct((n_layer, Bp, Hp), jnp.float32),
        ),
        grid_spec=pltpu.PrefetchScalarGridSpec(
            num_scalar_prefetch=0,
            grid=(T // Tc,),
            in_specs=in_specs,
            out_specs=[
                pl.BlockSpec((Tc * Bp, Hp), lambda i: (i, 0)),
                pl.BlockSpec((n_layer, Bp, Hp), lambda i: (0, 0, 0)),
                pl.BlockSpec((n_layer, Bp, Hp), lambda i: (0, 0, 0)),
            ],
            scratch_shapes=scratch_shapes,
        ),
        compiler_params=pltpu.CompilerParams(
            dimension_semantics=("arbitrary",),      # time is inherently serial
            vmem_limit_bytes=vmem_limit,
        ),
    )(x_tm, *weight_args)

    # ---- pass 3: vocab FC over all T*Bp rows (W_fc streamed once) ----
    wfc = jnp.pad(params["wfc"], ((0, Hp - H), (0, Vp - V))).astype(jnp.bfloat16)
    bfc = jnp.pad(params["bfc"], ((0, 0), (0, Vp - V)))
    logits_flat = _matmul_bias(h_out, wfc, bfc)               # (T*Bp, Vp) f32

    logits = jnp.transpose(logits_flat.reshape(T, Bp, Vp), (1, 0, 2))[:B, :, :V]
    return logits, (h_n[:, :B, :H], c_n[:, :B, :H])


# --------------------------------------------------------------------------- #
# Pure-JAX reference (PyTorch nn.LSTM + nn.Linear semantics).                  #
# --------------------------------------------------------------------------- #
def lstm_decoder_reference(emb, input_seq_emb, params, *, n_layer, d_hidden,
                           matmul_dtype=jnp.float32):
    H = d_hidden

    def mm(a, w):
        return jnp.dot(a.astype(matmul_dtype), w.astype(matmul_dtype),
                       preferred_element_type=jnp.float32)

    x = jnp.concatenate([input_seq_emb, emb], axis=-1).astype(jnp.float32)
    B, T, _ = x.shape
    h = jnp.zeros((n_layer, B, H), jnp.float32)
    c = jnp.zeros((n_layer, B, H), jnp.float32)
    outs = []
    for t in range(T):
        inp = x[:, t, :]
        hs, cs = [], []
        for l in range(n_layer):
            wih, whh, b = params["layers"][l]
            gates = mm(inp, wih) + mm(h[l], whh) + b
            i_g = jax.nn.sigmoid(gates[:, 0 * H:1 * H])
            f_g = jax.nn.sigmoid(gates[:, 1 * H:2 * H])
            g_g = jnp.tanh(gates[:, 2 * H:3 * H])
            o_g = jax.nn.sigmoid(gates[:, 3 * H:4 * H])
            c_new = f_g * c[l] + i_g * g_g
            h_new = o_g * jnp.tanh(c_new)
            hs.append(h_new)
            cs.append(c_new)
            inp = h_new
        h, c = jnp.stack(hs), jnp.stack(cs)
        outs.append(mm(inp, params["wfc"]) + params["bfc"])
    return jnp.stack(outs, axis=1), (h, c)


def init_params(key, *, d_wordvec, d_input, d_hidden, n_layer, n_vocab):
    """Weights stored pre-transposed: W_ih^T (in_l,4H), W_hh^T (H,4H),
    combined bias (1,4H) in PyTorch gate order [i,f,g,o], W_fc^T (H,V), b_fc (1,V)."""
    H = d_hidden
    k = 1.0 / np.sqrt(H)
    layers = []
    for l in range(n_layer):
        in_l = (d_wordvec + d_input) if l == 0 else H
        key, k1, k2, k3, k4 = jax.random.split(key, 5)
        wih_t = jax.random.uniform(k1, (in_l, 4 * H), jnp.float32, -k, k)
        whh_t = jax.random.uniform(k2, (H, 4 * H), jnp.float32, -k, k)
        b_ih = jax.random.uniform(k3, (1, 4 * H), jnp.float32, -k, k)
        b_hh = jax.random.uniform(k4, (1, 4 * H), jnp.float32, -k, k)
        layers.append((wih_t, whh_t, b_ih + b_hh))
    key, k5, k6 = jax.random.split(key, 3)
    wfc_t = jax.random.uniform(k5, (H, n_vocab), jnp.float32, -k, k)
    bfc = jax.random.uniform(k6, (1, n_vocab), jnp.float32, -k, k)
    return {"layers": layers, "wfc": wfc_t, "bfc": bfc}


if __name__ == "__main__":
    config = dict(d_wordvec=16, d_input=16, d_hidden=32, n_layer=2,
                  n_vocab=64, epsilon=0.1)
    B, T = 2, 8

    key = jax.random.PRNGKey(0)
    key, ke, ki = jax.random.split(key, 3)
    emb = jax.random.normal(ke, (B, T, config["d_input"]), jnp.float32)
    input_seq_emb = jax.random.normal(ki, (B, T, config["d_wordvec"]), jnp.float32)

    params = init_params(
        key,
        d_wordvec=config["d_wordvec"], d_input=config["d_input"],
        d_hidden=config["d_hidden"], n_layer=config["n_layer"],
        n_vocab=config["n_vocab"],
    )

    fwd = functools.partial(
        lstm_decoder_forward,
        params=params, n_layer=config["n_layer"], d_hidden=config["d_hidden"],
    )
    logits, (h_n, c_n) = jax.jit(fwd)(emb, input_seq_emb)
    jax.block_until_ready((logits, h_n, c_n))

    # 1) structural correctness: reference with the same bf16 matmul inputs
    bf_logits, (bf_h, bf_c) = lstm_decoder_reference(
        emb, input_seq_emb, params,
        n_layer=config["n_layer"], d_hidden=config["d_hidden"],
        matmul_dtype=jnp.bfloat16,
    )
    np.testing.assert_allclose(np.asarray(logits), np.asarray(bf_logits), rtol=2e-3, atol=2e-3)
    np.testing.assert_allclose(np.asarray(h_n), np.asarray(bf_h), rtol=2e-3, atol=2e-3)
    np.testing.assert_allclose(np.asarray(c_n), np.asarray(bf_c), rtol=2e-3, atol=2e-3)

    # 2) semantic fidelity vs full-f32 PyTorch-style reference (bf16 matmul tol)
    f32_logits, (f32_h, f32_c) = lstm_decoder_reference(
        emb, input_seq_emb, params,
        n_layer=config["n_layer"], d_hidden=config["d_hidden"],
    )
    np.testing.assert_allclose(np.asarray(logits), np.asarray(f32_logits), rtol=1e-1, atol=1e-1)
    np.testing.assert_allclose(np.asarray(h_n), np.asarray(f32_h), rtol=1e-1, atol=1e-1)
    np.testing.assert_allclose(np.asarray(c_n), np.asarray(f32_c), rtol=1e-1, atol=1e-1)

    print("KERNEL_OK")
</pallas_src>

<mosaic_0001>
module attributes {stable_mosaic.version = 11 : i64} {
  func.func @_matmul_bias_kernel(%arg0: i32, %arg1: i32, %arg2: memref<64x128xbf16, #tpu.memory_space<vmem>>, %arg3: memref<128x128xbf16, #tpu.memory_space<vmem>>, %arg4: memref<1x128xf32, #tpu.memory_space<vmem>>, %arg5: memref<64x128xf32, #tpu.memory_space<vmem>>) attributes {dimension_semantics = [#tpu.dimension_semantics<parallel>, #tpu.dimension_semantics<arbitrary>], iteration_bounds = array<i64: 1, 1>, scalar_prefetch = 0 : i64, scratch_operands = 0 : i64, tpu.core_type = #tpu.core_type<tc>, window_params = [{transform_indices = @transform_0, window_bounds = array<i64: 64, 128>}, {transform_indices = @transform_1, window_bounds = array<i64: 128, 128>}, {transform_indices = @transform_2, window_bounds = array<i64: 1, 128>}, {transform_indices = @transform_3, window_bounds = array<i64: 64, 128>}]} {
    %c0 = arith.constant 0 : index
    %c0_0 = arith.constant 0 : index
    %0 = vector.load %arg2[%c0, %c0_0] : memref<64x128xbf16, #tpu.memory_space<vmem>>, vector<64x128xbf16>
    %c0_1 = arith.constant 0 : index
    %c0_2 = arith.constant 0 : index
    %1 = vector.load %arg3[%c0_1, %c0_2] : memref<128x128xbf16, #tpu.memory_space<vmem>>, vector<128x128xbf16>
    %cst = arith.constant dense<0.000000e+00> : vector<64x128xf32>
    %2 = tpu.matmul %0, %1, %cst {dimension_numbers = #tpu.dot_dimension_numbers<[1], [0], [0], [1], [0, 0, 1, 1], [], []>} : vector<64x128xbf16>, vector<128x128xbf16>, vector<64x128xf32> -> vector<64x128xf32>
    %c0_3 = arith.constant 0 : index
    %c0_4 = arith.constant 0 : index
    %3 = vector.load %arg4[%c0_3, %c0_4] : memref<1x128xf32, #tpu.memory_space<vmem>>, vector<1x128xf32>
    %4 = vector.broadcast %3 : vector<1x128xf32> to vector<64x128xf32>
    %5 = arith.addf %2, %4 : vector<64x128xf32>
    %c0_5 = arith.constant 0 : index
    %c0_6 = arith.constant 0 : index
    %6 = vector.load %arg5[%c0_5, %c0_6] : memref<64x128xf32, #tpu.memory_space<vmem>>, vector<64x128xf32>
    tpu.vector_store %arg5[%c0_5, %c0_6], %5 {strides = array<i32>} : memref<64x128xf32, #tpu.memory_space<vmem>>, vector<64x128xf32>,
    return
  }
  func.func @transform_0(%arg0: i32, %arg1: i32) -> (i32, i32) {
    %c0_i32 = arith.constant 0 : i32
    %c0_i32_0 = arith.constant 0 : i32
    return %arg1, %c0_i32 : i32, i32
  }
  func.func @transform_1(%arg0: i32, %arg1: i32) -> (i32, i32) {
    %c0_i32 = arith.constant 0 : i32
    %c0_i32_0 = arith.constant 0 : i32
    return %c0_i32, %arg0 : i32, i32
  }
  func.func @transform_2(%arg0: i32, %arg1: i32) -> (i32, i32) {
    %c0_i32 = arith.constant 0 : i32
    %c0_i32_0 = arith.constant 0 : i32
    return %c0_i32, %arg0 : i32, i32
  }
  func.func @transform_3(%arg0: i32, %arg1: i32) -> (i32, i32) {
    %c0_i32 = arith.constant 0 : i32
    return %arg1, %arg0 : i32, i32
  }
}

module attributes {stable_mosaic.version = 11 : i64} {
  func.func @kernel(%arg0: i32, %arg1: memref<64x32xbf16, #tpu.memory_space<vmem>>, %arg2: memref<32x512xbf16, #tpu.memory_space<any>>, %arg3: memref<128x512xbf16, #tpu.memory_space<any>>, %arg4: memref<1x512xf32, #tpu.memory_space<any>>, %arg5: memref<128x512xbf16, #tpu.memory_space<any>>, %arg6: memref<128x512xbf16, #tpu.memory_space<any>>, %arg7: memref<1x512xf32, #tpu.memory_space<any>>, %arg8: memref<64x128xbf16, #tpu.memory_space<vmem>>, %arg9: memref<2x8x128xf32, #tpu.memory_space<vmem>>, %arg10: memref<2x8x128xf32, #tpu.memory_space<vmem>>, %arg11: memref<64x512xf32, #tpu.memory_space<vmem>>, %arg12: memref<32x512xbf16, #tpu.memory_space<vmem>>, %arg13: memref<128x512xbf16, #tpu.memory_space<vmem>>, %arg14: memref<1x512xf32, #tpu.memory_space<vmem>>, %arg15: memref<128x512xbf16, #tpu.memory_space<vmem>>, %arg16: memref<128x512xbf16, #tpu.memory_space<vmem>>, %arg17: memref<1x512xf32, #tpu.memory_space<vmem>>, %arg18: memref<!tpu.dma_semaphore, #tpu.memory_space<semaphore_mem>>) attributes {dimension_semantics = [#tpu.dimension_semantics<arbitrary>], iteration_bounds = array<i64: 1>, scalar_prefetch = 0 : i64, scratch_operands = 8 : i64, tpu.core_type = #tpu.core_type<tc>, window_params = [{transform_indices = @transform_0, window_bounds = array<i64: 64, 32>}, {}, {}, {}, {}, {}, {}, {transform_indices = @transform_7, window_bounds = array<i64: 64, 128>}, {pipeline_mode = #tpu.pipeline_mode<synchronous>, transform_indices = @transform_8, window_bounds = array<i64: 2, 8, 128>}, {pipeline_mode = #tpu.pipeline_mode<synchronous>, transform_indices = @transform_9, window_bounds = array<i64: 2, 8, 128>}]} {
    %c0_i32 = arith.constant 0 : i32
    %0 = arith.cmpi eq, %arg0, %c0_i32 : i32
    %1 = arith.extui %0 : i1 to i32
    %c0_i32_0 = arith.constant 0 : i32
    %2 = arith.cmpi ne, %1, %c0_i32_0 : i32
    scf.if %2 {
      %cst_136 = arith.constant 0.000000e+00 : f32
      %564 = vector.broadcast %cst_136 : f32 to vector<2x8x128xf32>
      %c0_137 = arith.constant 0 : index
      %c0_138 = arith.constant 0 : index
      %c0_139 = arith.constant 0 : index
      %565 = vector.load %arg9[%c0_137, %c0_138, %c0_139] : memref<2x8x128xf32, #tpu.memory_space<vmem>>, vector<2x8x128xf32>
      tpu.vector_store %arg9[%c0_137, %c0_138, %c0_139], %564 {strides = array<i32>} : memref<2x8x128xf32, #tpu.memory_space<vmem>>, vector<2x8x128xf32>,
      %cst_140 = arith.constant 0.000000e+00 : f32
      %566 = vector.broadcast %cst_140 : f32 to vector<2x8x128xf32>
      %c0_141 = arith.constant 0 : index
      %c0_142 = arith.constant 0 : index
      %c0_143 = arith.constant 0 : index
      %567 = vector.load %arg10[%c0_141, %c0_142, %c0_143] : memref<2x8x128xf32, #tpu.memory_space<vmem>>, vector<2x8x128xf32>
      tpu.vector_store %arg10[%c0_141, %c0_142, %c0_143], %566 {strides = array<i32>} : memref<2x8x128xf32, #tpu.memory_space<vmem>>, vector<2x8x128xf32>,
      tpu.enqueue_dma source(%arg2 : memref<32x512xbf16, #tpu.memory_space<any>>) target(%arg12 : memref<32x512xbf16, #tpu.memory_space<vmem>>) target_semaphore(%arg18 : memref<!tpu.dma_semaphore, #tpu.memory_space<semaphore_mem>>)
      tpu.wait_dma2 semaphore(%arg18 : memref<!tpu.dma_semaphore, #tpu.memory_space<semaphore_mem>>) src(%arg2 : memref<32x512xbf16, #tpu.memory_space<any>>) dst(%arg12 : memref<32x512xbf16, #tpu.memory_space<vmem>>)
      tpu.enqueue_dma source(%arg3 : memref<128x512xbf16, #tpu.memory_space<any>>) target(%arg13 : memref<128x512xbf16, #tpu.memory_space<vmem>>) target_semaphore(%arg18 : memref<!tpu.dma_semaphore, #tpu.memory_space<semaphore_mem>>)
      tpu.wait_dma2 semaphore(%arg18 : memref<!tpu.dma_semaphore, #tpu.memory_space<semaphore_mem>>) src(%arg3 : memref<128x512xbf16, #tpu.memory_space<any>>) dst(%arg13 : memref<128x512xbf16, #tpu.memory_space<vmem>>)
      tpu.enqueue_dma source(%arg4 : memref<1x512xf32, #tpu.memory_space<any>>) target(%arg14 : memref<1x512xf32, #tpu.memory_space<vmem>>) target_semaphore(%arg18 : memref<!tpu.dma_semaphore, #tpu.memory_space<semaphore_mem>>)
      tpu.wait_dma2 semaphore(%arg18 : memref<!tpu.dma_semaphore, #tpu.memory_space<semaphore_mem>>) src(%arg4 : memref<1x512xf32, #tpu.memory_space<any>>) dst(%arg14 : memref<1x512xf32, #tpu.memory_space<vmem>>)
      tpu.enqueue_dma source(%arg5 : memref<128x512xbf16, #tpu.memory_space<any>>) target(%arg15 : memref<128x512xbf16, #tpu.memory_space<vmem>>) target_semaphore(%arg18 : memref<!tpu.dma_semaphore, #tpu.memory_space<semaphore_mem>>)
      tpu.wait_dma2 semaphore(%arg18 : memref<!tpu.dma_semaphore, #tpu.memory_space<semaphore_mem>>) src(%arg5 : memref<128x512xbf16, #tpu.memory_space<any>>) dst(%arg15 : memref<128x512xbf16, #tpu.memory_space<vmem>>)
      tpu.enqueue_dma source(%arg6 : memref<128x512xbf16, #tpu.memory_space<any>>) target(%arg16 : memref<128x512xbf16, #tpu.memory_space<vmem>>) target_semaphore(%arg18 : memref<!tpu.dma_semaphore, #tpu.memory_space<semaphore_mem>>)
      tpu.wait_dma2 semaphore(%arg18 : memref<!tpu.dma_semaphore, #tpu.memory_space<semaphore_mem>>) src(%arg6 : memref<128x512xbf16, #tpu.memory_space<any>>) dst(%arg16 : memref<128x512xbf16, #tpu.memory_space<vmem>>)
      tpu.enqueue_dma source(%arg7 : memref<1x512xf32, #tpu.memory_space<any>>) target(%arg17 : memref<1x512xf32, #tpu.memory_space<vmem>>) target_semaphore(%arg18 : memref<!tpu.dma_semaphore, #tpu.memory_space<semaphore_mem>>)
      tpu.wait_dma2 semaphore(%arg18 : memref<!tpu.dma_semaphore, #tpu.memory_space<semaphore_mem>>) src(%arg7 : memref<1x512xf32, #tpu.memory_space<any>>) dst(%arg17 : memref<1x512xf32, #tpu.memory_space<vmem>>)
    } else {
    }
    %c0 = arith.constant 0 : index
    %c0_1 = arith.constant 0 : index
    %3 = vector.load %arg12[%c0, %c0_1] : memref<32x512xbf16, #tpu.memory_space<vmem>>, vector<32x512xbf16>
    %c0_2 = arith.constant 0 : index
    %c0_3 = arith.constant 0 : index
    %4 = vector.load %arg13[%c0_2, %c0_3] : memref<128x512xbf16, #tpu.memory_space<vmem>>, vector<128x512xbf16>
    %c0_4 = arith.constant 0 : index
    %c0_5 = arith.constant 0 : index
    %5 = vector.load %arg14[%c0_4, %c0_5] : memref<1x512xf32, #tpu.memory_space<vmem>>, vector<1x512xf32>
    %c0_6 = arith.constant 0 : index
    %c0_7 = arith.constant 0 : index
    %6 = vector.load %arg15[%c0_6, %c0_7] : memref<128x512xbf16, #tpu.memory_space<vmem>>, vector<128x512xbf16>
    %c0_8 = arith.constant 0 : index
    %c0_9 = arith.constant 0 : index
    %7 = vector.load %arg16[%c0_8, %c0_9] : memref<128x512xbf16, #tpu.memory_space<vmem>>, vector<128x512xbf16>
    %c0_10 = arith.constant 0 : index
    %c0_11 = arith.constant 0 : index
    %8 = vector.load %arg17[%c0_10, %c0_11] : memref<1x512xf32, #tpu.memory_space<vmem>>, vector<1x512xf32>
    %9 = vector.shape_cast %8 : vector<1x512xf32> to vector<1x512xf32>
    %10 = vector.broadcast %9 : vector<1x512xf32> to vector<8x512xf32>
    %c0_12 = arith.constant 0 : index
    %c0_13 = arith.constant 0 : index
    %11 = vector.load %arg1[%c0_12, %c0_13] : memref<64x32xbf16, #tpu.memory_space<vmem>>, vector<64x32xbf16>
    %cst = arith.constant dense<0.000000e+00> : vector<64x512xf32>
    %12 = tpu.matmul %11, %3, %cst {dimension_numbers = #tpu.dot_dimension_numbers<[1], [0], [0], [1], [0, 0, 1, 1], [], []>} : vector<64x32xbf16>, vector<32x512xbf16>, vector<64x512xf32> -> vector<64x512xf32>
    %13 = vector.broadcast %5 : vector<1x512xf32> to vector<64x512xf32>
    %14 = arith.addf %12, %13 : vector<64x512xf32>
    %c0_14 = arith.constant 0 : index
    %c0_15 = arith.constant 0 : index
    %15 = vector.load %arg11[%c0_14, %c0_15] : memref<64x512xf32, #tpu.memory_space<vmem>>, vector<64x512xf32>
    tpu.vector_store %arg11[%c0_14, %c0_15], %14 {strides = array<i32>} : memref<64x512xf32, #tpu.memory_space<vmem>>, vector<64x512xf32>,
    %c0_16 = arith.constant 0 : index
    %c0_17 = arith.constant 0 : index
    %c0_18 = arith.constant 0 : index
    %16 = vector.load %arg9[%c0_16, %c0_17, %c0_18] : memref<2x8x128xf32, #tpu.memory_space<vmem>>, vector<1x8x128xf32>
    %17 = vector.shape_cast %16 : vector<1x8x128xf32> to vector<8x128xf32>
    %c1 = arith.constant 1 : index
    %c0_19 = arith.constant 0 : index
    %c0_20 = arith.constant 0 : index
    %18 = vector.load %arg9[%c1, %c0_19, %c0_20] : memref<2x8x128xf32, #tpu.memory_space<vmem>>, vector<1x8x128xf32>
    %19 = vector.shape_cast %18 : vector<1x8x128xf32> to vector<8x128xf32>
    %c0_21 = arith.constant 0 : index
    %c0_22 = arith.constant 0 : index
    %c0_23 = arith.constant 0 : index
    %20 = vector.load %arg10[%c0_21, %c0_22, %c0_23] : memref<2x8x128xf32, #tpu.memory_space<vmem>>, vector<1x8x128xf32>
    %21 = vector.shape_cast %20 : vector<1x8x128xf32> to vector<8x128xf32>
    %c1_24 = arith.constant 1 : index
    %c0_25 = arith.constant 0 : index
    %c0_26 = arith.constant 0 : index
    %22 = vector.load %arg10[%c1_24, %c0_25, %c0_26] : memref<2x8x128xf32, #tpu.memory_space<vmem>>, vector<1x8x128xf32>
    %23 = vector.shape_cast %22 : vector<1x8x128xf32> to vector<8x128xf32>
    %c0_i32_27 = arith.constant 0 : i32
    %c8_i32 = arith.constant 8 : i32
    %24 = arith.muli %c0_i32_27, %c8_i32 : i32
    %25 = tpu.assume_multiple %24, 8 : i32
    %26 = arith.index_cast %25 : i32 to index
    %c0_28 = arith.constant 0 : index
    %27 = vector.load %arg11[%26, %c0_28] : memref<64x512xf32, #tpu.memory_space<vmem>>, vector<8x512xf32>
    %28 = arith.truncf %17 : vector<8x128xf32> to vector<8x128xbf16>
    %cst_29 = arith.constant dense<0.000000e+00> : vector<8x512xf32>
    %29 = tpu.matmul %28, %4, %cst_29 {dimension_numbers = #tpu.dot_dimension_numbers<[1], [0], [0], [1], [0, 0, 1, 1], [], []>} : vector<8x128xbf16>, vector<128x512xbf16>, vector<8x512xf32> -> vector<8x512xf32>
    %30 = arith.addf %27, %29 : vector<8x512xf32>
    %31 = vector.extract_strided_slice %30 {offsets = [0, 0], sizes = [8, 128], strides = [1, 1]} : vector<8x512xf32> to vector<8x128xf32>
    %32 = arith.negf %31 : vector<8x128xf32>
    %33 = math.exp %32 : vector<8x128xf32>
    %cst_30 = arith.constant 1.000000e+00 : f32
    %34 = vector.broadcast %cst_30 : f32 to vector<8x128xf32>
    %35 = arith.addf %34, %33 : vector<8x128xf32>
    %36 = arith.divf %34, %35 : vector<8x128xf32>
    %37 = vector.extract_strided_slice %30 {offsets = [0, 128], sizes = [8, 128], strides = [1, 1]} : vector<8x512xf32> to vector<8x128xf32>
    %38 = arith.negf %37 : vector<8x128xf32>
    %39 = math.exp %38 : vector<8x128xf32>
    %cst_31 = arith.constant 1.000000e+00 : f32
    %40 = vector.broadcast %cst_31 : f32 to vector<8x128xf32>
    %41 = arith.addf %40, %39 : vector<8x128xf32>
    %42 = arith.divf %40, %41 : vector<8x128xf32>
    %43 = vector.extract_strided_slice %30 {offsets = [0, 256], sizes = [8, 128], strides = [1, 1]} : vector<8x512xf32> to vector<8x128xf32>
    %44 = math.tanh %43 : vector<8x128xf32>
    %45 = vector.extract_strided_slice %30 {offsets = [0, 384], sizes = [8, 128], strides = [1, 1]} : vector<8x512xf32> to vector<8x128xf32>
    %46 = arith.negf %45 : vector<8x128xf32>
    %47 = math.exp %46 : vector<8x128xf32>
    %cst_32 = arith.constant 1.000000e+00 : f32
    %48 = vector.broadcast %cst_32 : f32 to vector<8x128xf32>
    %49 = arith.addf %48, %47 : vector<8x128xf32>
    %50 = arith.divf %48, %49 : vector<8x128xf32>
    %51 = arith.mulf %42, %21 : vector<8x128xf32>
    %52 = arith.mulf %36, %44 : vector<8x128xf32>
    %53 = arith.addf %51, %52 : vector<8x128xf32>
    %54 = math.tanh %53 : vector<8x128xf32>
    %55 = arith.mulf %50, %54 : vector<8x128xf32>
    %56 = arith.truncf %55 : vector<8x128xf32> to vector<8x128xbf16>
    %cst_33 = arith.constant dense<0.000000e+00> : vector<8x512xf32>
    %57 = tpu.matmul %56, %6, %cst_33 {dimension_numbers = #tpu.dot_dimension_numbers<[1], [0], [0], [1], [0, 0, 1, 1], [], []>} : vector<8x128xbf16>, vector<128x512xbf16>, vector<8x512xf32> -> vector<8x512xf32>
    %58 = arith.truncf %19 : vector<8x128xf32> to vector<8x128xbf16>
    %cst_34 = arith.constant dense<0.000000e+00> : vector<8x512xf32>
    %59 = tpu.matmul %58, %7, %cst_34 {dimension_numbers = #tpu.dot_dimension_numbers<[1], [0], [0], [1], [0, 0, 1, 1], [], []>} : vector<8x128xbf16>, vector<128x512xbf16>, vector<8x512xf32> -> vector<8x512xf32>
    %60 = arith.addf %57, %59 : vector<8x512xf32>
    %61 = arith.addf %60, %10 : vector<8x512xf32>
    %62 = vector.extract_strided_slice %61 {offsets = [0, 0], sizes = [8, 128], strides = [1, 1]} : vector<8x512xf32> to vector<8x128xf32>
    %63 = arith.negf %62 : vector<8x128xf32>
    %64 = math.exp %63 : vector<8x128xf32>
    %cst_35 = arith.constant 1.000000e+00 : f32
    %65 = vector.broadcast %cst_35 : f32 to vector<8x128xf32>
    %66 = arith.addf %65, %64 : vector<8x128xf32>
    %67 = arith.divf %65, %66 : vector<8x128xf32>
    %68 = vector.extract_strided_slice %61 {offsets = [0, 128], sizes = [8, 128], strides = [1, 1]} : vector<8x512xf32> to vector<8x128xf32>
    %69 = arith.negf %68 : vector<8x128xf32>
    %70 = math.exp %69 : vector<8x128xf32>
    %cst_36 = arith.constant 1.000000e+00 : f32
    %71 = vector.broadcast %cst_36 : f32 to vector<8x128xf32>
    %72 = arith.addf %71, %70 : vector<8x128xf32>
    %73 = arith.divf %71, %72 : vector<8x128xf32>
    %74 = vector.extract_strided_slice %61 {offsets = [0, 256], sizes = [8, 128], strides = [1, 1]} : vector<8x512xf32> to vector<8x128xf32>
    %75 = math.tanh %74 : vector<8x128xf32>
    %76 = vector.extract_strided_slice %61 {offsets = [0, 384], sizes = [8, 128], strides = [1, 1]} : vector<8x512xf32> to vector<8x128xf32>
    %77 = arith.negf %76 : vector<8x128xf32>
    %78 = math.exp %77 : vector<8x128xf32>
    %cst_37 = arith.constant 1.000000e+00 : f32
    %79 = vector.broadcast %cst_37 : f32 to vector<8x128xf32>
    %80 = arith.addf %79, %78 : vector<8x128xf32>
    %81 = arith.divf %79, %80 : vector<8x128xf32>
    %82 = arith.mulf %73, %23 : vector<8x128xf32>
    %83 = arith.mulf %67, %75 : vector<8x128xf32>
    %84 = arith.addf %82, %83 : vector<8x128xf32>
    %85 = math.tanh %84 : vector<8x128xf32>
    %86 = arith.mulf %81, %85 : vector<8x128xf32>
    %87 = arith.truncf %86 : vector<8x128xf32> to vector<8x128xbf16>
    %88 = arith.index_cast %25 : i32 to index
    %c0_38 = arith.constant 0 : index
    %89 = vector.load %arg8[%88, %c0_38] : memref<64x128xbf16, #tpu.memory_space<vmem>>, vector<8x128xbf16>
    tpu.vector_store %arg8[%88, %c0_38], %87 {strides = array<i32>} : memref<64x128xbf16, #tpu.memory_space<vmem>>, vector<8x128xbf16>,
    %c1_i32 = arith.constant 1 : i32
    %c8_i32_39 = arith.constant 8 : i32
    %90 = arith.muli %c1_i32, %c8_i32_39 : i32
    %91 = tpu.assume_multiple %90, 8 : i32
    %92 = arith.index_cast %91 : i32 to index
    %c0_40 = arith.constant 0 : index
    %93 = vector.load %arg11[%92, %c0_40] : memref<64x512xf32, #tpu.memory_space<vmem>>, vector<8x512xf32>
    %94 = arith.truncf %55 : vector<8x128xf32> to vector<8x128xbf16>
    %cst_41 = arith.constant dense<0.000000e+00> : vector<8x512xf32>
    %95 = tpu.matmul %94, %4, %cst_41 {dimension_numbers = #tpu.dot_dimension_numbers<[1], [0], [0], [1], [0, 0, 1, 1], [], []>} : vector<8x128xbf16>, vector<128x512xbf16>, vector<8x512xf32> -> vector<8x512xf32>
    %96 = arith.addf %93, %95 : vector<8x512xf32>
    %97 = vector.extract_strided_slice %96 {offsets = [0, 0], sizes = [8, 128], strides = [1, 1]} : vector<8x512xf32> to vector<8x128xf32>
    %98 = arith.negf %97 : vector<8x128xf32>
    %99 = math.exp %98 : vector<8x128xf32>
    %cst_42 = arith.constant 1.000000e+00 : f32
    %100 = vector.broadcast %cst_42 : f32 to vector<8x128xf32>
    %101 = arith.addf %100, %99 : vector<8x128xf32>
    %102 = arith.divf %100, %101 : vector<8x128xf32>
    %103 = vector.extract_strided_slice %96 {offsets = [0, 128], sizes = [8, 128], strides = [1, 1]} : vector<8x512xf32> to vector<8x128xf32>
    %104 = arith.negf %103 : vector<8x128xf32>
    %105 = math.exp %104 : vector<8x128xf32>
    %cst_43 = arith.constant 1.000000e+00 : f32
    %106 = vector.broadcast %cst_43 : f32 to vector<8x128xf32>
    %107 = arith.addf %106, %105 : vector<8x128xf32>
    %108 = arith.divf %106, %107 : vector<8x128xf32>
    %109 = vector.extract_strided_slice %96 {offsets = [0, 256], sizes = [8, 128], strides = [1, 1]} : vector<8x512xf32> to vector<8x128xf32>
    %110 = math.tanh %109 : vector<8x128xf32>
    %111 = vector.extract_strided_slice %96 {offsets = [0, 384], sizes = [8, 128], strides = [1, 1]} : vector<8x512xf32> to vector<8x128xf32>
    %112 = arith.negf %111 : vector<8x128xf32>
    %113 = math.exp %112 : vector<8x128xf32>
    %cst_44 = arith.constant 1.000000e+00 : f32
    %114 = vector.broadcast %cst_44 : f32 to vector<8x128xf32>
    %115 = arith.addf %114, %113 : vector<8x128xf32>
    %116 = arith.divf %114, %115 : vector<8x128xf32>
    %117 = arith.mulf %108, %53 : vector<8x128xf32>
    %118 = arith.mulf %102, %110 : vector<8x128xf32>
    %119 = arith.addf %117, %118 : vector<8x128xf32>
    %120 = math.tanh %119 : vector<8x128xf32>
    %121 = arith.mulf %116, %120 : vector<8x128xf32>
    %122 = arith.truncf %121 : vector<8x128xf32> to vector<8x128xbf16>
    %cst_45 = arith.constant dense<0.000000e+00> : vector<8x512xf32>
    %123 = tpu.matmul %122, %6, %cst_45 {dimension_numbers = #tpu.dot_dimension_numbers<[1], [0], [0], [1], [0, 0, 1, 1], [], []>} : vector<8x128xbf16>, vector<128x512xbf16>, vector<8x512xf32> -> vector<8x512xf32>
    %124 = arith.truncf %86 : vector<8x128xf32> to vector<8x128xbf16>
    %cst_46 = arith.constant dense<0.000000e+00> : vector<8x512xf32>
    %125 = tpu.matmul %124, %7, %cst_46 {dimension_numbers = #tpu.dot_dimension_numbers<[1], [0], [0], [1], [0, 0, 1, 1], [], []>} : vector<8x128xbf16>, vector<128x512xbf16>, vector<8x512xf32> -> vector<8x512xf32>
    %126 = arith.addf %123, %125 : vector<8x512xf32>
    %127 = arith.addf %126, %10 : vector<8x512xf32>
    %128 = vector.extract_strided_slice %127 {offsets = [0, 0], sizes = [8, 128], strides = [1, 1]} : vector<8x512xf32> to vector<8x128xf32>
    %129 = arith.negf %128 : vector<8x128xf32>
    %130 = math.exp %129 : vector<8x128xf32>
    %cst_47 = arith.constant 1.000000e+00 : f32
    %131 = vector.broadcast %cst_47 : f32 to vector<8x128xf32>
    %132 = arith.addf %131, %130 : vector<8x128xf32>
    %133 = arith.divf %131, %132 : vector<8x128xf32>
    %134 = vector.extract_strided_slice %127 {offsets = [0, 128], sizes = [8, 128], strides = [1, 1]} : vector<8x512xf32> to vector<8x128xf32>
    %135 = arith.negf %134 : vector<8x128xf32>
    %136 = math.exp %135 : vector<8x128xf32>
    %cst_48 = arith.constant 1.000000e+00 : f32
    %137 = vector.broadcast %cst_48 : f32 to vector<8x128xf32>
    %138 = arith.addf %137, %136 : vector<8x128xf32>
    %139 = arith.divf %137, %138 : vector<8x128xf32>
    %140 = vector.extract_strided_slice %127 {offsets = [0, 256], sizes = [8, 128], strides = [1, 1]} : vector<8x512xf32> to vector<8x128xf32>
    %141 = math.tanh %140 : vector<8x128xf32>
    %142 = vector.extract_strided_slice %127 {offsets = [0, 384], sizes = [8, 128], strides = [1, 1]} : vector<8x512xf32> to vector<8x128xf32>
    %143 = arith.negf %142 : vector<8x128xf32>
    %144 = math.exp %143 : vector<8x128xf32>
    %cst_49 = arith.constant 1.000000e+00 : f32
    %145 = vector.broadcast %cst_49 : f32 to vector<8x128xf32>
    %146 = arith.addf %145, %144 : vector<8x128xf32>
    %147 = arith.divf %145, %146 : vector<8x128xf32>
    %148 = arith.mulf %139, %84 : vector<8x128xf32>
    %149 = arith.mulf %133, %141 : vector<8x128xf32>
    %150 = arith.addf %148, %149 : vector<8x128xf32>
    %151 = math.tanh %150 : vector<8x128xf32>
    %152 = arith.mulf %147, %151 : vector<8x128xf32>
    %153 = arith.truncf %152 : vector<8x128xf32> to vector<8x128xbf16>
    %154 = arith.index_cast %91 : i32 to index
    %c0_50 = arith.constant 0 : index
    %155 = vector.load %arg8[%154, %c0_50] : memref<64x128xbf16, #tpu.memory_space<vmem>>, vector<8x128xbf16>
    tpu.vector_store %arg8[%154, %c0_50], %153 {strides = array<i32>} : memref<64x128xbf16, #tpu.memory_space<vmem>>, vector<8x128xbf16>,
    %c2_i32 = arith.constant 2 : i32
    %c8_i32_51 = arith.constant 8 : i32
    %156 = arith.muli %c2_i32, %c8_i32_51 : i32
    %157 = tpu.assume_multiple %156, 8 : i32
    %158 = arith.index_cast %157 : i32 to index
    %c0_52 = arith.constant 0 : index
    %159 = vector.load %arg11[%158, %c0_52] : memref<64x512xf32, #tpu.memory_space<vmem>>, vector<8x512xf32>
    %160 = arith.truncf %121 : vector<8x128xf32> to vector<8x128xbf16>
    %cst_53 = arith.constant dense<0.000000e+00> : vector<8x512xf32>
    %161 = tpu.matmul %160, %4, %cst_53 {dimension_numbers = #tpu.dot_dimension_numbers<[1], [0], [0], [1], [0, 0, 1, 1], [], []>} : vector<8x128xbf16>, vector<128x512xbf16>, vector<8x512xf32> -> vector<8x512xf32>
    %162 = arith.addf %159, %161 : vector<8x512xf32>
    %163 = vector.extract_strided_slice %162 {offsets = [0, 0], sizes = [8, 128], strides = [1, 1]} : vector<8x512xf32> to vector<8x128xf32>
    %164 = arith.negf %163 : vector<8x128xf32>
    %165 = math.exp %164 : vector<8x128xf32>
    %cst_54 = arith.constant 1.000000e+00 : f32
    %166 = vector.broadcast %cst_54 : f32 to vector<8x128xf32>
    %167 = arith.addf %166, %165 : vector<8x128xf32>
    %168 = arith.divf %166, %167 : vector<8x128xf32>
    %169 = vector.extract_strided_slice %162 {offsets = [0, 128], sizes = [8, 128], strides = [1, 1]} : vector<8x512xf32> to vector<8x128xf32>
    %170 = arith.negf %169 : vector<8x128xf32>
    %171 = math.exp %170 : vector<8x128xf32>
    %cst_55 = arith.constant 1.000000e+00 : f32
    %172 = vector.broadcast %cst_55 : f32 to vector<8x128xf32>
    %173 = arith.addf %172, %171 : vector<8x128xf32>
    %174 = arith.divf %172, %173 : vector<8x128xf32>
    %175 = vector.extract_strided_slice %162 {offsets = [0, 256], sizes = [8, 128], strides = [1, 1]} : vector<8x512xf32> to vector<8x128xf32>
    %176 = math.tanh %175 : vector<8x128xf32>
    %177 = vector.extract_strided_slice %162 {offsets = [0, 384], sizes = [8, 128], strides = [1, 1]} : vector<8x512xf32> to vector<8x128xf32>
    %178 = arith.negf %177 : vector<8x128xf32>
    %179 = math.exp %178 : vector<8x128xf32>
    %cst_56 = arith.constant 1.000000e+00 : f32
    %180 = vector.broadcast %cst_56 : f32 to vector<8x128xf32>
    %181 = arith.addf %180, %179 : vector<8x128xf32>
    %182 = arith.divf %180, %181 : vector<8x128xf32>
    %183 = arith.mulf %174, %119 : vector<8x128xf32>
    %184 = arith.mulf %168, %176 : vector<8x128xf32>
    %185 = arith.addf %183, %184 : vector<8x128xf32>
    %186 = math.tanh %185 : vector<8x128xf32>
    %187 = arith.mulf %182, %186 : vector<8x128xf32>
    %188 = arith.truncf %187 : vector<8x128xf32> to vector<8x128xbf16>
    %cst_57 = arith.constant dense<0.000000e+00> : vector<8x512xf32>
    %189 = tpu.matmul %188, %6, %cst_57 {dimension_numbers = #tpu.dot_dimension_numbers<[1], [0], [0], [1], [0, 0, 1, 1], [], []>} : vector<8x128xbf16>, vector<128x512xbf16>, vector<8x512xf32> -> vector<8x512xf32>
    %190 = arith.truncf %152 : vector<8x128xf32> to vector<8x128xbf16>
    %cst_58 = arith.constant dense<0.000000e+00> : vector<8x512xf32>
    %191 = tpu.matmul %190, %7, %cst_58 {dimension_numbers = #tpu.dot_dimension_numbers<[1], [0], [0], [1], [0, 0, 1, 1], [], []>} : vector<8x128xbf16>, vector<128x512xbf16>, vector<8x512xf32> -> vector<8x512xf32>
    %192 = arith.addf %189, %191 : vector<8x512xf32>
    %193 = arith.addf %192, %10 : vector<8x512xf32>
    %194 = vector.extract_strided_slice %193 {offsets = [0, 0], sizes = [8, 128], strides = [1, 1]} : vector<8x512xf32> to vector<8x128xf32>
    %195 = arith.negf %194 : vector<8x128xf32>
    %196 = math.exp %195 : vector<8x128xf32>
    %cst_59 = arith.constant 1.000000e+00 : f32
    %197 = vector.broadcast %cst_59 : f32 to vector<8x128xf32>
    %198 = arith.addf %197, %196 : vector<8x128xf32>
    %199 = arith.divf %197, %198 : vector<8x128xf32>
    %200 = vector.extract_strided_slice %193 {offsets = [0, 128], sizes = [8, 128], strides = [1, 1]} : vector<8x512xf32> to vector<8x128xf32>
    %201 = arith.negf %200 : vector<8x128xf32>
    %202 = math.exp %201 : vector<8x128xf32>
    %cst_60 = arith.constant 1.000000e+00 : f32
    %203 = vector.broadcast %cst_60 : f32 to vector<8x128xf32>
    %204 = arith.addf %203, %202 : vector<8x128xf32>
    %205 = arith.divf %203, %204 : vector<8x128xf32>
    %206 = vector.extract_strided_slice %193 {offsets = [0, 256], sizes = [8, 128], strides = [1, 1]} : vector<8x512xf32> to vector<8x128xf32>
    %207 = math.tanh %206 : vector<8x128xf32>
    %208 = vector.extract_strided_slice %193 {offsets = [0, 384], sizes = [8, 128], strides = [1, 1]} : vector<8x512xf32> to vector<8x128xf32>
    %209 = arith.negf %208 : vector<8x128xf32>
    %210 = math.exp %209 : vector<8x128xf32>
    %cst_61 = arith.constant 1.000000e+00 : f32
    %211 = vector.broadcast %cst_61 : f32 to vector<8x128xf32>
    %212 = arith.addf %211, %210 : vector<8x128xf32>
    %213 = arith.divf %211, %212 : vector<8x128xf32>
    %214 = arith.mulf %205, %150 : vector<8x128xf32>
    %215 = arith.mulf %199, %207 : vector<8x128xf32>
    %216 = arith.addf %214, %215 : vector<8x128xf32>
    %217 = math.tanh %216 : vector<8x128xf32>
    %218 = arith.mulf %213, %217 : vector<8x128xf32>
    %219 = arith.truncf %218 : vector<8x128xf32> to vector<8x128xbf16>
    %220 = arith.index_cast %157 : i32 to index
    %c0_62 = arith.constant 0 : index
    %221 = vector.load %arg8[%220, %c0_62] : memref<64x128xbf16, #tpu.memory_space<vmem>>, vector<8x128xbf16>
    tpu.vector_store %arg8[%220, %c0_62], %219 {strides = array<i32>} : memref<64x128xbf16, #tpu.memory_space<vmem>>, vector<8x128xbf16>,
    %c3_i32 = arith.constant 3 : i32
    %c8_i32_63 = arith.constant 8 : i32
    %222 = arith.muli %c3_i32, %c8_i32_63 : i32
    %223 = tpu.assume_multiple %222, 8 : i32
    %224 = arith.index_cast %223 : i32 to index
    %c0_64 = arith.constant 0 : index
    %225 = vector.load %arg11[%224, %c0_64] : memref<64x512xf32, #tpu.memory_space<vmem>>, vector<8x512xf32>
    %226 = arith.truncf %187 : vector<8x128xf32> to vector<8x128xbf16>
    %cst_65 = arith.constant dense<0.000000e+00> : vector<8x512xf32>
    %227 = tpu.matmul %226, %4, %cst_65 {dimension_numbers = #tpu.dot_dimension_numbers<[1], [0], [0], [1], [0, 0, 1, 1], [], []>} : vector<8x128xbf16>, vector<128x512xbf16>, vector<8x512xf32> -> vector<8x512xf32>
    %228 = arith.addf %225, %227 : vector<8x512xf32>
    %229 = vector.extract_strided_slice %228 {offsets = [0, 0], sizes = [8, 128], strides = [1, 1]} : vector<8x512xf32> to vector<8x128xf32>
    %230 = arith.negf %229 : vector<8x128xf32>
    %231 = math.exp %230 : vector<8x128xf32>
    %cst_66 = arith.constant 1.000000e+00 : f32
    %232 = vector.broadcast %cst_66 : f32 to vector<8x128xf32>
    %233 = arith.addf %232, %231 : vector<8x128xf32>
    %234 = arith.divf %232, %233 : vector<8x128xf32>
    %235 = vector.extract_strided_slice %228 {offsets = [0, 128], sizes = [8, 128], strides = [1, 1]} : vector<8x512xf32> to vector<8x128xf32>
    %236 = arith.negf %235 : vector<8x128xf32>
    %237 = math.exp %236 : vector<8x128xf32>
    %cst_67 = arith.constant 1.000000e+00 : f32
    %238 = vector.broadcast %cst_67 : f32 to vector<8x128xf32>
    %239 = arith.addf %238, %237 : vector<8x128xf32>
    %240 = arith.divf %238, %239 : vector<8x128xf32>
    %241 = vector.extract_strided_slice %228 {offsets = [0, 256], sizes = [8, 128], strides = [1, 1]} : vector<8x512xf32> to vector<8x128xf32>
    %242 = math.tanh %241 : vector<8x128xf32>
    %243 = vector.extract_strided_slice %228 {offsets = [0, 384], sizes = [8, 128], strides = [1, 1]} : vector<8x512xf32> to vector<8x128xf32>
    %244 = arith.negf %243 : vector<8x128xf32>
    %245 = math.exp %244 : vector<8x128xf32>
    %cst_68 = arith.constant 1.000000e+00 : f32
    %246 = vector.broadcast %cst_68 : f32 to vector<8x128xf32>
    %247 = arith.addf %246, %245 : vector<8x128xf32>
    %248 = arith.divf %246, %247 : vector<8x128xf32>
    %249 = arith.mulf %240, %185 : vector<8x128xf32>
    %250 = arith.mulf %234, %242 : vector<8x128xf32>
    %251 = arith.addf %249, %250 : vector<8x128xf32>
    %252 = math.tanh %251 : vector<8x128xf32>
    %253 = arith.mulf %248, %252 : vector<8x128xf32>
    %254 = arith.truncf %253 : vector<8x128xf32> to vector<8x128xbf16>
    %cst_69 = arith.constant dense<0.000000e+00> : vector<8x512xf32>
    %255 = tpu.matmul %254, %6, %cst_69 {dimension_numbers = #tpu.dot_dimension_numbers<[1], [0], [0], [1], [0, 0, 1, 1], [], []>} : vector<8x128xbf16>, vector<128x512xbf16>, vector<8x512xf32> -> vector<8x512xf32>
    %256 = arith.truncf %218 : vector<8x128xf32> to vector<8x128xbf16>
    %cst_70 = arith.constant dense<0.000000e+00> : vector<8x512xf32>
    %257 = tpu.matmul %256, %7, %cst_70 {dimension_numbers = #tpu.dot_dimension_numbers<[1], [0], [0], [1], [0, 0, 1, 1], [], []>} : vector<8x128xbf16>, vector<128x512xbf16>, vector<8x512xf32> -> vector<8x512xf32>
    %258 = arith.addf %255, %257 : vector<8x512xf32>
    %259 = arith.addf %258, %10 : vector<8x512xf32>
    %260 = vector.extract_strided_slice %259 {offsets = [0, 0], sizes = [8, 128], strides = [1, 1]} : vector<8x512xf32> to vector<8x128xf32>
    %261 = arith.negf %260 : vector<8x128xf32>
    %262 = math.exp %261 : vector<8x128xf32>
    %cst_71 = arith.constant 1.000000e+00 : f32
    %263 = vector.broadcast %cst_71 : f32 to vector<8x128xf32>
    %264 = arith.addf %263, %262 : vector<8x128xf32>
    %265 = arith.divf %263, %264 : vector<8x128xf32>
    %266 = vector.extract_strided_slice %259 {offsets = [0, 128], sizes = [8, 128], strides = [1, 1]} : vector<8x512xf32> to vector<8x128xf32>
    %267 = arith.negf %266 : vector<8x128xf32>
    %268 = math.exp %267 : vector<8x128xf32>
    %cst_72 = arith.constant 1.000000e+00 : f32
    %269 = vector.broadcast %cst_72 : f32 to vector<8x128xf32>
    %270 = arith.addf %269, %268 : vector<8x128xf32>
    %271 = arith.divf %269, %270 : vector<8x128xf32>
    %272 = vector.extract_strided_slice %259 {offsets = [0, 256], sizes = [8, 128], strides = [1, 1]} : vector<8x512xf32> to vector<8x128xf32>
    %273 = math.tanh %272 : vector<8x128xf32>
    %274 = vector.extract_strided_slice %259 {offsets = [0, 384], sizes = [8, 128], strides = [1, 1]} : vector<8x512xf32> to vector<8x128xf32>
    %275 = arith.negf %274 : vector<8x128xf32>
    %276 = math.exp %275 : vector<8x128xf32>
    %cst_73 = arith.constant 1.000000e+00 : f32
    %277 = vector.broadcast %cst_73 : f32 to vector<8x128xf32>
    %278 = arith.addf %277, %276 : vector<8x128xf32>
    %279 = arith.divf %277, %278 : vector<8x128xf32>
    %280 = arith.mulf %271, %216 : vector<8x128xf32>
    %281 = arith.mulf %265, %273 : vector<8x128xf32>
    %282 = arith.addf %280, %281 : vector<8x128xf32>
    %283 = math.tanh %282 : vector<8x128xf32>
    %284 = arith.mulf %279, %283 : vector<8x128xf32>
    %285 = arith.truncf %284 : vector<8x128xf32> to vector<8x128xbf16>
    %286 = arith.index_cast %223 : i32 to index
    %c0_74 = arith.constant 0 : index
    %287 = vector.load %arg8[%286, %c0_74] : memref<64x128xbf16, #tpu.memory_space<vmem>>, vector<8x128xbf16>
    tpu.vector_store %arg8[%286, %c0_74], %285 {strides = array<i32>} : memref<64x128xbf16, #tpu.memory_space<vmem>>, vector<8x128xbf16>,
    %c4_i32 = arith.constant 4 : i32
    %c8_i32_75 = arith.constant 8 : i32
    %288 = arith.muli %c4_i32, %c8_i32_75 : i32
    %289 = tpu.assume_multiple %288, 8 : i32
    %290 = arith.index_cast %289 : i32 to index
    %c0_76 = arith.constant 0 : index
    %291 = vector.load %arg11[%290, %c0_76] : memref<64x512xf32, #tpu.memory_space<vmem>>, vector<8x512xf32>
    %292 = arith.truncf %253 : vector<8x128xf32> to vector<8x128xbf16>
    %cst_77 = arith.constant dense<0.000000e+00> : vector<8x512xf32>
    %293 = tpu.matmul %292, %4, %cst_77 {dimension_numbers = #tpu.dot_dimension_numbers<[1], [0], [0], [1], [0, 0, 1, 1], [], []>} : vector<8x128xbf16>, vector<128x512xbf16>, vector<8x512xf32> -> vector<8x512xf32>
    %294 = arith.addf %291, %293 : vector<8x512xf32>
    %295 = vector.extract_strided_slice %294 {offsets = [0, 0], sizes = [8, 128], strides = [1, 1]} : vector<8x512xf32> to vector<8x128xf32>
    %296 = arith.negf %295 : vector<8x128xf32>
    %297 = math.exp %296 : vector<8x128xf32>
    %cst_78 = arith.constant 1.000000e+00 : f32
    %298 = vector.broadcast %cst_78 : f32 to vector<8x128xf32>
    %299 = arith.addf %298, %297 : vector<8x128xf32>
    %300 = arith.divf %298, %299 : vector<8x128xf32>
    %301 = vector.extract_strided_slice %294 {offsets = [0, 128], sizes = [8, 128], strides = [1, 1]} : vector<8x512xf32> to vector<8x128xf32>
    %302 = arith.negf %301 : vector<8x128xf32>
    %303 = math.exp %302 : vector<8x128xf32>
    %cst_79 = arith.constant 1.000000e+00 : f32
    %304 = vector.broadcast %cst_79 : f32 to vector<8x128xf32>
    %305 = arith.addf %304, %303 : vector<8x128xf32>
    %306 = arith.divf %304, %305 : vector<8x128xf32>
    %307 = vector.extract_strided_slice %294 {offsets = [0, 256], sizes = [8, 128], strides = [1, 1]} : vector<8x512xf32> to vector<8x128xf32>
    %308 = math.tanh %307 : vector<8x128xf32>
    %309 = vector.extract_strided_slice %294 {offsets = [0, 384], sizes = [8, 128], strides = [1, 1]} : vector<8x512xf32> to vector<8x128xf32>
    %310 = arith.negf %309 : vector<8x128xf32>
    %311 = math.exp %310 : vector<8x128xf32>
    %cst_80 = arith.constant 1.000000e+00 : f32
    %312 = vector.broadcast %cst_80 : f32 to vector<8x128xf32>
    %313 = arith.addf %312, %311 : vector<8x128xf32>
    %314 = arith.divf %312, %313 : vector<8x128xf32>
    %315 = arith.mulf %306, %251 : vector<8x128xf32>
    %316 = arith.mulf %300, %308 : vector<8x128xf32>
    %317 = arith.addf %315, %316 : vector<8x128xf32>
    %318 = math.tanh %317 : vector<8x128xf32>
    %319 = arith.mulf %314, %318 : vector<8x128xf32>
    %320 = arith.truncf %319 : vector<8x128xf32> to vector<8x128xbf16>
    %cst_81 = arith.constant dense<0.000000e+00> : vector<8x512xf32>
    %321 = tpu.matmul %320, %6, %cst_81 {dimension_numbers = #tpu.dot_dimension_numbers<[1], [0], [0], [1], [0, 0, 1, 1], [], []>} : vector<8x128xbf16>, vector<128x512xbf16>, vector<8x512xf32> -> vector<8x512xf32>
    %322 = arith.truncf %284 : vector<8x128xf32> to vector<8x128xbf16>
    %cst_82 = arith.constant dense<0.000000e+00> : vector<8x512xf32>
    %323 = tpu.matmul %322, %7, %cst_82 {dimension_numbers = #tpu.dot_dimension_numbers<[1], [0], [0], [1], [0, 0, 1, 1], [], []>} : vector<8x128xbf16>, vector<128x512xbf16>, vector<8x512xf32> -> vector<8x512xf32>
    %324 = arith.addf %321, %323 : vector<8x512xf32>
    %325 = arith.addf %324, %10 : vector<8x512xf32>
    %326 = vector.extract_strided_slice %325 {offsets = [0, 0], sizes = [8, 128], strides = [1, 1]} : vector<8x512xf32> to vector<8x128xf32>
    %327 = arith.negf %326 : vector<8x128xf32>
    %328 = math.exp %327 : vector<8x128xf32>
    %cst_83 = arith.constant 1.000000e+00 : f32
    %329 = vector.broadcast %cst_83 : f32 to vector<8x128xf32>
    %330 = arith.addf %329, %328 : vector<8x128xf32>
    %331 = arith.divf %329, %330 : vector<8x128xf32>
    %332 = vector.extract_strided_slice %325 {offsets = [0, 128], sizes = [8, 128], strides = [1, 1]} : vector<8x512xf32> to vector<8x128xf32>
    %333 = arith.negf %332 : vector<8x128xf32>
    %334 = math.exp %333 : vector<8x128xf32>
    %cst_84 = arith.constant 1.000000e+00 : f32
    %335 = vector.broadcast %cst_84 : f32 to vector<8x128xf32>
    %336 = arith.addf %335, %334 : vector<8x128xf32>
    %337 = arith.divf %335, %336 : vector<8x128xf32>
    %338 = vector.extract_strided_slice %325 {offsets = [0, 256], sizes = [8, 128], strides = [1, 1]} : vector<8x512xf32> to vector<8x128xf32>
    %339 = math.tanh %338 : vector<8x128xf32>
    %340 = vector.extract_strided_slice %325 {offsets = [0, 384], sizes = [8, 128], strides = [1, 1]} : vector<8x512xf32> to vector<8x128xf32>
    %341 = arith.negf %340 : vector<8x128xf32>
    %342 = math.exp %341 : vector<8x128xf32>
    %cst_85 = arith.constant 1.000000e+00 : f32
    %343 = vector.broadcast %cst_85 : f32 to vector<8x128xf32>
    %344 = arith.addf %343, %342 : vector<8x128xf32>
    %345 = arith.divf %343, %344 : vector<8x128xf32>
    %346 = arith.mulf %337, %282 : vector<8x128xf32>
    %347 = arith.mulf %331, %339 : vector<8x128xf32>
    %348 = arith.addf %346, %347 : vector<8x128xf32>
    %349 = math.tanh %348 : vector<8x128xf32>
    %350 = arith.mulf %345, %349 : vector<8x128xf32>
    %351 = arith.truncf %350 : vector<8x128xf32> to vector<8x128xbf16>
    %352 = arith.index_cast %289 : i32 to index
    %c0_86 = arith.constant 0 : index
    %353 = vector.load %arg8[%352, %c0_86] : memref<64x128xbf16, #tpu.memory_space<vmem>>, vector<8x128xbf16>
    tpu.vector_store %arg8[%352, %c0_86], %351 {strides = array<i32>} : memref<64x128xbf16, #tpu.memory_space<vmem>>, vector<8x128xbf16>,
    %c5_i32 = arith.constant 5 : i32
    %c8_i32_87 = arith.constant 8 : i32
    %354 = arith.muli %c5_i32, %c8_i32_87 : i32
    %355 = tpu.assume_multiple %354, 8 : i32
    %356 = arith.index_cast %355 : i32 to index
    %c0_88 = arith.constant 0 : index
    %357 = vector.load %arg11[%356, %c0_88] : memref<64x512xf32, #tpu.memory_space<vmem>>, vector<8x512xf32>
    %358 = arith.truncf %319 : vector<8x128xf32> to vector<8x128xbf16>
    %cst_89 = arith.constant dense<0.000000e+00> : vector<8x512xf32>
    %359 = tpu.matmul %358, %4, %cst_89 {dimension_numbers = #tpu.dot_dimension_numbers<[1], [0], [0], [1], [0, 0, 1, 1], [], []>} : vector<8x128xbf16>, vector<128x512xbf16>, vector<8x512xf32> -> vector<8x512xf32>
    %360 = arith.addf %357, %359 : vector<8x512xf32>
    %361 = vector.extract_strided_slice %360 {offsets = [0, 0], sizes = [8, 128], strides = [1, 1]} : vector<8x512xf32> to vector<8x128xf32>
    %362 = arith.negf %361 : vector<8x128xf32>
    %363 = math.exp %362 : vector<8x128xf32>
    %cst_90 = arith.constant 1.000000e+00 : f32
    %364 = vector.broadcast %cst_90 : f32 to vector<8x128xf32>
    %365 = arith.addf %364, %363 : vector<8x128xf32>
    %366 = arith.divf %364, %365 : vector<8x128xf32>
    %367 = vector.extract_strided_slice %360 {offsets = [0, 128], sizes = [8, 128], strides = [1, 1]} : vector<8x512xf32> to vector<8x128xf32>
    %368 = arith.negf %367 : vector<8x128xf32>
    %369 = math.exp %368 : vector<8x128xf32>
    %cst_91 = arith.constant 1.000000e+00 : f32
    %370 = vector.broadcast %cst_91 : f32 to vector<8x128xf32>
    %371 = arith.addf %370, %369 : vector<8x128xf32>
    %372 = arith.divf %370, %371 : vector<8x128xf32>
    %373 = vector.extract_strided_slice %360 {offsets = [0, 256], sizes = [8, 128], strides = [1, 1]} : vector<8x512xf32> to vector<8x128xf32>
    %374 = math.tanh %373 : vector<8x128xf32>
    %375 = vector.extract_strided_slice %360 {offsets = [0, 384], sizes = [8, 128], strides = [1, 1]} : vector<8x512xf32> to vector<8x128xf32>
    %376 = arith.negf %375 : vector<8x128xf32>
    %377 = math.exp %376 : vector<8x128xf32>
    %cst_92 = arith.constant 1.000000e+00 : f32
    %378 = vector.broadcast %cst_92 : f32 to vector<8x128xf32>
    %379 = arith.addf %378, %377 : vector<8x128xf32>
    %380 = arith.divf %378, %379 : vector<8x128xf32>
    %381 = arith.mulf %372, %317 : vector<8x128xf32>
    %382 = arith.mulf %366, %374 : vector<8x128xf32>
    %383 = arith.addf %381, %382 : vector<8x128xf32>
    %384 = math.tanh %383 : vector<8x128xf32>
    %385 = arith.mulf %380, %384 : vector<8x128xf32>
    %386 = arith.truncf %385 : vector<8x128xf32> to vector<8x128xbf16>
    %cst_93 = arith.constant dense<0.000000e+00> : vector<8x512xf32>
    %387 = tpu.matmul %386, %6, %cst_93 {dimension_numbers = #tpu.dot_dimension_numbers<[1], [0], [0], [1], [0, 0, 1, 1], [], []>} : vector<8x128xbf16>, vector<128x512xbf16>, vector<8x512xf32> -> vector<8x512xf32>
    %388 = arith.truncf %350 : vector<8x128xf32> to vector<8x128xbf16>
    %cst_94 = arith.constant dense<0.000000e+00> : vector<8x512xf32>
    %389 = tpu.matmul %388, %7, %cst_94 {dimension_numbers = #tpu.dot_dimension_numbers<[1], [0], [0], [1], [0, 0, 1, 1], [], []>} : vector<8x128xbf16>, vector<128x512xbf16>, vector<8x512xf32> -> vector<8x512xf32>
    %390 = arith.addf %387, %389 : vector<8x512xf32>
    %391 = arith.addf %390, %10 : vector<8x512xf32>
    %392 = vector.extract_strided_slice %391 {offsets = [0, 0], sizes = [8, 128], strides = [1, 1]} : vector<8x512xf32> to vector<8x128xf32>
    %393 = arith.negf %392 : vector<8x128xf32>
    %394 = math.exp %393 : vector<8x128xf32>
    %cst_95 = arith.constant 1.000000e+00 : f32
    %395 = vector.broadcast %cst_95 : f32 to vector<8x128xf32>
    %396 = arith.addf %395, %394 : vector<8x128xf32>
    %397 = arith.divf %395, %396 : vector<8x128xf32>
    %398 = vector.extract_strided_slice %391 {offsets = [0, 128], sizes = [8, 128], strides = [1, 1]} : vector<8x512xf32> to vector<8x128xf32>
    %399 = arith.negf %398 : vector<8x128xf32>
    %400 = math.exp %399 : vector<8x128xf32>
    %cst_96 = arith.constant 1.000000e+00 : f32
    %401 = vector.broadcast %cst_96 : f32 to vector<8x128xf32>
    %402 = arith.addf %401, %400 : vector<8x128xf32>
    %403 = arith.divf %401, %402 : vector<8x128xf32>
    %404 = vector.extract_strided_slice %391 {offsets = [0, 256], sizes = [8, 128], strides = [1, 1]} : vector<8x512xf32> to vector<8x128xf32>
    %405 = math.tanh %404 : vector<8x128xf32>
    %406 = vector.extract_strided_slice %391 {offsets = [0, 384], sizes = [8, 128], strides = [1, 1]} : vector<8x512xf32> to vector<8x128xf32>
    %407 = arith.negf %406 : vector<8x128xf32>
    %408 = math.exp %407 : vector<8x128xf32>
    %cst_97 = arith.constant 1.000000e+00 : f32
    %409 = vector.broadcast %cst_97 : f32 to vector<8x128xf32>
    %410 = arith.addf %409, %408 : vector<8x128xf32>
    %411 = arith.divf %409, %410 : vector<8x128xf32>
    %412 = arith.mulf %403, %348 : vector<8x128xf32>
    %413 = arith.mulf %397, %405 : vector<8x128xf32>
    %414 = arith.addf %412, %413 : vector<8x128xf32>
    %415 = math.tanh %414 : vector<8x128xf32>
    %416 = arith.mulf %411, %415 : vector<8x128xf32>
    %417 = arith.truncf %416 : vector<8x128xf32> to vector<8x128xbf16>
    %418 = arith.index_cast %355 : i32 to index
    %c0_98 = arith.constant 0 : index
    %419 = vector.load %arg8[%418, %c0_98] : memref<64x128xbf16, #tpu.memory_space<vmem>>, vector<8x128xbf16>
    tpu.vector_store %arg8[%418, %c0_98], %417 {strides = array<i32>} : memref<64x128xbf16, #tpu.memory_space<vmem>>, vector<8x128xbf16>,
    %c6_i32 = arith.constant 6 : i32
    %c8_i32_99 = arith.constant 8 : i32
    %420 = arith.muli %c6_i32, %c8_i32_99 : i32
    %421 = tpu.assume_multiple %420, 8 : i32
    %422 = arith.index_cast %421 : i32 to index
    %c0_100 = arith.constant 0 : index
    %423 = vector.load %arg11[%422, %c0_100] : memref<64x512xf32, #tpu.memory_space<vmem>>, vector<8x512xf32>
    %424 = arith.truncf %385 : vector<8x128xf32> to vector<8x128xbf16>
    %cst_101 = arith.constant dense<0.000000e+00> : vector<8x512xf32>
    %425 = tpu.matmul %424, %4, %cst_101 {dimension_numbers = #tpu.dot_dimension_numbers<[1], [0], [0], [1], [0, 0, 1, 1], [], []>} : vector<8x128xbf16>, vector<128x512xbf16>, vector<8x512xf32> -> vector<8x512xf32>
    %426 = arith.addf %423, %425 : vector<8x512xf32>
    %427 = vector.extract_strided_slice %426 {offsets = [0, 0], sizes = [8, 128], strides = [1, 1]} : vector<8x512xf32> to vector<8x128xf32>
    %428 = arith.negf %427 : vector<8x128xf32>
    %429 = math.exp %428 : vector<8x128xf32>
    %cst_102 = arith.constant 1.000000e+00 : f32
    %430 = vector.broadcast %cst_102 : f32 to vector<8x128xf32>
    %431 = arith.addf %430, %429 : vector<8x128xf32>
    %432 = arith.divf %430, %431 : vector<8x128xf32>
    %433 = vector.extract_strided_slice %426 {offsets = [0, 128], sizes = [8, 128], strides = [1, 1]} : vector<8x512xf32> to vector<8x128xf32>
    %434 = arith.negf %433 : vector<8x128xf32>
    %435 = math.exp %434 : vector<8x128xf32>
    %cst_103 = arith.constant 1.000000e+00 : f32
    %436 = vector.broadcast %cst_103 : f32 to vector<8x128xf32>
    %437 = arith.addf %436, %435 : vector<8x128xf32>
    %438 = arith.divf %436, %437 : vector<8x128xf32>
    %439 = vector.extract_strided_slice %426 {offsets = [0, 256], sizes = [8, 128], strides = [1, 1]} : vector<8x512xf32> to vector<8x128xf32>
    %440 = math.tanh %439 : vector<8x128xf32>
    %441 = vector.extract_strided_slice %426 {offsets = [0, 384], sizes = [8, 128], strides = [1, 1]} : vector<8x512xf32> to vector<8x128xf32>
    %442 = arith.negf %441 : vector<8x128xf32>
    %443 = math.exp %442 : vector<8x128xf32>
    %cst_104 = arith.constant 1.000000e+00 : f32
    %444 = vector.broadcast %cst_104 : f32 to vector<8x128xf32>
    %445 = arith.addf %444, %443 : vector<8x128xf32>
    %446 = arith.divf %444, %445 : vector<8x128xf32>
    %447 = arith.mulf %438, %383 : vector<8x128xf32>
    %448 = arith.mulf %432, %440 : vector<8x128xf32>
    %449 = arith.addf %447, %448 : vector<8x128xf32>
    %450 = math.tanh %449 : vector<8x128xf32>
    %451 = arith.mulf %446, %450 : vector<8x128xf32>
    %452 = arith.truncf %451 : vector<8x128xf32> to vector<8x128xbf16>
    %cst_105 = arith.constant dense<0.000000e+00> : vector<8x512xf32>
    %453 = tpu.matmul %452, %6, %cst_105 {dimension_numbers = #tpu.dot_dimension_numbers<[1], [0], [0], [1], [0, 0, 1, 1], [], []>} : vector<8x128xbf16>, vector<128x512xbf16>, vector<8x512xf32> -> vector<8x512xf32>
    %454 = arith.truncf %416 : vector<8x128xf32> to vector<8x128xbf16>
    %cst_106 = arith.constant dense<0.000000e+00> : vector<8x512xf32>
    %455 = tpu.matmul %454, %7, %cst_106 {dimension_numbers = #tpu.dot_dimension_numbers<[1], [0], [0], [1], [0, 0, 1, 1], [], []>} : vector<8x128xbf16>, vector<128x512xbf16>, vector<8x512xf32> -> vector<8x512xf32>
    %456 = arith.addf %453, %455 : vector<8x512xf32>
    %457 = arith.addf %456, %10 : vector<8x512xf32>
    %458 = vector.extract_strided_slice %457 {offsets = [0, 0], sizes = [8, 128], strides = [1, 1]} : vector<8x512xf32> to vector<8x128xf32>
    %459 = arith.negf %458 : vector<8x128xf32>
    %460 = math.exp %459 : vector<8x128xf32>
    %cst_107 = arith.constant 1.000000e+00 : f32
    %461 = vector.broadcast %cst_107 : f32 to vector<8x128xf32>
    %462 = arith.addf %461, %460 : vector<8x128xf32>
    %463 = arith.divf %461, %462 : vector<8x128xf32>
    %464 = vector.extract_strided_slice %457 {offsets = [0, 128], sizes = [8, 128], strides = [1, 1]} : vector<8x512xf32> to vector<8x128xf32>
    %465 = arith.negf %464 : vector<8x128xf32>
    %466 = math.exp %465 : vector<8x128xf32>
    %cst_108 = arith.constant 1.000000e+00 : f32
    %467 = vector.broadcast %cst_108 : f32 to vector<8x128xf32>
    %468 = arith.addf %467, %466 : vector<8x128xf32>
    %469 = arith.divf %467, %468 : vector<8x128xf32>
    %470 = vector.extract_strided_slice %457 {offsets = [0, 256], sizes = [8, 128], strides = [1, 1]} : vector<8x512xf32> to vector<8x128xf32>
    %471 = math.tanh %470 : vector<8x128xf32>
    %472 = vector.extract_strided_slice %457 {offsets = [0, 384], sizes = [8, 128], strides = [1, 1]} : vector<8x512xf32> to vector<8x128xf32>
    %473 = arith.negf %472 : vector<8x128xf32>
    %474 = math.exp %473 : vector<8x128xf32>
    %cst_109 = arith.constant 1.000000e+00 : f32
    %475 = vector.broadcast %cst_109 : f32 to vector<8x128xf32>
    %476 = arith.addf %475, %474 : vector<8x128xf32>
    %477 = arith.divf %475, %476 : vector<8x128xf32>
    %478 = arith.mulf %469, %414 : vector<8x128xf32>
    %479 = arith.mulf %463, %471 : vector<8x128xf32>
    %480 = arith.addf %478, %479 : vector<8x128xf32>
    %481 = math.tanh %480 : vector<8x128xf32>
    %482 = arith.mulf %477, %481 : vector<8x128xf32>
    %483 = arith.truncf %482 : vector<8x128xf32> to vector<8x128xbf16>
    %484 = arith.index_cast %421 : i32 to index
    %c0_110 = arith.constant 0 : index
    %485 = vector.load %arg8[%484, %c0_110] : memref<64x128xbf16, #tpu.memory_space<vmem>>, vector<8x128xbf16>
    tpu.vector_store %arg8[%484, %c0_110], %483 {strides = array<i32>} : memref<64x128xbf16, #tpu.memory_space<vmem>>, vector<8x128xbf16>,
    %c7_i32 = arith.constant 7 : i32
    %c8_i32_111 = arith.constant 8 : i32
    %486 = arith.muli %c7_i32, %c8_i32_111 : i32
    %487 = tpu.assume_multiple %486, 8 : i32
    %488 = arith.index_cast %487 : i32 to index
    %c0_112 = arith.constant 0 : index
    %489 = vector.load %arg11[%488, %c0_112] : memref<64x512xf32, #tpu.memory_space<vmem>>, vector<8x512xf32>
    %490 = arith.truncf %451 : vector<8x128xf32> to vector<8x128xbf16>
    %cst_113 = arith.constant dense<0.000000e+00> : vector<8x512xf32>
    %491 = tpu.matmul %490, %4, %cst_113 {dimension_numbers = #tpu.dot_dimension_numbers<[1], [0], [0], [1], [0, 0, 1, 1], [], []>} : vector<8x128xbf16>, vector<128x512xbf16>, vector<8x512xf32> -> vector<8x512xf32>
    %492 = arith.addf %489, %491 : vector<8x512xf32>
    %493 = vector.extract_strided_slice %492 {offsets = [0, 0], sizes = [8, 128], strides = [1, 1]} : vector<8x512xf32> to vector<8x128xf32>
    %494 = arith.negf %493 : vector<8x128xf32>
    %495 = math.exp %494 : vector<8x128xf32>
    %cst_114 = arith.constant 1.000000e+00 : f32
    %496 = vector.broadcast %cst_114 : f32 to vector<8x128xf32>
    %497 = arith.addf %496, %495 : vector<8x128xf32>
    %498 = arith.divf %496, %497 : vector<8x128xf32>
    %499 = vector.extract_strided_slice %492 {offsets = [0, 128], sizes = [8, 128], strides = [1, 1]} : vector<8x512xf32> to vector<8x128xf32>
    %500 = arith.negf %499 : vector<8x128xf32>
    %501 = math.exp %500 : vector<8x128xf32>
    %cst_115 = arith.constant 1.000000e+00 : f32
    %502 = vector.broadcast %cst_115 : f32 to vector<8x128xf32>
    %503 = arith.addf %502, %501 : vector<8x128xf32>
    %504 = arith.divf %502, %503 : vector<8x128xf32>
    %505 = vector.extract_strided_slice %492 {offsets = [0, 256], sizes = [8, 128], strides = [1, 1]} : vector<8x512xf32> to vector<8x128xf32>
    %506 = math.tanh %505 : vector<8x128xf32>
    %507 = vector.extract_strided_slice %492 {offsets = [0, 384], sizes = [8, 128], strides = [1, 1]} : vector<8x512xf32> to vector<8x128xf32>
    %508 = arith.negf %507 : vector<8x128xf32>
    %509 = math.exp %508 : vector<8x128xf32>
    %cst_116 = arith.constant 1.000000e+00 : f32
    %510 = vector.broadcast %cst_116 : f32 to vector<8x128xf32>
    %511 = arith.addf %510, %509 : vector<8x128xf32>
    %512 = arith.divf %510, %511 : vector<8x128xf32>
    %513 = arith.mulf %504, %449 : vector<8x128xf32>
    %514 = arith.mulf %498, %506 : vector<8x128xf32>
    %515 = arith.addf %513, %514 : vector<8x128xf32>
    %516 = math.tanh %515 : vector<8x128xf32>
    %517 = arith.mulf %512, %516 : vector<8x128xf32>
    %518 = arith.truncf %517 : vector<8x128xf32> to vector<8x128xbf16>
    %cst_117 = arith.constant dense<0.000000e+00> : vector<8x512xf32>
    %519 = tpu.matmul %518, %6, %cst_117 {dimension_numbers = #tpu.dot_dimension_numbers<[1], [0], [0], [1], [0, 0, 1, 1], [], []>} : vector<8x128xbf16>, vector<128x512xbf16>, vector<8x512xf32> -> vector<8x512xf32>
    %520 = arith.truncf %482 : vector<8x128xf32> to vector<8x128xbf16>
    %cst_118 = arith.constant dense<0.000000e+00> : vector<8x512xf32>
    %521 = tpu.matmul %520, %7, %cst_118 {dimension_numbers = #tpu.dot_dimension_numbers<[1], [0], [0], [1], [0, 0, 1, 1], [], []>} : vector<8x128xbf16>, vector<128x512xbf16>, vector<8x512xf32> -> vector<8x512xf32>
    %522 = arith.addf %519, %521 : vector<8x512xf32>
    %523 = arith.addf %522, %10 : vector<8x512xf32>
    %524 = vector.extract_strided_slice %523 {offsets = [0, 0], sizes = [8, 128], strides = [1, 1]} : vector<8x512xf32> to vector<8x128xf32>
    %525 = arith.negf %524 : vector<8x128xf32>
    %526 = math.exp %525 : vector<8x128xf32>
    %cst_119 = arith.constant 1.000000e+00 : f32
    %527 = vector.broadcast %cst_119 : f32 to vector<8x128xf32>
    %528 = arith.addf %527, %526 : vector<8x128xf32>
    %529 = arith.divf %527, %528 : vector<8x128xf32>
    %530 = vector.extract_strided_slice %523 {offsets = [0, 128], sizes = [8, 128], strides = [1, 1]} : vector<8x512xf32> to vector<8x128xf32>
    %531 = arith.negf %530 : vector<8x128xf32>
    %532 = math.exp %531 : vector<8x128xf32>
    %cst_120 = arith.constant 1.000000e+00 : f32
    %533 = vector.broadcast %cst_120 : f32 to vector<8x128xf32>
    %534 = arith.addf %533, %532 : vector<8x128xf32>
    %535 = arith.divf %533, %534 : vector<8x128xf32>
    %536 = vector.extract_strided_slice %523 {offsets = [0, 256], sizes = [8, 128], strides = [1, 1]} : vector<8x512xf32> to vector<8x128xf32>
    %537 = math.tanh %536 : vector<8x128xf32>
    %538 = vector.extract_strided_slice %523 {offsets = [0, 384], sizes = [8, 128], strides = [1, 1]} : vector<8x512xf32> to vector<8x128xf32>
    %539 = arith.negf %538 : vector<8x128xf32>
    %540 = math.exp %539 : vector<8x128xf32>
    %cst_121 = arith.constant 1.000000e+00 : f32
    %541 = vector.broadcast %cst_121 : f32 to vector<8x128xf32>
    %542 = arith.addf %541, %540 : vector<8x128xf32>
    %543 = arith.divf %541, %542 : vector<8x128xf32>
    %544 = arith.mulf %535, %480 : vector<8x128xf32>
    %545 = arith.mulf %529, %537 : vector<8x128xf32>
    %546 = arith.addf %544, %545 : vector<8x128xf32>
    %547 = math.tanh %546 : vector<8x128xf32>
    %548 = arith.mulf %543, %547 : vector<8x128xf32>
    %549 = arith.truncf %548 : vector<8x128xf32> to vector<8x128xbf16>
    %550 = arith.index_cast %487 : i32 to index
    %c0_122 = arith.constant 0 : index
    %551 = vector.load %arg8[%550, %c0_122] : memref<64x128xbf16, #tpu.memory_space<vmem>>, vector<8x128xbf16>
    tpu.vector_store %arg8[%550, %c0_122], %549 {strides = array<i32>} : memref<64x128xbf16, #tpu.memory_space<vmem>>, vector<8x128xbf16>,
    %c8_i32_123 = arith.constant 8 : i32
    %c0_124 = arith.constant 0 : index
    %c0_125 = arith.constant 0 : index
    %c0_126 = arith.constant 0 : index
    %552 = vector.load %arg9[%c0_124, %c0_125, %c0_126] : memref<2x8x128xf32, #tpu.memory_space<vmem>>, vector<1x8x128xf32>
    %553 = vector.shape_cast %552 : vector<1x8x128xf32> to vector<8x128xf32>
    %554 = vector.shape_cast %517 : vector<8x128xf32> to vector<1x8x128xf32>
    tpu.vector_store %arg9[%c0_124, %c0_125, %c0_126], %554 {strides = array<i32>} : memref<2x8x128xf32, #tpu.memory_space<vmem>>, vector<1x8x128xf32>,
    %c0_127 = arith.constant 0 : index
    %c0_128 = arith.constant 0 : index
    %c0_129 = arith.constant 0 : index
    %555 = vector.load %arg10[%c0_127, %c0_128, %c0_129] : memref<2x8x128xf32, #tpu.memory_space<vmem>>, vector<1x8x128xf32>
    %556 = vector.shape_cast %555 : vector<1x8x128xf32> to vector<8x128xf32>
    %557 = vector.shape_cast %515 : vector<8x128xf32> to vector<1x8x128xf32>
    tpu.vector_store %arg10[%c0_127, %c0_128, %c0_129], %557 {strides = array<i32>} : memref<2x8x128xf32, #tpu.memory_space<vmem>>, vector<1x8x128xf32>,
    %c1_130 = arith.constant 1 : index
    %c0_131 = arith.constant 0 : index
    %c0_132 = arith.constant 0 : index
    %558 = vector.load %arg9[%c1_130, %c0_131, %c0_132] : memref<2x8x128xf32, #tpu.memory_space<vmem>>, vector<1x8x128xf32>
    %559 = vector.shape_cast %558 : vector<1x8x128xf32> to vector<8x128xf32>
    %560 = vector.shape_cast %548 : vector<8x128xf32> to vector<1x8x128xf32>
    tpu.vector_store %arg9[%c1_130, %c0_131, %c0_132], %560 {strides = array<i32>} : memref<2x8x128xf32, #tpu.memory_space<vmem>>, vector<1x8x128xf32>,
    %c1_133 = arith.constant 1 : index
    %c0_134 = arith.constant 0 : index
    %c0_135 = arith.constant 0 : index
    %561 = vector.load %arg10[%c1_133, %c0_134, %c0_135] : memref<2x8x128xf32, #tpu.memory_space<vmem>>, vector<1x8x128xf32>
    %562 = vector.shape_cast %561 : vector<1x8x128xf32> to vector<8x128xf32>
    %563 = vector.shape_cast %546 : vector<8x128xf32> to vector<1x8x128xf32>
    tpu.vector_store %arg10[%c1_133, %c0_134, %c0_135], %563 {strides = array<i32>} : memref<2x8x128xf32, #tpu.memory_space<vmem>>, vector<1x8x128xf32>,
    return
  }
  func.func @transform_0(%arg0: i32) -> (i32, i32) {
    %c0_i32 = arith.constant 0 : i32
    %c0_i32_0 = arith.constant 0 : i32
    return %arg0, %c0_i32 : i32, i32
  }
  func.func @transform_7(%arg0: i32) -> (i32, i32) {
    %c0_i32 = arith.constant 0 : i32
    %c0_i32_0 = arith.constant 0 : i32
    return %arg0, %c0_i32 : i32, i32
  }
  func.func @transform_8(%arg0: i32) -> (i32, i32, i32) {
    %c0_i32 = arith.constant 0 : i32
    %c0_i32_0 = arith.constant 0 : i32
    %c0_i32_1 = arith.constant 0 : i32
    %c0_i32_2 = arith.constant 0 : i32
    return %c0_i32, %c0_i32_0, %c0_i32_1 : i32, i32, i32
  }
  func.func @transform_9(%arg0: i32) -> (i32, i32, i32) {
    %c0_i32 = arith.constant 0 : i32
    %c0_i32_0 = arith.constant 0 : i32
    %c0_i32_1 = arith.constant 0 : i32
    %c0_i32_2 = arith.constant 0 : i32
    return %c0_i32, %c0_i32_0, %c0_i32_1 : i32, i32, i32
  }
}

</mosaic_0001>

<bundles_post_ra>
// kernel: lstm_decoder_forward.3
= control target key start
LH: loop header
LB: loop body
LE: loop exit
PB: predicated region body
PF: predicated region fallthrough
CT: control target
= control target key end

     0   :  { %s355_s1 = inlined_call_operand.vmem [shape: bf16[128,128], index: 1, kind: input, shape index: {}]   ;;  %s356_s0 = inlined_call_operand.vmem [shape: bf16[64,128], index: 0, kind: input, shape index: {}]   ;;  %s357_s2 = inlined_call_operand.vmem [shape: f32[1,128], index: 2, kind: input, shape index: {}]   ;;  %s358_s3 = inlined_call_operand.vmem [shape: f32[64,128], index: 3, kind: output, shape index: {}]  }
   0x1   :  { %v260_v0 = vld [vmem:[%s355_s1] sm:$0xff]   ;;  %v261_v1 = vld [vmem:[%s355_s1 + $0x8] sm:$0xff]   ;;  %v262_v2 = vld [vmem:[%s355_s1 + $0x10] sm:$0xff]  }
   0x2   :  { %220 = vmatprep.subr.bf16.mxu0 %v260_v0  ;;  %244 = vmatprep.subr.bf16.mxu1 %v260_v0  ;;  %v263_v3 = vld [vmem:[%s355_s1 + $0x18] sm:$0xff]   ;;  %v268_v4 = vld [vmem:[%s356_s0] sm:$0xff]   ;;  %v269_v5 = vld [vmem:[%s356_s0 + $0x10] sm:$0xff]  }
   0x3   :  { %221 = vmatpush3.bf16.msra.mxu0 %v260_v0  ;;  %252 = vmatpush3.bf16.msra.mxu1 %v260_v0  ;;  %v264_v6 = vld [vmem:[%s355_s1 + $0x20] sm:$0xff]   ;;  %v265_v7 = vld [vmem:[%s355_s1 + $0x28] sm:$0xff]   ;;  %v266_v8 = vld [vmem:[%s355_s1 + $0x30] sm:$0xff]  }
   0x4   :  { %222 = vmatprep.subr.bf16.mxu0 %v261_v1  ;;  %245 = vmatprep.subr.bf16.mxu1 %v261_v1  ;;  %v267_v9 = vld [vmem:[%s355_s1 + $0x38] sm:$0xff]   ;;  %v270_v10 = vld [vmem:[%s356_s0 + $0x8] sm:$0xff]   ;;  %v195_v12 = vld [vmem:[%s357_s2] ss:$0 sm:$0xff] }
   0x5   :  { %236 = vmatprep.mubr.bf16.mxu0 %v268_v4  ;;  %240 = vmatprep.mubr.bf16.mxu1 %v269_v5  ;;  %v271_v11 = vld [vmem:[%s356_s0 + $0x18] sm:$0xff]  }
   0x7   :  { %223 = vmatpush3.bf16.msra.mxu0 %v261_v1  ;;  %253 = vmatpush3.bf16.msra.mxu1 %v261_v1 }
   0x8   :  { %224 = vmatprep.subr.bf16.mxu0 %v262_v2  ;;  %246 = vmatprep.subr.bf16.mxu1 %v262_v2 }
   0xb   :  { %225 = vmatpush3.bf16.msra.mxu0 %v262_v2  ;;  %254 = vmatpush3.bf16.msra.mxu1 %v262_v2 }
   0xc   :  { %226 = vmatprep.subr.bf16.mxu0 %v263_v3  ;;  %247 = vmatprep.subr.bf16.mxu1 %v263_v3 }
   0xf   :  { %227 = vmatpush3.bf16.msra.mxu0 %v263_v3  ;;  %255 = vmatpush3.bf16.msra.mxu1 %v263_v3 }
  0x10   :  { %228 = vmatprep.subr.bf16.mxu0 %v264_v6  ;;  %248 = vmatprep.subr.bf16.mxu1 %v264_v6 }
  0x13   :  { %229 = vmatpush3.bf16.msra.mxu0 %v264_v6  ;;  %256 = vmatpush3.bf16.msra.mxu1 %v264_v6 }
  0x14   :  { %230 = vmatprep.subr.bf16.mxu0 %v265_v7  ;;  %249 = vmatprep.subr.bf16.mxu1 %v265_v7 }
  0x17   :  { %231 = vmatpush3.bf16.msra.mxu0 %v265_v7  ;;  %257 = vmatpush3.bf16.msra.mxu1 %v265_v7 }
  0x18   :  { %232 = vmatprep.subr.bf16.mxu0 %v266_v8  ;;  %250 = vmatprep.subr.bf16.mxu1 %v266_v8 }
  0x1b   :  { %233 = vmatpush3.bf16.msra.mxu0 %v266_v8  ;;  %258 = vmatpush3.bf16.msra.mxu1 %v266_v8 }
  0x1c   :  { %234 = vmatprep.subr.bf16.mxu0 %v267_v9  ;;  %251 = vmatprep.subr.bf16.mxu1 %v267_v9 }
  0x1f   :  { %235 = vmatpush3.bf16.msra.mxu0 %v267_v9  ;;  %259 = vmatpush3.bf16.msra.mxu1 %v267_v9 }
  0x22   :  { %237 = vmatmul.mubr.bf16.vlgmr.msra.gmra.mrb[0].mxu0 %v270_v10  ;;  %241 = vmatmul.mubr.bf16.vlgmr.msra.gmra.mrb[0].mxu1 %v271_v11 }
  0xf5   :  { %v238_v13 = vpop.f32.mrb[0].mxu0  ;;  %v242_v14 = vpop.f32.mrb[0].mxu1 }
  0xf6   :  { %v161_v15 = vadd.f32 %v238_v13, %v195_v12  ;;  %v177_v16 = vadd.f32 %v242_v14, %v195_v12  ;;  %v152_v17 = vpop.f32.mrb[1].mxu0  ;;  %v168_v18 = vpop.f32.mrb[1].mxu1 }
  0xf7   :  { %v153_v19 = vadd.f32 %v195_v12, %v152_v17  ;;  %v169_v20 = vadd.f32 %v195_v12, %v168_v18  ;;  %v239_v21 = vpop.f32.mrb[2].mxu0  ;;  %v243_v22 = vpop.f32.mrb[2].mxu1 }
  0xf8   :  { %185 = vst [vmem:[%s358_s3 + $0x10] sm:$0xff] %v161_v15  ;;  %189 = vst [vmem:[%s358_s3 + $0x30] sm:$0xff] %v177_v16  ;;  %v164_v23 = vadd.f32 %v239_v21, %v195_v12  ;;  %v180_v24 = vadd.f32 %v243_v22, %v195_v12  ;;  %v155_v25 = vpop.f32.mrb[3].mxu0  ;;  %v171_v26 = vpop.f32.mrb[3].mxu1 }
  0xf9   :  { %183 = vst [vmem:[%s358_s3] sm:$0xff] %v153_v19  ;;  %187 = vst [vmem:[%s358_s3 + $0x20] sm:$0xff] %v169_v20  ;;  %v156_v27 = vadd.f32 %v195_v12, %v155_v25  ;;  %v172_v28 = vadd.f32 %v195_v12, %v171_v26 }
  0xfa   :  { %186 = vst [vmem:[%s358_s3 + $0x18] sm:$0xff] %v164_v23  ;;  %190 = vst [vmem:[%s358_s3 + $0x38] sm:$0xff] %v180_v24 }
  0xfb   :  { %184 = vst [vmem:[%s358_s3 + $0x8] sm:$0xff] %v156_v27  ;;  %188 = vst [vmem:[%s358_s3 + $0x28] sm:$0xff] %v172_v28 }

// kernel: lstm_decoder_forward.2
= control target key start
LH: loop header
LB: loop body
LE: loop exit
PB: predicated region body
PF: predicated region fallthrough
CT: control target
= control target key end

     0   :  { %v4676_v0 = vmov 0.0   ;;  %s7012_s0 = inlined_call_operand.vmem [shape: bf16[64,32], index: 0, kind: input, shape index: {}]   ;;  %s7013_s2 = inlined_call_operand.vmem [shape: bf16[128,512], index: 2, kind: input, shape index: {}]   ;;  %s7014_s3 = inlined_call_operand.vmem [shape: f32[1,512], index: 3, kind: input, shape index: {}]   ;;  %s7015_s4 = inlined_call_operand.vmem [shape: bf16[128,512], index: 4, kind: input, shape index: {}]   ;;  %s7016_s5 = inlined_call_operand.vmem [shape: bf16[128,512], index: 5, kind: input, shape index: {}]   ;;  %s7017_s6 = inlined_call_operand.vmem [shape: f32[1,512], index: 6, kind: input, shape index: {}]   ;;  %s7018_s7 = inlined_call_operand.vmem [shape: bf16[64,128], index: 7, kind: output, shape index: {0}]   ;;  %s7019_s8 = inlined_call_operand.vmem [shape: f32[2,8,128], index: 8, kind: output, shape index: {1}]   ;;  %s7020_s9 = inlined_call_operand.vmem [shape: f32[2,8,128], index: 9, kind: output, shape index: {2}]   ;;  %s7021_s1 = inlined_call_operand.vmem [shape: bf16[32,512], index: 1, kind: input, shape index: {}]  }
   0x1   :  { %22 = vst [vmem:[%s7019_s8] sm:$0xff] %v4676_v0  ;;  %23 = vst [vmem:[%s7019_s8 + $0x8] sm:$0xff] %v4676_v0  ;;  %v43_v1 = vld [vmem:[%s7021_s1] sm:$0xf]  ;;  %v45_v2 = vld [vmem:[%s7021_s1 + $0x10] sm:$0xf] }
   0x2   :  { %24 = vst [vmem:[%s7020_s9] sm:$0xff] %v4676_v0  ;;  %25 = vst [vmem:[%s7020_s9 + $0x8] sm:$0xff] %v4676_v0  ;;  %v47_v3 = vld [vmem:[%s7021_s1 + $0x4] sm:$0xf]  ;;  %v49_v4 = vld [vmem:[%s7021_s1 + $0x14] sm:$0xf] }
   0x3   :  { %44 = vst [vmem:[#allocation3] sm:$0xf] %v43_v1  ;;  %46 = vst [vmem:[#allocation3 + $0x4] sm:$0xf] %v45_v2  ;;  %v51_v5 = vld [vmem:[%s7021_s1 + $0x8] sm:$0xf] }
   0x4   :  { %48 = vst [vmem:[#allocation3 + $0x8] sm:$0xf] %v47_v3  ;;  %v53_v6 = vld [vmem:[%s7021_s1 + $0x18] sm:$0xf]  ;;  %50 = vst [vmem:[#allocation3 + $0xc] sm:$0xf] %v49_v4 }
   0x5   :  { %52 = vst [vmem:[#allocation3 + $0x10] sm:$0xf] %v51_v5  ;;  %54 = vst [vmem:[#allocation3 + $0x14] sm:$0xf] %v53_v6  ;;  %v55_v7 = vld [vmem:[%s7021_s1 + $0xc] sm:$0xf] }
   0x6   :  { %v57_v8 = vld [vmem:[%s7021_s1 + $0x1c] sm:$0xff]   ;;  %v61_v9 = vld [vmem:[%s7021_s1 + $0x30] sm:$0xf]  ;;  %56 = vst [vmem:[#allocation3 + $0x18] sm:$0xf] %v55_v7 }
   0x7   :  { %58 = vst [vmem:[#allocation3 + $0x1c] sm:$0xff] %v57_v8   ;;  %62 = vst [vmem:[#allocation3 + $0x24] sm:$0xf] %v61_v9  ;;  %v63_v10 = vld [vmem:[%s7021_s1 + $0x24] sm:$0xf] }
   0x8   :  { %v65_v11 = vld [vmem:[%s7021_s1 + $0x34] sm:$0xf]  ;;  %v67_v12 = vld [vmem:[%s7021_s1 + $0x28] sm:$0xf]  ;;  %64 = vst [vmem:[#allocation3 + $0x28] sm:$0xf] %v63_v10 }
   0x9   :  { %66 = vst [vmem:[#allocation3 + $0x2c] sm:$0xf] %v65_v11  ;;  %68 = vst [vmem:[#allocation3 + $0x30] sm:$0xf] %v67_v12  ;;  %v69_v13 = vld [vmem:[%s7021_s1 + $0x38] sm:$0xf] }
   0xa   :  { %v71_v14 = vld [vmem:[%s7021_s1 + $0x2c] sm:$0xf]  ;;  %v73_v15 = vld [vmem:[%s7021_s1 + $0x3c] sm:$0xf]  ;;  %70 = vst [vmem:[#allocation3 + $0x34] sm:$0xf] %v69_v13 }
   0xb   :  { %72 = vst [vmem:[#allocation3 + $0x38] sm:$0xf] %v71_v14  ;;  %74 = vst [vmem:[#allocation3 + $0x3c] sm:$0xf] %v73_v15 }
   0xc   :  { %137 = vsyncadd [#allocation9], 1024 }
   0xd   :  { %4664 = dma.done.wait [#allocation9], 1024 }
   0xe   :  { %4665 = vsyncadd [#allocation9], 4294966272  ;;  %v159_v16 = vld [vmem:[%s7013_s2] sm:$0xf]  ;;  %v161_v17 = vld [vmem:[%s7013_s2 + $0x10] sm:$0xf] }
   0xf   :  { %v163_v18 = vld [vmem:[%s7013_s2 + $0x4] sm:$0xf]  ;;  %160 = vst [vmem:[#allocation4] sm:$0xf] %v159_v16  ;;  %162 = vst [vmem:[#allocation4 + $0x4] sm:$0xf] %v161_v17 }
  0x10   :  { %164 = vst [vmem:[#allocation4 + $0x8] sm:$0xf] %v163_v18  ;;  %v165_v19 = vld [vmem:[%s7013_s2 + $0x14] sm:$0xf]  ;;  %v167_v20 = vld [vmem:[%s7013_s2 + $0x8] sm:$0xf] }
  0x11   :  { %v169_v21 = vld [vmem:[%s7013_s2 + $0x18] sm:$0xf]  ;;  %166 = vst [vmem:[#allocation4 + $0xc] sm:$0xf] %v165_v19  ;;  %168 = vst [vmem:[#allocation4 + $0x10] sm:$0xf] %v167_v20 }
  0x12   :  { %170 = vst [vmem:[#allocation4 + $0x14] sm:$0xf] %v169_v21  ;;  %v171_v22 = vld [vmem:[%s7013_s2 + $0xc] sm:$0xf]  ;;  %v173_v23 = vld [vmem:[%s7013_s2 + $0x1c] sm:$0xff]  }
  0x13   :  { %v177_v24 = vld [vmem:[%s7013_s2 + $0x30] sm:$0xf]  ;;  %172 = vst [vmem:[#allocation4 + $0x18] sm:$0xf] %v171_v22  ;;  %174 = vst [vmem:[#allocation4 + $0x1c] sm:$0xff] %v173_v23   ;;  %v189_v30 = vld [vmem:[%s7013_s2 + $0x3c] sm:$0xff]  }
  0x14   :  { %178 = vst [vmem:[#allocation4 + $0x24] sm:$0xf] %v177_v24  ;;  %v179_v25 = vld [vmem:[%s7013_s2 + $0x24] sm:$0xf]  ;;  %v181_v26 = vld [vmem:[%s7013_s2 + $0x34] sm:$0xf] }
  0x15   :  { %v183_v27 = vld [vmem:[%s7013_s2 + $0x28] sm:$0xf]  ;;  %180 = vst [vmem:[#allocation4 + $0x28] sm:$0xf] %v179_v25  ;;  %182 = vst [vmem:[#allocation4 + $0x2c] sm:$0xf] %v181_v26 }
  0x16   :  { %184 = vst [vmem:[#allocation4 + $0x30] sm:$0xf] %v183_v27  ;;  %v185_v28 = vld [vmem:[%s7013_s2 + $0x38] sm:$0xf]  ;;  %v187_v29 = vld [vmem:[%s7013_s2 + $0x2c] sm:$0xf] }
  0x17   :  { %186 = vst [vmem:[#allocation4 + $0x34] sm:$0xf] %v185_v28  ;;  %188 = vst [vmem:[#allocation4 + $0x38] sm:$0xf] %v187_v29  ;;  %v193_v31 = vld [vmem:[%s7013_s2 + $0x50] sm:$0xf] }
  0x18   :  { %190 = vst [vmem:[#allocation4 + $0x3c] sm:$0xff] %v189_v30   ;;  %v195_v32 = vld [vmem:[%s7013_s2 + $0x44] sm:$0xf]  ;;  %v197_v33 = vld [vmem:[%s7013_s2 + $0x54] sm:$0xf]  ;;  %v205_v37 = vld [vmem:[%s7013_s2 + $0x5c] sm:$0xff]  }
  0x19   :  { %194 = vst [vmem:[#allocation4 + $0x44] sm:$0xf] %v193_v31  ;;  %196 = vst [vmem:[#allocation4 + $0x48] sm:$0xf] %v195_v32  ;;  %v199_v34 = vld [vmem:[%s7013_s2 + $0x48] sm:$0xf] }
  0x1a   :  { %198 = vst [vmem:[#allocation4 + $0x4c] sm:$0xf] %v197_v33  ;;  %v201_v35 = vld [vmem:[%s7013_s2 + $0x58] sm:$0xf]  ;;  %v203_v36 = vld [vmem:[%s7013_s2 + $0x4c] sm:$0xf] }
  0x1b   :  { %200 = vst [vmem:[#allocation4 + $0x50] sm:$0xf] %v199_v34  ;;  %202 = vst [vmem:[#allocation4 + $0x54] sm:$0xf] %v201_v35  ;;  %v209_v38 = vld [vmem:[%s7013_s2 + $0x70] sm:$0xf] }
  0x1c   :  { %204 = vst [vmem:[#allocation4 + $0x58] sm:$0xf] %v203_v36  ;;  %v211_v39 = vld [vmem:[%s7013_s2 + $0x64] sm:$0xf]  ;;  %206 = vst [vmem:[#allocation4 + $0x5c] sm:$0xff] %v205_v37   ;;  %v221_v44 = vld [vmem:[%s7013_s2 + $0x7c] sm:$0xff]  }
  0x1d   :  { %210 = vst [vmem:[#allocation4 + $0x64] sm:$0xf] %v209_v38  ;;  %212 = vst [vmem:[#allocation4 + $0x68] sm:$0xf] %v211_v39  ;;  %v213_v40 = vld [vmem:[%s7013_s2 + $0x74] sm:$0xf] }
  0x1e   :  { %v215_v41 = vld [vmem:[%s7013_s2 + $0x68] sm:$0xf]  ;;  %v217_v42 = vld [vmem:[%s7013_s2 + $0x78] sm:$0xf]  ;;  %214 = vst [vmem:[#allocation4 + $0x6c] sm:$0xf] %v213_v40 }
  0x1f   :  { %216 = vst [vmem:[#allocation4 + $0x70] sm:$0xf] %v215_v41  ;;  %218 = vst [vmem:[#allocation4 + $0x74] sm:$0xf] %v217_v42  ;;  %v219_v43 = vld [vmem:[%s7013_s2 + $0x6c] sm:$0xf] }
  0x20   :  { %v225_v45 = vld [vmem:[%s7013_s2 + $0x90] sm:$0xf]  ;;  %220 = vst [vmem:[#allocation4 + $0x78] sm:$0xf] %v219_v43  ;;  %222 = vst [vmem:[#allocation4 + $0x7c] sm:$0xff] %v221_v44   ;;  %v237_v51 = vld [vmem:[%s7013_s2 + $0x9c] sm:$0xff]  }
  0x21   :  { %226 = vst [vmem:[#allocation4 + $0x84] sm:$0xf] %v225_v45  ;;  %v227_v46 = vld [vmem:[%s7013_s2 + $0x84] sm:$0xf]  ;;  %v229_v47 = vld [vmem:[%s7013_s2 + $0x94] sm:$0xf] }
  0x22   :  { %v231_v48 = vld [vmem:[%s7013_s2 + $0x88] sm:$0xf]  ;;  %228 = vst [vmem:[#allocation4 + $0x88] sm:$0xf] %v227_v46  ;;  %230 = vst [vmem:[#allocation4 + $0x8c] sm:$0xf] %v229_v47 }
  0x23   :  { %232 = vst [vmem:[#allocation4 + $0x90] sm:$0xf] %v231_v48  ;;  %v233_v49 = vld [vmem:[%s7013_s2 + $0x98] sm:$0xf]  ;;  %v235_v50 = vld [vmem:[%s7013_s2 + $0x8c] sm:$0xf] }
  0x24   :  { %234 = vst [vmem:[#allocation4 + $0x94] sm:$0xf] %v233_v49  ;;  %236 = vst [vmem:[#allocation4 + $0x98] sm:$0xf] %v235_v50  ;;  %v241_v52 = vld [vmem:[%s7013_s2 + $0xb0] sm:$0xf] }
  0x25   :  { %238 = vst [vmem:[#allocation4 + $0x9c] sm:$0xff] %v237_v51   ;;  %v243_v53 = vld [vmem:[%s7013_s2 + $0xa4] sm:$0xf]  ;;  %v245_v54 = vld [vmem:[%s7013_s2 + $0xb4] sm:$0xf]  ;;  %v253_v58 = vld [vmem:[%s7013_s2 + $0xbc] sm:$0xff]  }
  0x26   :  { %242 = vst [vmem:[#allocation4 + $0xa4] sm:$0xf] %v241_v52  ;;  %244 = vst [vmem:[#allocation4 + $0xa8] sm:$0xf] %v243_v53  ;;  %v247_v55 = vld [vmem:[%s7013_s2 + $0xa8] sm:$0xf] }
  0x27   :  { %246 = vst [vmem:[#allocation4 + $0xac] sm:$0xf] %v245_v54  ;;  %v249_v56 = vld [vmem:[%s7013_s2 + $0xb8] sm:$0xf]  ;;  %v251_v57 = vld [vmem:[%s7013_s2 + $0xac] sm:$0xf] }
  0x28   :  { %248 = vst [vmem:[#allocation4 + $0xb0] sm:$0xf] %v247_v55  ;;  %250 = vst [vmem:[#allocation4 + $0xb4] sm:$0xf] %v249_v56  ;;  %v257_v59 = vld [vmem:[%s7013_s2 + $0xd0] sm:$0xf] }
  0x29   :  { %252 = vst [vmem:[#allocation4 + $0xb8] sm:$0xf] %v251_v57  ;;  %v259_v60 = vld [vmem:[%s7013_s2 + $0xc4] sm:$0xf]  ;;  %254 = vst [vmem:[#allocation4 + $0xbc] sm:$0xff] %v253_v58   ;;  %v269_v1 = vld [vmem:[%s7013_s2 + $0xdc] sm:$0xff]  }
  0x2a   :  { %258 = vst [vmem:[#allocation4 + $0xc4] sm:$0xf] %v257_v59  ;;  %260 = vst [vmem:[#allocation4 + $0xc8] sm:$0xf] %v259_v60  ;;  %v261_v61 = vld [vmem:[%s7013_s2 + $0xd4] sm:$0xf] }
  0x2b   :  { %v263_v62 = vld [vmem:[%s7013_s2 + $0xc8] sm:$0xf]  ;;  %v265_v63 = vld [vmem:[%s7013_s2 + $0xd8] sm:$0xf]  ;;  %262 = vst [vmem:[#allocation4 + $0xcc] sm:$0xf] %v261_v61 }
  0x2c   :  { %264 = vst [vmem:[#allocation4 + $0xd0] sm:$0xf] %v263_v62  ;;  %266 = vst [vmem:[#allocation4 + $0xd4] sm:$0xf] %v265_v63  ;;  %v267_v0 = vld [vmem:[%s7013_s2 + $0xcc] sm:$0xf] }
  0x2d   :  { %v273_v2 = vld [vmem:[%s7013_s2 + $0xf0] sm:$0xf]  ;;  %268 = vst [vmem:[#allocation4 + $0xd8] sm:$0xf] %v267_v0  ;;  %270 = vst [vmem:[#allocation4 + $0xdc] sm:$0xff] %v269_v1  }
  0x2e   :  { %274 = vst [vmem:[#allocation4 + $0xe4] sm:$0xf] %v273_v2  ;;  %v275_v3 = vld [vmem:[%s7013_s2 + $0xe4] sm:$0xf]  ;;  %v277_v4 = vld [vmem:[%s7013_s2 + $0xf4] sm:$0xf] }
  0x2f   :  { %v279_v5 = vld [vmem:[%s7013_s2 + $0xe8] sm:$0xf]  ;;  %276 = vst [vmem:[#allocation4 + $0xe8] sm:$0xf] %v275_v3  ;;  %278 = vst [vmem:[#allocation4 + $0xec] sm:$0xf] %v277_v4 }
  0x30   :  { %280 = vst [vmem:[#allocation4 + $0xf0] sm:$0xf] %v279_v5  ;;  %v281_v6 = vld [vmem:[%s7013_s2 + $0xf8] sm:$0xf]  ;;  %v283_v7 = vld [vmem:[%s7013_s2 + $0xec] sm:$0xf] }
  0x31   :  { %v285_v8 = vld [vmem:[%s7013_s2 + $0xfc] sm:$0xf]  ;;  %282 = vst [vmem:[#allocation4 + $0xf4] sm:$0xf] %v281_v6  ;;  %284 = vst [vmem:[#allocation4 + $0xf8] sm:$0xf] %v283_v7 }
  0x32   :  { %286 = vst [vmem:[#allocation4 + $0xfc] sm:$0xf] %v285_v8 }
  0x33   :  { %445 = vsyncadd [#allocation9], 4096 }
  0x34   :  { %4666 = dma.done.wait [#allocation9], 4096 }
  0x35   :  { %4667 = vsyncadd [#allocation9], 4294963200  ;;  %v467_v9 = vld [vmem:[%s7014_s3] sm:$0xf] }
  0x36   :  { %468 = vst [vmem:[#allocation5] sm:$0xf] %v467_v9 }
  0x37   :  { %493 = vsyncadd [#allocation9], 64 }
  0x38   :  { %4668 = dma.done.wait [#allocation9], 64 }
  0x39   :  { %4669 = vsyncadd [#allocation9], 4294967232  ;;  %v514_v10 = vld [vmem:[%s7015_s4] sm:$0xf]  ;;  %v516_v11 = vld [vmem:[%s7015_s4 + $0x10] sm:$0xf] }
  0x3a   :  { %v518_v12 = vld [vmem:[%s7015_s4 + $0x4] sm:$0xf]  ;;  %515 = vst [vmem:[#allocation6] sm:$0xf] %v514_v10  ;;  %517 = vst [vmem:[#allocation6 + $0x4] sm:$0xf] %v516_v11 }
  0x3b   :  { %519 = vst [vmem:[#allocation6 + $0x8] sm:$0xf] %v518_v12  ;;  %v520_v13 = vld [vmem:[%s7015_s4 + $0x14] sm:$0xf]  ;;  %v522_v14 = vld [vmem:[%s7015_s4 + $0x8] sm:$0xf] }
  0x3c   :  { %v524_v15 = vld [vmem:[%s7015_s4 + $0x18] sm:$0xf]  ;;  %521 = vst [vmem:[#allocation6 + $0xc] sm:$0xf] %v520_v13  ;;  %523 = vst [vmem:[#allocation6 + $0x10] sm:$0xf] %v522_v14 }
  0x3d   :  { %525 = vst [vmem:[#allocation6 + $0x14] sm:$0xf] %v524_v15  ;;  %v526_v16 = vld [vmem:[%s7015_s4 + $0xc] sm:$0xf]  ;;  %v528_v17 = vld [vmem:[%s7015_s4 + $0x1c] sm:$0xff]  }
  0x3e   :  { %v532_v18 = vld [vmem:[%s7015_s4 + $0x30] sm:$0xf]  ;;  %527 = vst [vmem:[#allocation6 + $0x18] sm:$0xf] %v526_v16  ;;  %529 = vst [vmem:[#allocation6 + $0x1c] sm:$0xff] %v528_v17   ;;  %v544_v24 = vld [vmem:[%s7015_s4 + $0x3c] sm:$0xff]  }
  0x3f   :  { %533 = vst [vmem:[#allocation6 + $0x24] sm:$0xf] %v532_v18  ;;  %v534_v19 = vld [vmem:[%s7015_s4 + $0x24] sm:$0xf]  ;;  %v536_v20 = vld [vmem:[%s7015_s4 + $0x34] sm:$0xf] }
  0x40   :  { %v538_v21 = vld [vmem:[%s7015_s4 + $0x28] sm:$0xf]  ;;  %535 = vst [vmem:[#allocation6 + $0x28] sm:$0xf] %v534_v19  ;;  %537 = vst [vmem:[#allocation6 + $0x2c] sm:$0xf] %v536_v20 }
  0x41   :  { %539 = vst [vmem:[#allocation6 + $0x30] sm:$0xf] %v538_v21  ;;  %v540_v22 = vld [vmem:[%s7015_s4 + $0x38] sm:$0xf]  ;;  %v542_v23 = vld [vmem:[%s7015_s4 + $0x2c] sm:$0xf] }
  0x42   :  { %541 = vst [vmem:[#allocation6 + $0x34] sm:$0xf] %v540_v22  ;;  %543 = vst [vmem:[#allocation6 + $0x38] sm:$0xf] %v542_v23  ;;  %v548_v25 = vld [vmem:[%s7015_s4 + $0x50] sm:$0xf] }
  0x43   :  { %545 = vst [vmem:[#allocation6 + $0x3c] sm:$0xff] %v544_v24   ;;  %v550_v26 = vld [vmem:[%s7015_s4 + $0x44] sm:$0xf]  ;;  %v552_v27 = vld [vmem:[%s7015_s4 + $0x54] sm:$0xf]  ;;  %v560_v31 = vld [vmem:[%s7015_s4 + $0x5c] sm:$0xff]  }
  0x44   :  { %549 = vst [vmem:[#allocation6 + $0x44] sm:$0xf] %v548_v25  ;;  %551 = vst [vmem:[#allocation6 + $0x48] sm:$0xf] %v550_v26  ;;  %v554_v28 = vld [vmem:[%s7015_s4 + $0x48] sm:$0xf] }
  0x45   :  { %553 = vst [vmem:[#allocation6 + $0x4c] sm:$0xf] %v552_v27  ;;  %v556_v29 = vld [vmem:[%s7015_s4 + $0x58] sm:$0xf]  ;;  %v558_v30 = vld [vmem:[%s7015_s4 + $0x4c] sm:$0xf] }
  0x46   :  { %555 = vst [vmem:[#allocation6 + $0x50] sm:$0xf] %v554_v28  ;;  %557 = vst [vmem:[#allocation6 + $0x54] sm:$0xf] %v556_v29  ;;  %v564_v32 = vld [vmem:[%s7015_s4 + $0x70] sm:$0xf] }
  0x47   :  { %559 = vst [vmem:[#allocation6 + $0x58] sm:$0xf] %v558_v30  ;;  %v566_v33 = vld [vmem:[%s7015_s4 + $0x64] sm:$0xf]  ;;  %561 = vst [vmem:[#allocation6 + $0x5c] sm:$0xff] %v560_v31   ;;  %v576_v38 = vld [vmem:[%s7015_s4 + $0x7c] sm:$0xff]  }
  0x48   :  { %565 = vst [vmem:[#allocation6 + $0x64] sm:$0xf] %v564_v32  ;;  %567 = vst [vmem:[#allocation6 + $0x68] sm:$0xf] %v566_v33  ;;  %v568_v34 = vld [vmem:[%s7015_s4 + $0x74] sm:$0xf] }
  0x49   :  { %v570_v35 = vld [vmem:[%s7015_s4 + $0x68] sm:$0xf]  ;;  %v572_v36 = vld [vmem:[%s7015_s4 + $0x78] sm:$0xf]  ;;  %569 = vst [vmem:[#allocation6 + $0x6c] sm:$0xf] %v568_v34 }
  0x4a   :  { %571 = vst [vmem:[#allocation6 + $0x70] sm:$0xf] %v570_v35  ;;  %573 = vst [vmem:[#allocation6 + $0x74] sm:$0xf] %v572_v36  ;;  %v574_v37 = vld [vmem:[%s7015_s4 + $0x6c] sm:$0xf] }
  0x4b   :  { %v580_v39 = vld [vmem:[%s7015_s4 + $0x90] sm:$0xf]  ;;  %575 = vst [vmem:[#allocation6 + $0x78] sm:$0xf] %v574_v37  ;;  %577 = vst [vmem:[#allocation6 + $0x7c] sm:$0xff] %v576_v38   ;;  %v592_v45 = vld [vmem:[%s7015_s4 + $0x9c] sm:$0xff]  }
  0x4c   :  { %581 = vst [vmem:[#allocation6 + $0x84] sm:$0xf] %v580_v39  ;;  %v582_v40 = vld [vmem:[%s7015_s4 + $0x84] sm:$0xf]  ;;  %v584_v41 = vld [vmem:[%s7015_s4 + $0x94] sm:$0xf] }
  0x4d   :  { %v586_v42 = vld [vmem:[%s7015_s4 + $0x88] sm:$0xf]  ;;  %583 = vst [vmem:[#allocation6 + $0x88] sm:$0xf] %v582_v40  ;;  %585 = vst [vmem:[#allocation6 + $0x8c] sm:$0xf] %v584_v41 }
  0x4e   :  { %587 = vst [vmem:[#allocation6 + $0x90] sm:$0xf] %v586_v42  ;;  %v588_v43 = vld [vmem:[%s7015_s4 + $0x98] sm:$0xf]  ;;  %v590_v44 = vld [vmem:[%s7015_s4 + $0x8c] sm:$0xf] }
  0x4f   :  { %589 = vst [vmem:[#allocation6 + $0x94] sm:$0xf] %v588_v43  ;;  %591 = vst [vmem:[#allocation6 + $0x98] sm:$0xf] %v590_v44  ;;  %v596_v46 = vld [vmem:[%s7015_s4 + $0xb0] sm:$0xf] }
  0x50   :  { %593 = vst [vmem:[#allocation6 + $0x9c] sm:$0xff] %v592_v45   ;;  %v598_v47 = vld [vmem:[%s7015_s4 + $0xa4] sm:$0xf]  ;;  %v600_v48 = vld [vmem:[%s7015_s4 + $0xb4] sm:$0xf]  ;;  %v608_v52 = vld [vmem:[%s7015_s4 + $0xbc] sm:$0xff]  }
  0x51   :  { %597 = vst [vmem:[#allocation6 + $0xa4] sm:$0xf] %v596_v46  ;;  %599 = vst [vmem:[#allocation6 + $0xa8] sm:$0xf] %v598_v47  ;;  %v602_v49 = vld [vmem:[%s7015_s4 + $0xa8] sm:$0xf] }
  0x52   :  { %601 = vst [vmem:[#allocation6 + $0xac] sm:$0xf] %v600_v48  ;;  %v604_v50 = vld [vmem:[%s7015_s4 + $0xb8] sm:$0xf]  ;;  %v606_v51 = vld [vmem:[%s7015_s4 + $0xac] sm:$0xf] }
  0x53   :  { %603 = vst [vmem:[#allocation6 + $0xb0] sm:$0xf] %v602_v49  ;;  %605 = vst [vmem:[#allocation6 + $0xb4] sm:$0xf] %v604_v50  ;;  %v612_v53 = vld [vmem:[%s7015_s4 + $0xd0] sm:$0xf] }
  0x54   :  { %607 = vst [vmem:[#allocation6 + $0xb8] sm:$0xf] %v606_v51  ;;  %v614_v54 = vld [vmem:[%s7015_s4 + $0xc4] sm:$0xf]  ;;  %609 = vst [vmem:[#allocation6 + $0xbc] sm:$0xff] %v608_v52   ;;  %v624_v59 = vld [vmem:[%s7015_s4 + $0xdc] sm:$0xff]  }
  0x55   :  { %613 = vst [vmem:[#allocation6 + $0xc4] sm:$0xf] %v612_v53  ;;  %615 = vst [vmem:[#allocation6 + $0xc8] sm:$0xf] %v614_v54  ;;  %v616_v55 = vld [vmem:[%s7015_s4 + $0xd4] sm:$0xf] }
  0x56   :  { %v618_v56 = vld [vmem:[%s7015_s4 + $0xc8] sm:$0xf]  ;;  %v620_v57 = vld [vmem:[%s7015_s4 + $0xd8] sm:$0xf]  ;;  %617 = vst [vmem:[#allocation6 + $0xcc] sm:$0xf] %v616_v55 }
  0x57   :  { %619 = vst [vmem:[#allocation6 + $0xd0] sm:$0xf] %v618_v56  ;;  %621 = vst [vmem:[#allocation6 + $0xd4] sm:$0xf] %v620_v57  ;;  %v622_v58 = vld [vmem:[%s7015_s4 + $0xcc] sm:$0xf] }
  0x58   :  { %v628_v60 = vld [vmem:[%s7015_s4 + $0xf0] sm:$0xf]  ;;  %623 = vst [vmem:[#allocation6 + $0xd8] sm:$0xf] %v622_v58  ;;  %625 = vst [vmem:[#allocation6 + $0xdc] sm:$0xff] %v624_v59  }
  0x59   :  { %629 = vst [vmem:[#allocation6 + $0xe4] sm:$0xf] %v628_v60  ;;  %v630_v61 = vld [vmem:[%s7015_s4 + $0xe4] sm:$0xf]  ;;  %v632_v62 = vld [vmem:[%s7015_s4 + $0xf4] sm:$0xf] }
  0x5a   :  { %v634_v63 = vld [vmem:[%s7015_s4 + $0xe8] sm:$0xf]  ;;  %631 = vst [vmem:[#allocation6 + $0xe8] sm:$0xf] %v630_v61  ;;  %633 = vst [vmem:[#allocation6 + $0xec] sm:$0xf] %v632_v62 }
  0x5b   :  { %635 = vst [vmem:[#allocation6 + $0xf0] sm:$0xf] %v634_v63  ;;  %v636_v0 = vld [vmem:[%s7015_s4 + $0xf8] sm:$0xf]  ;;  %v638_v1 = vld [vmem:[%s7015_s4 + $0xec] sm:$0xf] }
  0x5c   :  { %v640_v2 = vld [vmem:[%s7015_s4 + $0xfc] sm:$0xf]  ;;  %637 = vst [vmem:[#allocation6 + $0xf4] sm:$0xf] %v636_v0  ;;  %639 = vst [vmem:[#allocation6 + $0xf8] sm:$0xf] %v638_v1 }
  0x5d   :  { %641 = vst [vmem:[#allocation6 + $0xfc] sm:$0xf] %v640_v2 }
  0x5e   :  { %800 = vsyncadd [#allocation9], 4096 }
  0x5f   :  { %4670 = dma.done.wait [#allocation9], 4096 }
  0x60   :  { %4671 = vsyncadd [#allocation9], 4294963200  ;;  %v820_v3 = vld [vmem:[%s7016_s5] sm:$0xf]  ;;  %v822_v4 = vld [vmem:[%s7016_s5 + $0x10] sm:$0xf] }
  0x61   :  { %v824_v5 = vld [vmem:[%s7016_s5 + $0x4] sm:$0xf]  ;;  %821 = vst [vmem:[#allocation7] sm:$0xf] %v820_v3  ;;  %823 = vst [vmem:[#allocation7 + $0x4] sm:$0xf] %v822_v4 }
  0x62   :  { %825 = vst [vmem:[#allocation7 + $0x8] sm:$0xf] %v824_v5  ;;  %v826_v6 = vld [vmem:[%s7016_s5 + $0x14] sm:$0xf]  ;;  %v828_v7 = vld [vmem:[%s7016_s5 + $0x8] sm:$0xf] }
  0x63   :  { %v830_v8 = vld [vmem:[%s7016_s5 + $0x18] sm:$0xf]  ;;  %827 = vst [vmem:[#allocation7 + $0xc] sm:$0xf] %v826_v6  ;;  %829 = vst [vmem:[#allocation7 + $0x10] sm:$0xf] %v828_v7 }
  0x64   :  { %831 = vst [vmem:[#allocation7 + $0x14] sm:$0xf] %v830_v8  ;;  %v832_v9 = vld [vmem:[%s7016_s5 + $0xc] sm:$0xf]  ;;  %v834_v10 = vld [vmem:[%s7016_s5 + $0x1c] sm:$0xff]  }
  0x65   :  { %v838_v11 = vld [vmem:[%s7016_s5 + $0x30] sm:$0xf]  ;;  %833 = vst [vmem:[#allocation7 + $0x18] sm:$0xf] %v832_v9  ;;  %835 = vst [vmem:[#allocation7 + $0x1c] sm:$0xff] %v834_v10   ;;  %v850_v17 = vld [vmem:[%s7016_s5 + $0x3c] sm:$0xff]  }
  0x66   :  { %839 = vst [vmem:[#allocation7 + $0x24] sm:$0xf] %v838_v11  ;;  %v840_v12 = vld [vmem:[%s7016_s5 + $0x24] sm:$0xf]  ;;  %v842_v13 = vld [vmem:[%s7016_s5 + $0x34] sm:$0xf] }
  0x67   :  { %v844_v14 = vld [vmem:[%s7016_s5 + $0x28] sm:$0xf]  ;;  %841 = vst [vmem:[#allocation7 + $0x28] sm:$0xf] %v840_v12  ;;  %843 = vst [vmem:[#allocation7 + $0x2c] sm:$0xf] %v842_v13 }
  0x68   :  { %845 = vst [vmem:[#allocation7 + $0x30] sm:$0xf] %v844_v14  ;;  %v846_v15 = vld [vmem:[%s7016_s5 + $0x38] sm:$0xf]  ;;  %v848_v16 = vld [vmem:[%s7016_s5 + $0x2c] sm:$0xf] }
  0x69   :  { %847 = vst [vmem:[#allocation7 + $0x34] sm:$0xf] %v846_v15  ;;  %849 = vst [vmem:[#allocation7 + $0x38] sm:$0xf] %v848_v16  ;;  %v854_v18 = vld [vmem:[%s7016_s5 + $0x50] sm:$0xf] }
  0x6a   :  { %851 = vst [vmem:[#allocation7 + $0x3c] sm:$0xff] %v850_v17   ;;  %v856_v19 = vld [vmem:[%s7016_s5 + $0x44] sm:$0xf]  ;;  %v858_v20 = vld [vmem:[%s7016_s5 + $0x54] sm:$0xf]  ;;  %v866_v24 = vld [vmem:[%s7016_s5 + $0x5c] sm:$0xff]  }
  0x6b   :  { %855 = vst [vmem:[#allocation7 + $0x44] sm:$0xf] %v854_v18  ;;  %857 = vst [vmem:[#allocation7 + $0x48] sm:$0xf] %v856_v19  ;;  %v860_v21 = vld [vmem:[%s7016_s5 + $0x48] sm:$0xf] }
  0x6c   :  { %859 = vst [vmem:[#allocation7 + $0x4c] sm:$0xf] %v858_v20  ;;  %v862_v22 = vld [vmem:[%s7016_s5 + $0x58] sm:$0xf]  ;;  %v864_v23 = vld [vmem:[%s7016_s5 + $0x4c] sm:$0xf] }
  0x6d   :  { %861 = vst [vmem:[#allocation7 + $0x50] sm:$0xf] %v860_v21  ;;  %863 = vst [vmem:[#allocation7 + $0x54] sm:$0xf] %v862_v22  ;;  %v870_v25 = vld [vmem:[%s7016_s5 + $0x70] sm:$0xf] }
  0x6e   :  { %865 = vst [vmem:[#allocation7 + $0x58] sm:$0xf] %v864_v23  ;;  %v872_v26 = vld [vmem:[%s7016_s5 + $0x64] sm:$0xf]  ;;  %867 = vst [vmem:[#allocation7 + $0x5c] sm:$0xff] %v866_v24   ;;  %v882_v31 = vld [vmem:[%s7016_s5 + $0x7c] sm:$0xff]  }
  0x6f   :  { %871 = vst [vmem:[#allocation7 + $0x64] sm:$0xf] %v870_v25  ;;  %873 = vst [vmem:[#allocation7 + $0x68] sm:$0xf] %v872_v26  ;;  %v874_v27 = vld [vmem:[%s7016_s5 + $0x74] sm:$0xf] }
  0x70   :  { %v876_v28 = vld [vmem:[%s7016_s5 + $0x68] sm:$0xf]  ;;  %v878_v29 = vld [vmem:[%s7016_s5 + $0x78] sm:$0xf]  ;;  %875 = vst [vmem:[#allocation7 + $0x6c] sm:$0xf] %v874_v27 }
  0x71   :  { %877 = vst [vmem:[#allocation7 + $0x70] sm:$0xf] %v876_v28  ;;  %879 = vst [vmem:[#allocation7 + $0x74] sm:$0xf] %v878_v29  ;;  %v880_v30 = vld [vmem:[%s7016_s5 + $0x6c] sm:$0xf] }
  0x72   :  { %v886_v32 = vld [vmem:[%s7016_s5 + $0x90] sm:$0xf]  ;;  %881 = vst [vmem:[#allocation7 + $0x78] sm:$0xf] %v880_v30  ;;  %883 = vst [vmem:[#allocation7 + $0x7c] sm:$0xff] %v882_v31   ;;  %v898_v38 = vld [vmem:[%s7016_s5 + $0x9c] sm:$0xff]  }
  0x73   :  { %887 = vst [vmem:[#allocation7 + $0x84] sm:$0xf] %v886_v32  ;;  %v888_v33 = vld [vmem:[%s7016_s5 + $0x84] sm:$0xf]  ;;  %v890_v34 = vld [vmem:[%s7016_s5 + $0x94] sm:$0xf] }
  0x74   :  { %v892_v35 = vld [vmem:[%s7016_s5 + $0x88] sm:$0xf]  ;;  %889 = vst [vmem:[#allocation7 + $0x88] sm:$0xf] %v888_v33  ;;  %891 = vst [vmem:[#allocation7 + $0x8c] sm:$0xf] %v890_v34 }
  0x75   :  { %893 = vst [vmem:[#allocation7 + $0x90] sm:$0xf] %v892_v35  ;;  %v894_v36 = vld [vmem:[%s7016_s5 + $0x98] sm:$0xf]  ;;  %v896_v37 = vld [vmem:[%s7016_s5 + $0x8c] sm:$0xf] }
  0x76   :  { %895 = vst [vmem:[#allocation7 + $0x94] sm:$0xf] %v894_v36  ;;  %897 = vst [vmem:[#allocation7 + $0x98] sm:$0xf] %v896_v37  ;;  %v902_v39 = vld [vmem:[%s7016_s5 + $0xb0] sm:$0xf] }
  0x77   :  { %899 = vst [vmem:[#allocation7 + $0x9c] sm:$0xff] %v898_v38   ;;  %v904_v40 = vld [vmem:[%s7016_s5 + $0xa4] sm:$0xf]  ;;  %v906_v41 = vld [vmem:[%s7016_s5 + $0xb4] sm:$0xf]  ;;  %v914_v45 = vld [vmem:[%s7016_s5 + $0xbc] sm:$0xff]  }
  0x78   :  { %903 = vst [vmem:[#allocation7 + $0xa4] sm:$0xf] %v902_v39  ;;  %905 = vst [vmem:[#allocation7 + $0xa8] sm:$0xf] %v904_v40  ;;  %v908_v42 = vld [vmem:[%s7016_s5 + $0xa8] sm:$0xf] }
  0x79   :  { %907 = vst [vmem:[#allocation7 + $0xac] sm:$0xf] %v906_v41  ;;  %v910_v43 = vld [vmem:[%s7016_s5 + $0xb8] sm:$0xf]  ;;  %v912_v44 = vld [vmem:[%s7016_s5 + $0xac] sm:$0xf] }
  0x7a   :  { %909 = vst [vmem:[#allocation7 + $0xb0] sm:$0xf] %v908_v42  ;;  %911 = vst [vmem:[#allocation7 + $0xb4] sm:$0xf] %v910_v43  ;;  %v918_v46 = vld [vmem:[%s7016_s5 + $0xd0] sm:$0xf] }
  0x7b   :  { %913 = vst [vmem:[#allocation7 + $0xb8] sm:$0xf] %v912_v44  ;;  %v920_v47 = vld [vmem:[%s7016_s5 + $0xc4] sm:$0xf]  ;;  %915 = vst [vmem:[#allocation7 + $0xbc] sm:$0xff] %v914_v45   ;;  %v930_v52 = vld [vmem:[%s7016_s5 + $0xdc] sm:$0xff]  }
  0x7c   :  { %919 = vst [vmem:[#allocation7 + $0xc4] sm:$0xf] %v918_v46  ;;  %921 = vst [vmem:[#allocation7 + $0xc8] sm:$0xf] %v920_v47  ;;  %v922_v48 = vld [vmem:[%s7016_s5 + $0xd4] sm:$0xf] }
  0x7d   :  { %v924_v49 = vld [vmem:[%s7016_s5 + $0xc8] sm:$0xf]  ;;  %v926_v50 = vld [vmem:[%s7016_s5 + $0xd8] sm:$0xf]  ;;  %923 = vst [vmem:[#allocation7 + $0xcc] sm:$0xf] %v922_v48 }
  0x7e   :  { %925 = vst [vmem:[#allocation7 + $0xd0] sm:$0xf] %v924_v49  ;;  %927 = vst [vmem:[#allocation7 + $0xd4] sm:$0xf] %v926_v50  ;;  %v928_v51 = vld [vmem:[%s7016_s5 + $0xcc] sm:$0xf] }
  0x7f   :  { %v934_v53 = vld [vmem:[%s7016_s5 + $0xf0] sm:$0xf]  ;;  %929 = vst [vmem:[#allocation7 + $0xd8] sm:$0xf] %v928_v51  ;;  %931 = vst [vmem:[#allocation7 + $0xdc] sm:$0xff] %v930_v52  }
  0x80   :  { %935 = vst [vmem:[#allocation7 + $0xe4] sm:$0xf] %v934_v53  ;;  %v936_v54 = vld [vmem:[%s7016_s5 + $0xe4] sm:$0xf]  ;;  %v938_v55 = vld [vmem:[%s7016_s5 + $0xf4] sm:$0xf] }
  0x81   :  { %v940_v56 = vld [vmem:[%s7016_s5 + $0xe8] sm:$0xf]  ;;  %937 = vst [vmem:[#allocation7 + $0xe8] sm:$0xf] %v936_v54  ;;  %939 = vst [vmem:[#allocation7 + $0xec] sm:$0xf] %v938_v55 }
  0x82   :  { %941 = vst [vmem:[#allocation7 + $0xf0] sm:$0xf] %v940_v56  ;;  %v942_v57 = vld [vmem:[%s7016_s5 + $0xf8] sm:$0xf]  ;;  %v944_v58 = vld [vmem:[%s7016_s5 + $0xec] sm:$0xf] }
  0x83   :  { %v946_v59 = vld [vmem:[%s7016_s5 + $0xfc] sm:$0xf]  ;;  %943 = vst [vmem:[#allocation7 + $0xf4] sm:$0xf] %v942_v57  ;;  %945 = vst [vmem:[#allocation7 + $0xf8] sm:$0xf] %v944_v58 }
  0x84   :  { %947 = vst [vmem:[#allocation7 + $0xfc] sm:$0xf] %v946_v59 }
  0x85   :  { %1106 = vsyncadd [#allocation9], 4096 }
  0x86   :  { %4672 = dma.done.wait [#allocation9], 4096 }
  0x87   :  { %4673 = vsyncadd [#allocation9], 4294963200  ;;  %v1126_v60 = vld [vmem:[%s7017_s6] sm:$0xf] }
  0x88   :  { %1127 = vst [vmem:[#allocation8] sm:$0xf] %v1126_v60 }
  0x89   :  { %1152 = vsyncadd [#allocation9], 64 }
  0x8a   :  { %4674 = dma.done.wait [#allocation9], 64 }
  0x8b   :  { %4675 = vsyncadd [#allocation9], 4294967232  ;;  %v7022_v61 = vmov 0   ;;  %v1156_v62 = vld [vmem:[#allocation3 + $0x8] sm:$0xff]  ;;  %v1158_v63 = vld [vmem:[#allocation3 + $0x18] sm:$0xff]  ;;  %vm1331_vm0 = vcmask 261120  }
  0x8c   :  { %1376 = vmatprep.mubr.bf16.mxu0 %v7022_v61  ;;  %1449 = vmatprep.mubr.bf16.mxu1 %v7022_v61  ;;  %v1155_v0 = vld [vmem:[#allocation3] sm:$0xff]  ;;  %v1157_v1 = vld [vmem:[#allocation3 + $0x10] sm:$0xff]  ;;  %v1160_v2 = vld [vmem:[#allocation3 + $0x28] sm:$0xff] }
  0x8d   :  { %1344 = vmatprep.subr.bf16.mxu0 %v1156_v62  ;;  %1417 = vmatprep.subr.bf16.mxu1 %v1158_v63  ;;  %v1162_v3 = vld [vmem:[#allocation3 + $0x38] sm:$0xff]  ;;  %v1159_v4 = vld [vmem:[#allocation3 + $0x20] sm:$0xff]  ;;  %v1161_v5 = vld [vmem:[#allocation3 + $0x30] sm:$0xff] }
  0x8e   :  { %1345 = vmatpush1.bf16.msra.mxu0 %v1155_v0  ;;  %1418 = vmatpush1.bf16.msra.mxu1 %v1157_v1  ;;  %v5306_v6 = vld [vmem:[#allocation4 + $0x8] sm:$0xff]  ;;  %v5308_v7 = vld [vmem:[#allocation4 + $0x18] sm:$0xff]  ;;  %v4212_v8 = vld [vmem:[%s7012_s0] sm:$0xff]  }
  0x8f   :  { %1346 = vmatprep.subr.bf16.mxu0 %v1160_v2  ;;  %1419 = vmatprep.subr.bf16.mxu1 %v1162_v3  ;;  %v5315_v9 = vld [vmem:[#allocation4] sm:$0xff]  ;;  %v5317_v10 = vld [vmem:[#allocation4 + $0x10] sm:$0xff]  ;;  %v5319_v11 = vld [vmem:[#allocation4 + $0x28] sm:$0xff] }
  0x90   :  { %v5321_v12 = vld [vmem:[#allocation4 + $0x38] sm:$0xff]  ;;  %v5329_v13 = vld [vmem:[#allocation4 + $0x20] sm:$0xff]  ;;  %v5331_v14 = vld [vmem:[#allocation4 + $0x30] sm:$0xff] }
  0x91   :  { %v5335_v15 = vld [vmem:[#allocation4 + $0x48] sm:$0xff]  ;;  %v5337_v16 = vld [vmem:[#allocation4 + $0x58] sm:$0xff]  ;;  %v5346_v18 = vld [vmem:[#allocation4 + $0x40] sm:$0xff] }
  0x92   :  { %1347 = vmatpush1.bf16.msra.mxu0 %v1159_v4  ;;  %1420 = vmatpush1.bf16.msra.mxu1 %v1161_v5  ;;  %v4213_v17 = vld [vmem:[%s7012_s0 + $0x8] sm:$0xff]   ;;  %v5348_v19 = vld [vmem:[#allocation4 + $0x50] sm:$0xff]  ;;  %v5352_v21 = vld [vmem:[#allocation4 + $0x78] sm:$0xff] }
  0x93   :  { %1536 = vmatprep.subr.bf16.mxu0 %v5306_v6  ;;  %1577 = vmatprep.subr.bf16.mxu1 %v5308_v7  ;;  %v5350_v20 = vld [vmem:[#allocation4 + $0x68] sm:$0xff]  ;;  %v5360_v22 = vld [vmem:[#allocation4 + $0x60] sm:$0xff]  ;;  %v5362_v23 = vld [vmem:[#allocation4 + $0x70] sm:$0xff] }
  0x94   :  { %v5366_v24 = vld [vmem:[#allocation4 + $0x88] sm:$0xff]  ;;  %v5368_v25 = vld [vmem:[#allocation4 + $0x98] sm:$0xff]  ;;  %v4214_v26 = vld [vmem:[%s7012_s0 + $0x10] sm:$0xff]  }
  0x95   :  { %4142 = vmatmul.mubr.msk.bf16.vlgmr.msra.gmra.mrb[0].mxu0 %vm1331_vm0, %v4212_v8  ;;  %4146 = vmatmul.mubr.msk.bf16.vlgmr.msra.gmra.mrb[0].mxu1 %vm1331_vm0, %v4212_v8  ;;  %v5377_v27 = vld [vmem:[#allocation4 + $0x80] sm:$0xff]  ;;  %v5379_v28 = vld [vmem:[#allocation4 + $0x90] sm:$0xff]  ;;  %v5381_v29 = vld [vmem:[#allocation4 + $0xa8] sm:$0xff] }
  0x96   :  { %1537 = vmatpush1.bf16.msra.mxu0 %v5315_v9  ;;  %1578 = vmatpush1.bf16.msra.mxu1 %v5317_v10  ;;  %v5383_v30 = vld [vmem:[#allocation4 + $0xb8] sm:$0xff]  ;;  %v5391_v31 = vld [vmem:[#allocation4 + $0xa0] sm:$0xff]  ;;  %v5393_v32 = vld [vmem:[#allocation4 + $0xb0] sm:$0xff] }
  0x97   :  { %1538 = vmatprep.subr.bf16.mxu0 %v5319_v11  ;;  %1579 = vmatprep.subr.bf16.mxu1 %v5321_v12  ;;  %v5397_v33 = vld [vmem:[#allocation4 + $0xc8] sm:$0xff]  ;;  %v5399_v34 = vld [vmem:[#allocation4 + $0xd8] sm:$0xff]  ;;  %v5408_v36 = vld [vmem:[#allocation4 + $0xc0] sm:$0xff] }
  0x98   :  { %1386 = vmatprep.mubr.bf16.mxu0 %v7022_v61  ;;  %1459 = vmatprep.mubr.bf16.mxu1 %v7022_v61  ;;  %v4215_v35 = vld [vmem:[%s7012_s0 + $0x18] sm:$0xff]   ;;  %v5410_v37 = vld [vmem:[#allocation4 + $0xd0] sm:$0xff]  ;;  %v5412_v38 = vld [vmem:[#allocation4 + $0xe8] sm:$0xff] }
  0x99   :  { %v5414_v39 = vld [vmem:[#allocation4 + $0xf8] sm:$0xff]  ;;  %v1522_v40 = vld [vmem:[%s7019_s8] sm:$0xff]  ;;  %v5427_v42 = vld [vmem:[#allocation4 + $0xf0] sm:$0xff] }
  0x9a   :  { %1539 = vmatpush1.bf16.msra.mxu0 %v5329_v13  ;;  %1580 = vmatpush1.bf16.msra.mxu1 %v5331_v14  ;;  %v5425_v41 = vld [vmem:[#allocation4 + $0xe0] sm:$0xff]  ;;  %v1535_v43 = vpack.c.bf16 %v1522_v40, %v1522_v40  ;;  %v5435_v44 = vld [vmem:[#allocation7 + $0x8] sm:$0xff]  ;;  %v5444_v47 = vld [vmem:[#allocation7 + $0x10] sm:$0xff] }
  0x9b   :  { %1540 = vmatprep.subr.bf16.mxu0 %v5335_v15  ;;  %1581 = vmatprep.subr.bf16.mxu1 %v5337_v16  ;;  %v5438_v45 = vld [vmem:[#allocation7 + $0x18] sm:$0xff]  ;;  %v5440_v46 = vld [vmem:[#allocation7] sm:$0xff]  ;;  %v5447_v48 = vld [vmem:[#allocation7 + $0x28] sm:$0xff] }
  0x9c   :  { %v5450_v49 = vld [vmem:[#allocation7 + $0x38] sm:$0xff]  ;;  %v5452_v50 = vld [vmem:[#allocation7 + $0x20] sm:$0xff]  ;;  %v5456_v51 = vld [vmem:[#allocation7 + $0x30] sm:$0xff] }
  0x9d   :  { %4143 = vmatmul.mubr.msk.bf16.gmra.mrb[4].mxu0 %vm1331_vm0, %v4213_v17  ;;  %4147 = vmatmul.mubr.msk.bf16.gmra.mrb[4].mxu1 %vm1331_vm0, %v4213_v17  ;;  %v5459_v52 = vld [vmem:[#allocation7 + $0x48] sm:$0xff]  ;;  %v5462_v53 = vld [vmem:[#allocation7 + $0x58] sm:$0xff]  ;;  %v5464_v54 = vld [vmem:[#allocation7 + $0x40] sm:$0xff] }
  0x9e   :  { %1541 = vmatpush1.bf16.msra.mxu0 %v5346_v18  ;;  %1582 = vmatpush1.bf16.msra.mxu1 %v5348_v19  ;;  %7282 = vst [vmem:[#allocation22_spill] sm:$0xff] %v5459_v52  ;;  %7283 = vst [vmem:[#allocation23_spill] sm:$0xff] %v5462_v53  ;;  %v5468_v55 = vld [vmem:[#allocation7 + $0x50] sm:$0xff]  ;;  %v5471_v56 = vld [vmem:[#allocation7 + $0x68] sm:$0xff] }
  0x9f   :  { %1542 = vmatprep.subr.bf16.mxu0 %v5350_v20  ;;  %1583 = vmatprep.subr.bf16.mxu1 %v5352_v21  ;;  %7284 = vst [vmem:[#allocation24_spill] sm:$0xff] %v5464_v54  ;;  %7285 = vst [vmem:[#allocation25_spill] sm:$0xff] %v5468_v55  ;;  %v5474_v57 = vld [vmem:[#allocation7 + $0x78] sm:$0xff]  ;;  %v5476_v58 = vld [vmem:[#allocation7 + $0x60] sm:$0xff] }
  0xa0   :  { %1396 = vmatprep.mubr.bf16.mxu0 %v7022_v61  ;;  %1469 = vmatprep.mubr.bf16.mxu1 %v7022_v61  ;;  %7286 = vst [vmem:[#allocation26_spill] sm:$0xff] %v5471_v56  ;;  %7287 = vst [vmem:[#allocation27_spill] sm:$0xff] %v5474_v57  ;;  %v5480_v59 = vld [vmem:[#allocation7 + $0x70] sm:$0xff]  ;;  %v5483_v60 = vld [vmem:[#allocation7 + $0x88] sm:$0xff] }
  0xa1   :  { %7288 = vst [vmem:[#allocation28_spill] sm:$0xff] %v5476_v58  ;;  %7289 = vst [vmem:[#allocation29_spill] sm:$0xff] %v5480_v59  ;;  %v5486_v62 = vld [vmem:[#allocation7 + $0x98] sm:$0xff]  ;;  %v5489_v63 = vld [vmem:[#allocation7 + $0x80] sm:$0xff] }
  0xa2   :  { %1543 = vmatpush1.bf16.msra.mxu0 %v5360_v22  ;;  %1584 = vmatpush1.bf16.msra.mxu1 %v5362_v23  ;;  %7290 = vst [vmem:[#allocation30_spill] sm:$0xff] %v5483_v60  ;;  %7291 = vst [vmem:[#allocation31_spill] sm:$0xff] %v5486_v62  ;;  %v5492_v0 = vld [vmem:[#allocation7 + $0x90] sm:$0xff]  ;;  %v5495_v1 = vld [vmem:[#allocation7 + $0xa8] sm:$0xff] }
  0xa3   :  { %1544 = vmatprep.subr.bf16.mxu0 %v5366_v24  ;;  %1585 = vmatprep.subr.bf16.mxu1 %v5368_v25  ;;  %7292 = vst [vmem:[#allocation32_spill] sm:$0xff] %v5489_v63  ;;  %7293 = vst [vmem:[#allocation33_spill] sm:$0xff] %v5492_v0  ;;  %v5498_v2 = vld [vmem:[#allocation7 + $0xb8] sm:$0xff]  ;;  %v5500_v3 = vld [vmem:[#allocation7 + $0xa0] sm:$0xff] }
  0xa4   :  { %7294 = vst [vmem:[#allocation34_spill] sm:$0xff] %v5495_v1  ;;  %7295 = vst [vmem:[#allocation35_spill] sm:$0xff] %v5498_v2  ;;  %v5504_v4 = vld [vmem:[#allocation7 + $0xb0] sm:$0xff]  ;;  %v5507_v5 = vld [vmem:[#allocation7 + $0xc8] sm:$0xff] }
  0xa5   :  { %4144 = vmatmul.mubr.msk.bf16.gmra.mrb[8].mxu0 %vm1331_vm0, %v4214_v26  ;;  %4148 = vmatmul.mubr.msk.bf16.gmra.mrb[8].mxu1 %vm1331_vm0, %v4214_v26  ;;  %7296 = vst [vmem:[#allocation36_spill] sm:$0xff] %v5500_v3  ;;  %7297 = vst [vmem:[#allocation37_spill] sm:$0xff] %v5504_v4  ;;  %v5510_v8 = vld [vmem:[#allocation7 + $0xd8] sm:$0xff]  ;;  %v5512_v17 = vld [vmem:[#allocation7 + $0xc0] sm:$0xff] }
  0xa6   :  { %1545 = vmatpush1.bf16.msra.mxu0 %v5377_v27  ;;  %1586 = vmatpush1.bf16.msra.mxu1 %v5379_v28  ;;  %7298 = vst [vmem:[#allocation38_spill] sm:$0xff] %v5507_v5  ;;  %7299 = vst [vmem:[#allocation39_spill] sm:$0xff] %v5510_v8  ;;  %v5516_v26 = vld [vmem:[#allocation7 + $0xd0] sm:$0xff]  ;;  %v5522_v40 = vld [vmem:[#allocation7 + $0xf8] sm:$0xff] }
  0xa7   :  { %1546 = vmatprep.subr.bf16.mxu0 %v5381_v29  ;;  %1587 = vmatprep.subr.bf16.mxu1 %v5383_v30  ;;  %7300 = vst [vmem:[#allocation40_spill] sm:$0xff] %v5512_v17  ;;  %7301 = vst [vmem:[#allocation41_spill] sm:$0xff] %v5516_v26 }
  0xa8   :  { %1406 = vmatprep.mubr.bf16.mxu0 %v7022_v61  ;;  %1479 = vmatprep.mubr.bf16.mxu1 %v7022_v61  ;;  %7303 = vst [vmem:[#allocation43_spill] sm:$0xff] %v5522_v40 }
  0xaa   :  { %1547 = vmatpush1.bf16.msra.mxu0 %v5391_v31  ;;  %1588 = vmatpush1.bf16.msra.mxu1 %v5393_v32 }
  0xab   :  { %1548 = vmatprep.subr.bf16.mxu0 %v5397_v33  ;;  %1589 = vmatprep.subr.bf16.mxu1 %v5399_v34 }
  0xad   :  { %4145 = vmatmul.mubr.msk.bf16.gmra.mrb[12].mxu0 %vm1331_vm0, %v4215_v35  ;;  %4149 = vmatmul.mubr.msk.bf16.gmra.mrb[12].mxu1 %vm1331_vm0, %v4215_v35  ;;  %v5519_v35 = vld [vmem:[#allocation7 + $0xe8] sm:$0xff] }
  0xae   :  { %1549 = vmatpush1.bf16.msra.mxu0 %v5408_v36  ;;  %1590 = vmatpush1.bf16.msra.mxu1 %v5410_v37  ;;  %7302 = vst [vmem:[#allocation42_spill] sm:$0xff] %v5519_v35 }
  0xaf   :  { %1550 = vmatprep.subr.bf16.mxu0 %v5412_v38  ;;  %1591 = vmatprep.subr.bf16.mxu1 %v5414_v39 }
  0xb0   :  { %1568 = vmatprep.mubr.bf16.mxu0 %v7022_v61  ;;  %1609 = vmatprep.mubr.bf16.mxu1 %v7022_v61 }
  0xb2   :  { %1551 = vmatpush1.bf16.msra.mxu0 %v5425_v41  ;;  %1592 = vmatpush1.bf16.msra.mxu1 %v5427_v42 }
  0xb3   :  { %1648 = vmatprep.subr.bf16.mxu0 %v5435_v44  ;;  %1689 = vmatprep.subr.bf16.mxu1 %v5438_v45 }
  0xb5   :  { %1569 = vmatmul.mubr.bf16.vlgmr.msra.gmra.mrb[16].mxu0 %v1535_v43  ;;  %1610 = vmatmul.mubr.bf16.vlgmr.msra.gmra.mrb[16].mxu1 %v1535_v43  ;;  %v5524_v43 = vld [vmem:[#allocation7 + $0xe0] sm:$0xff] }
  0xb6   :  { %1680 = vmatprep.mubr.bf16.mxu0 %v7022_v61  ;;  %1721 = vmatprep.mubr.bf16.mxu1 %v7022_v61  ;;  %7304 = vst [vmem:[#allocation44_spill] sm:$0xff] %v5524_v43  ;;  %v5528_v61 = vld [vmem:[#allocation7 + $0xf0] sm:$0xff] }
  0xb7   :  { %1649 = vmatpush1.bf16.msra.mxu0 %v5440_v46  ;;  %1690 = vmatpush1.bf16.msra.mxu1 %v5444_v47  ;;  %7305 = vst [vmem:[#allocation45_spill] sm:$0xff] %v5528_v61 }
  0xb8   :  { %1650 = vmatprep.subr.bf16.mxu0 %v5447_v48  ;;  %1691 = vmatprep.subr.bf16.mxu1 %v5450_v49 }
  0xbb   :  { %1651 = vmatpush1.bf16.msra.mxu0 %v5452_v50  ;;  %1692 = vmatpush1.bf16.msra.mxu1 %v5456_v51 }
  0xbc   :  { %1652 = vmatprep.subr.bf16.mxu0 %v5459_v52  ;;  %1693 = vmatprep.subr.bf16.mxu1 %v5462_v53 }
  0xbf   :  { %1653 = vmatpush1.bf16.msra.mxu0 %v5464_v54  ;;  %1694 = vmatpush1.bf16.msra.mxu1 %v5468_v55 }
  0xc0   :  { %1654 = vmatprep.subr.bf16.mxu0 %v5471_v56  ;;  %1695 = vmatprep.subr.bf16.mxu1 %v5474_v57 }
  0xc3   :  { %1655 = vmatpush1.bf16.msra.mxu0 %v5476_v58  ;;  %1696 = vmatpush1.bf16.msra.mxu1 %v5480_v59 }
  0xc4   :  { %1656 = vmatprep.subr.bf16.mxu0 %v5483_v60  ;;  %1697 = vmatprep.subr.bf16.mxu1 %v5486_v62 }
  0xc7   :  { %1657 = vmatpush1.bf16.msra.mxu0 %v5489_v63  ;;  %1698 = vmatpush1.bf16.msra.mxu1 %v5492_v0 }
  0xc8   :  { %1658 = vmatprep.subr.bf16.mxu0 %v5495_v1  ;;  %1699 = vmatprep.subr.bf16.mxu1 %v5498_v2 }
  0xcb   :  { %1659 = vmatpush1.bf16.msra.mxu0 %v5500_v3  ;;  %1700 = vmatpush1.bf16.msra.mxu1 %v5504_v4  ;;  %v5596_v4 = vld [vmem:[#allocation6 + $0xb8] sm:$0xff] }
  0xcc   :  { %1660 = vmatprep.subr.bf16.mxu0 %v5507_v5  ;;  %1701 = vmatprep.subr.bf16.mxu1 %v5510_v8  ;;  %v5534_v8 = vld [vmem:[#allocation6 + $0x8] sm:$0xff]  ;;  %v5549_v5 = vld [vmem:[#allocation6 + $0x38] sm:$0xff]  ;;  %7328 = vst [vmem:[#allocation67_spill] sm:$0xff] %v5596_v4 }
  0xcd   :  { %7306 = vst [vmem:[#allocation46_spill] sm:$0xff] %v5534_v8  ;;  %7312 = vst [vmem:[#allocation51_spill] sm:$0xff] %v5549_v5 }
  0xcf   :  { %1661 = vmatpush1.bf16.msra.mxu0 %v5512_v17  ;;  %1702 = vmatpush1.bf16.msra.mxu1 %v5516_v26  ;;  %v4150_v17 = vld [vmem:[%s7019_s8 + $0x8] sm:$0xff] }
  0xd0   :  { %1662 = vmatprep.subr.bf16.mxu0 %v5519_v35  ;;  %1703 = vmatprep.subr.bf16.mxu1 %v5522_v40  ;;  %v1647_v26 = vpack.c.bf16 %v4150_v17, %v4150_v17  ;;  %v5536_v35 = vld [vmem:[#allocation6 + $0x18] sm:$0xff]  ;;  %v5540_v40 = vld [vmem:[#allocation6] sm:$0xff]  ;;  %v5547_v17 = vld [vmem:[#allocation6 + $0x28] sm:$0xff] }
  0xd1   :  { %7307 = vst [vmem:[#allocation47_spill] sm:$0xff] %v5536_v35  ;;  %7308 = vst [vmem:[#allocation48_spill] sm:$0xff] %v5540_v40 }
  0xd2   :  { %7311 = vst [vmem:[#allocation50_spill] sm:$0xff] %v5547_v17 }
  0xd3   :  { %1663 = vmatpush1.bf16.msra.mxu0 %v5524_v43  ;;  %1704 = vmatpush1.bf16.msra.mxu1 %v5528_v61  ;;  %v5542_v43 = vld [vmem:[#allocation6 + $0x10] sm:$0xff]  ;;  %v7310_v61 = vmov 0  }
  0xd4   :  { %1730 = vmatprep.subr.bf16.mxu0 %v5534_v8  ;;  %1771 = vmatprep.subr.bf16.mxu1 %v5536_v35  ;;  %7309 = vst [vmem:[#allocation49_spill] sm:$0xff] %v5542_v43  ;;  %v5554_v35 = vld [vmem:[#allocation6 + $0x20] sm:$0xff]  ;;  %v5556_v8 = vld [vmem:[#allocation6 + $0x30] sm:$0xff] }
  0xd5   :  { %7313 = vst [vmem:[#allocation52_spill] sm:$0xff] %v5554_v35  ;;  %7314 = vst [vmem:[#allocation53_spill] sm:$0xff] %v5556_v8 }
  0xd6   :  { %1681 = vmatmul.mubr.bf16.vlgmr.msra.gmra.mrb[20].mxu0 %v1647_v26  ;;  %1722 = vmatmul.mubr.bf16.vlgmr.msra.gmra.mrb[20].mxu1 %v1647_v26  ;;  %v5560_v26 = vld [vmem:[#allocation6 + $0x48] sm:$0xff] }
  0xd7   :  { %1731 = vmatpush1.bf16.msra.mxu0 %v5540_v40  ;;  %1772 = vmatpush1.bf16.msra.mxu1 %v5542_v43  ;;  %7315 = vst [vmem:[#allocation54_spill] sm:$0xff] %v5560_v26  ;;  %v5562_v43 = vld [vmem:[#allocation6 + $0x58] sm:$0xff]  ;;  %v5566_v40 = vld [vmem:[#allocation6 + $0x40] sm:$0xff] }
  0xd8   :  { %1762 = vmatprep.mubr.bf16.mxu0 %v7310_v61  ;;  %1803 = vmatprep.mubr.bf16.mxu1 %v7310_v61  ;;  %7316 = vst [vmem:[#allocation55_spill] sm:$0xff] %v5562_v43  ;;  %7317 = vst [vmem:[#allocation56_spill] sm:$0xff] %v5566_v40 }
  0xd9   :  { %1732 = vmatprep.subr.bf16.mxu0 %v5547_v17  ;;  %1773 = vmatprep.subr.bf16.mxu1 %v5549_v5  ;;  %v5568_v17 = vld [vmem:[#allocation6 + $0x50] sm:$0xff]  ;;  %v5572_v5 = vld [vmem:[#allocation6 + $0x68] sm:$0xff] }
  0xda   :  { %7318 = vst [vmem:[#allocation57_spill] sm:$0xff] %v5568_v17  ;;  %7319 = vst [vmem:[#allocation58_spill] sm:$0xff] %v5572_v5 }
  0xdb   :  { %1733 = vmatpush1.bf16.msra.mxu0 %v5554_v35  ;;  %1774 = vmatpush1.bf16.msra.mxu1 %v5556_v8  ;;  %v5574_v35 = vld [vmem:[#allocation6 + $0x78] sm:$0xff]  ;;  %v5578_v8 = vld [vmem:[#allocation6 + $0x60] sm:$0xff] }
  0xdc   :  { %1734 = vmatprep.subr.bf16.mxu0 %v5560_v26  ;;  %1775 = vmatprep.subr.bf16.mxu1 %v5562_v43  ;;  %7320 = vst [vmem:[#allocation59_spill] sm:$0xff] %v5574_v35  ;;  %7321 = vst [vmem:[#allocation60_spill] sm:$0xff] %v5578_v8  ;;  %v5580_v26 = vld [vmem:[#allocation6 + $0x70] sm:$0xff]  ;;  %v5584_v43 = vld [vmem:[#allocation6 + $0x88] sm:$0xff] }
  0xdd   :  { %7322 = vst [vmem:[#allocation61_spill] sm:$0xff] %v5580_v26  ;;  %7323 = vst [vmem:[#allocation62_spill] sm:$0xff] %v5584_v43 }
  0xdf   :  { %1735 = vmatpush1.bf16.msra.mxu0 %v5566_v40  ;;  %1776 = vmatpush1.bf16.msra.mxu1 %v5568_v17  ;;  %v5586_v40 = vld [vmem:[#allocation6 + $0x98] sm:$0xff]  ;;  %v5588_v17 = vld [vmem:[#allocation6 + $0x80] sm:$0xff] }
  0xe0   :  { %1736 = vmatprep.subr.bf16.mxu0 %v5572_v5  ;;  %1777 = vmatprep.subr.bf16.mxu1 %v5574_v35  ;;  %7324 = vst [vmem:[#allocation63_spill] sm:$0xff] %v5586_v40  ;;  %7325 = vst [vmem:[#allocation64_spill] sm:$0xff] %v5588_v17  ;;  %v5592_v5 = vld [vmem:[#allocation6 + $0x90] sm:$0xff]  ;;  %v5594_v35 = vld [vmem:[#allocation6 + $0xa8] sm:$0xff] }
  0xe1   :  { %7326 = vst [vmem:[#allocation65_spill] sm:$0xff] %v5592_v5  ;;  %7327 = vst [vmem:[#allocation66_spill] sm:$0xff] %v5594_v35 }
  0xe3   :  { %1737 = vmatpush1.bf16.msra.mxu0 %v5578_v8  ;;  %1778 = vmatpush1.bf16.msra.mxu1 %v5580_v26  ;;  %v5601_v26 = vld [vmem:[#allocation6 + $0xa0] sm:$0xff]  ;;  %v5604_v8 = vld [vmem:[#allocation6 + $0xb0] sm:$0xff] }
  0xe4   :  { %1738 = vmatprep.subr.bf16.mxu0 %v5584_v43  ;;  %1779 = vmatprep.subr.bf16.mxu1 %v5586_v40  ;;  %7329 = vst [vmem:[#allocation68_spill] sm:$0xff] %v5601_v26  ;;  %7330 = vst [vmem:[#allocation69_spill] sm:$0xff] %v5604_v8  ;;  %v5606_v43 = vld [vmem:[#allocation6 + $0xc8] sm:$0xff]  ;;  %v5608_v40 = vld [vmem:[#allocation6 + $0xd8] sm:$0xff] }
  0xe5   :  { %7331 = vst [vmem:[#allocation70_spill] sm:$0xff] %v5606_v43  ;;  %7332 = vst [vmem:[#allocation71_spill] sm:$0xff] %v5608_v40 }
  0xe7   :  { %1739 = vmatpush1.bf16.msra.mxu0 %v5588_v17  ;;  %1780 = vmatpush1.bf16.msra.mxu1 %v5592_v5  ;;  %v5613_v17 = vld [vmem:[#allocation6 + $0xc0] sm:$0xff]  ;;  %v5618_v5 = vld [vmem:[#allocation6 + $0xe8] sm:$0xff] }
  0xe8   :  { %1740 = vmatprep.subr.bf16.mxu0 %v5594_v35  ;;  %1781 = vmatprep.subr.bf16.mxu1 %v5596_v4  ;;  %7333 = vst [vmem:[#allocation72_spill] sm:$0xff] %v5613_v17  ;;  %v5616_v35 = vld [vmem:[#allocation6 + $0xd0] sm:$0xff]  ;;  %7335 = vst [vmem:[#allocation74_spill] sm:$0xff] %v5618_v5  ;;  %v5620_v4 = vld [vmem:[#allocation6 + $0xf8] sm:$0xff] }
  0xe9   :  { %7334 = vst [vmem:[#allocation73_spill] sm:$0xff] %v5616_v35  ;;  %7336 = vst [vmem:[#allocation75_spill] sm:$0xff] %v5620_v4 }
  0xeb   :  { %1741 = vmatpush1.bf16.msra.mxu0 %v5601_v26  ;;  %1782 = vmatpush1.bf16.msra.mxu1 %v5604_v8  ;;  %v5625_v26 = vld [vmem:[#allocation6 + $0xe0] sm:$0xff] }
  0xec   :  { %1742 = vmatprep.subr.bf16.mxu0 %v5606_v43  ;;  %1783 = vmatprep.subr.bf16.mxu1 %v5608_v40  ;;  %7337 = vst [vmem:[#allocation76_spill] sm:$0xff] %v5625_v26  ;;  %v5628_v43 = vld [vmem:[#allocation6 + $0xf0] sm:$0xff]  ;;  %v1262_v40 = vlaneseq }
  0xed   :  { %7338 = vst [vmem:[#allocation77_spill] sm:$0xff] %v5628_v43 }
  0xef   :  { %1743 = vmatpush1.bf16.msra.mxu0 %v5613_v17  ;;  %1784 = vmatpush1.bf16.msra.mxu1 %v5616_v35  ;;  %v5634_v17 = vshrl.u32 %v1262_v40, 7 }
  0xf0   :  { %1744 = vmatprep.subr.bf16.mxu0 %v5618_v5  ;;  %1785 = vmatprep.subr.bf16.mxu1 %v5620_v4  ;;  %v1195_v4 = vld [vmem:[#allocation5] sm:$0xf] }
  0xf1   :  { %7339 = vst [vmem:[#allocation78_spill] sm:$0xff] %v5634_v17  ;;  %v7088_v35 = vsub.s32 2, %v5634_v17  ;;  %v7097_v5 = vsub.s32 3, %v5634_v17  ;;  %v7098_v8 = vsub.s32 0, %v5634_v17  ;;  %v7105_v3 = vsub.s32 1, %v5634_v17 }
  0xf3   :  { %1745 = vmatpush1.bf16.msra.mxu0 %v5625_v26  ;;  %1786 = vmatpush1.bf16.msra.mxu1 %v5628_v43  ;;  %v5642_v26 = vrot.slane %v1195_v4, %v7088_v35  ;;  %v1294_v40 = vrot.slane %v1195_v4, %v7098_v8  ;;  %v1298_v0 = vrot.slane %v1195_v4, %v7105_v3 }
  0xf4   :  { %1849 = vmatprep.subr.bf16.mxu0 %v5306_v6  ;;  %1890 = vmatprep.subr.bf16.mxu1 %v5308_v7  ;;  %v5650_v7 = vrot.slane %v1195_v4, %v7097_v5 }
 0x168   :  { %v5644_v43 = vpop.f32.mrb[0].mxu0  ;;  %v5646_v6 = vpop.f32.mrb[0].mxu1 }
 0x169   :  { %v1380_v2 = vpop.f32.mrb[1].mxu0  ;;  %v1453_v1 = vpop.f32.mrb[1].mxu1 }
 0x16a   :  { %v1382_v63 = vpop.f32.mrb[2].mxu0  ;;  %v1455_v62 = vpop.f32.mrb[2].mxu1 }
 0x16b   :  { %v5656_v35 = vadd.f32 %v1382_v63, %v1294_v40  ;;  %v1384_v60 = vpop.f32.mrb[3].mxu0  ;;  %v5659_v59 = vadd.f32 %v1455_v62, %v5642_v26  ;;  %v1457_v58 = vpop.f32.mrb[3].mxu1 }
 0x16c   :  { %v5661_v57 = vadd.f32 %v1384_v60, %v1298_v0  ;;  %v5664_v5 = vadd.f32 %v1457_v58, %v5650_v7 }
 0x16d   :  { %7340 = vst [vmem:[#allocation79_spill] sm:$0xff] %v5656_v35  ;;  %7341 = vst [vmem:[#allocation80_spill] sm:$0xff] %v5659_v59 }
 0x16e   :  { %7342 = vst [vmem:[#allocation81_spill] sm:$0xff] %v5661_v57  ;;  %7343 = vst [vmem:[#allocation82_spill] sm:$0xff] %v5664_v5 }
 0x170   :  { %v1388_v8 = vpop.f32.mrb[4].mxu0  ;;  %v1461_v56 = vpop.f32.mrb[4].mxu1 }
 0x171   :  { %v5666_v55 = vadd.f32 %v1388_v8, %v1294_v40  ;;  %v1390_v17 = vpop.f32.mrb[5].mxu0  ;;  %v5669_v4 = vadd.f32 %v1461_v56, %v5642_v26  ;;  %v1463_v63 = vpop.f32.mrb[5].mxu1 }
 0x172   :  { %v5671_v3 = vadd.f32 %v1390_v17, %v1298_v0  ;;  %v1392_v35 = vpop.f32.mrb[6].mxu0  ;;  %v5674_v62 = vadd.f32 %v1463_v63, %v5650_v7  ;;  %v1465_v60 = vpop.f32.mrb[6].mxu1 }
 0x173   :  { %7344 = vst [vmem:[#allocation83_spill] sm:$0xff] %v5666_v55  ;;  %7345 = vst [vmem:[#allocation84_spill] sm:$0xff] %v5669_v4  ;;  %v5676_v57 = vadd.f32 %v1392_v35, %v1294_v40  ;;  %v1394_v58 = vpop.f32.mrb[7].mxu0  ;;  %v5679_v5 = vadd.f32 %v1465_v60, %v5642_v26  ;;  %v1467_v8 = vpop.f32.mrb[7].mxu1 }
 0x174   :  { %7346 = vst [vmem:[#allocation85_spill] sm:$0xff] %v5671_v3  ;;  %7347 = vst [vmem:[#allocation86_spill] sm:$0xff] %v5674_v62  ;;  %v5681_v55 = vadd.f32 %v1394_v58, %v1298_v0  ;;  %v5684_v56 = vadd.f32 %v1467_v8, %v5650_v7 }
 0x175   :  { %7348 = vst [vmem:[#allocation87_spill] sm:$0xff] %v5676_v57  ;;  %7349 = vst [vmem:[#allocation88_spill] sm:$0xff] %v5679_v5 }
 0x176   :  { %7350 = vst [vmem:[#allocation89_spill] sm:$0xff] %v5681_v55  ;;  %7351 = vst [vmem:[#allocation90_spill] sm:$0xff] %v5684_v56 }
 0x178   :  { %v1398_v4 = vpop.f32.mrb[8].mxu0  ;;  %v1471_v17 = vpop.f32.mrb[8].mxu1 }
 0x179   :  { %v5686_v3 = vadd.f32 %v1398_v4, %v1294_v40  ;;  %v1400_v59 = vpop.f32.mrb[9].mxu0  ;;  %v5689_v63 = vadd.f32 %v1471_v17, %v5642_v26  ;;  %v1473_v35 = vpop.f32.mrb[9].mxu1 }
 0x17a   :  { %v5691_v57 = vadd.f32 %v1400_v59, %v1298_v0  ;;  %v1402_v62 = vpop.f32.mrb[10].mxu0  ;;  %v5694_v60 = vadd.f32 %v1473_v35, %v5650_v7  ;;  %v1475_v58 = vpop.f32.mrb[10].mxu1 }
 0x17b   :  { %7352 = vst [vmem:[#allocation91_spill] sm:$0xff] %v5686_v3  ;;  %7353 = vst [vmem:[#allocation92_spill] sm:$0xff] %v5689_v63  ;;  %v5696_v55 = vadd.f32 %v1402_v62, %v1294_v40  ;;  %v1404_v8 = vpop.f32.mrb[11].mxu0  ;;  %v5699_v56 = vadd.f32 %v1475_v58, %v5642_v26  ;;  %v1477_v4 = vpop.f32.mrb[11].mxu1 }
 0x17c   :  { %7354 = vst [vmem:[#allocation93_spill] sm:$0xff] %v5691_v57  ;;  %7355 = vst [vmem:[#allocation94_spill] sm:$0xff] %v5694_v60  ;;  %v5701_v3 = vadd.f32 %v1404_v8, %v1298_v0  ;;  %v5704_v17 = vadd.f32 %v1477_v4, %v5650_v7 }
 0x17d   :  { %7356 = vst [vmem:[#allocation95_spill] sm:$0xff] %v5696_v55  ;;  %7357 = vst [vmem:[#allocation96_spill] sm:$0xff] %v5699_v56 }
 0x17e   :  { %7358 = vst [vmem:[#allocation97_spill] sm:$0xff] %v5701_v3  ;;  %7359 = vst [vmem:[#allocation98_spill] sm:$0xff] %v5704_v17 }
 0x180   :  { %v1408_v63 = vpop.f32.mrb[12].mxu0  ;;  %v1481_v59 = vpop.f32.mrb[12].mxu1 }
 0x181   :  { %v5706_v57 = vadd.f32 %v1408_v63, %v1294_v40  ;;  %v1410_v5 = vpop.f32.mrb[13].mxu0  ;;  %v5709_v35 = vadd.f32 %v1481_v59, %v5642_v26  ;;  %v1483_v62 = vpop.f32.mrb[13].mxu1 }
 0x182   :  { %v5711_v55 = vadd.f32 %v1410_v5, %v1298_v0  ;;  %v1412_v60 = vpop.f32.mrb[14].mxu0  ;;  %v5714_v58 = vadd.f32 %v1483_v62, %v5650_v7  ;;  %v1485_v8 = vpop.f32.mrb[14].mxu1  ;;  %v1379_v5 = vadd.f32 %v5644_v43, %v1294_v40  ;;  %v1381_v62 = vadd.f32 %v1380_v2, %v1298_v0 }
 0x183   :  { %7360 = vst [vmem:[#allocation99_spill] sm:$0xff] %v5706_v57  ;;  %7361 = vst [vmem:[#allocation100_spill] sm:$0xff] %v5709_v35  ;;  %v5716_v3 = vadd.f32 %v1412_v60, %v1294_v40  ;;  %v1414_v4 = vpop.f32.mrb[15].mxu0  ;;  %v5719_v17 = vadd.f32 %v1485_v8, %v5642_v26  ;;  %v1487_v63 = vpop.f32.mrb[15].mxu1 }
 0x184   :  { %7362 = vst [vmem:[#allocation101_spill] sm:$0xff] %v5711_v55  ;;  %7363 = vst [vmem:[#allocation102_spill] sm:$0xff] %v5714_v58  ;;  %v5721_v57 = vadd.f32 %v1414_v4, %v1298_v0  ;;  %v5724_v59 = vadd.f32 %v1487_v63, %v5650_v7  ;;  %v1452_v55 = vadd.f32 %v5646_v6, %v5642_v26 }
 0x185   :  { %7364 = vst [vmem:[#allocation103_spill] sm:$0xff] %v5716_v3  ;;  %7365 = vst [vmem:[#allocation104_spill] sm:$0xff] %v5719_v17  ;;  %v1454_v58 = vadd.f32 %v1453_v1, %v5650_v7 }
 0x186   :  { %7366 = vst [vmem:[#allocation105_spill] sm:$0xff] %v5721_v57  ;;  %7367 = vst [vmem:[#allocation106_spill] sm:$0xff] %v5724_v59 }
 0x188   :  { %v1570_v60 = vpop.f32.mrb[16].mxu0  ;;  %v1611_v3 = vpop.f32.mrb[16].mxu1 }
 0x189   :  { %v1618_v35 = vadd.f32 %v1570_v60, %v1379_v5  ;;  %v1620_v56 = vadd.f32 %v1611_v3, %v1452_v55  ;;  %v1572_v8 = vpop.f32.mrb[17].mxu0  ;;  %v1613_v17 = vpop.f32.mrb[17].mxu1  ;;  %v7385_v60 = vld [vmem:[#allocation39_spill] sm:$0xff] }
 0x18a   :  { %v1619_v54 = vadd.f32 %v1572_v8, %v1381_v62  ;;  %v1621_v4 = vadd.f32 %v1613_v17, %v1454_v58  ;;  %v1574_v57 = vpop.f32.mrb[18].mxu0  ;;  %v1615_v53 = vpop.f32.mrb[18].mxu1  ;;  %v7384_v62 = vld [vmem:[#allocation38_spill] sm:$0xff] }
 0x18b   :  { %v4152_v63 = vmul.f32 -1.442695, %v1618_v35  ;;  %v1575_v59 = vpop.f32.mrb[19].mxu0  ;;  %v1616_v52 = vpop.f32.mrb[19].mxu1  ;;  %v1525_v53 = vld [vmem:[%s7020_s9] sm:$0xff] }
 0x18c   :  { %v4153_v43 = vmul.f32 -1.442695, %v1619_v54  ;;  %v4154_v26 = vmul.f32 -1.442695, %v1621_v4  ;;  %v7386_v4 = vld [vmem:[#allocation40_spill] sm:$0xff] }
 0x18d   :  { %4216 = vpow2.f32 %v4152_v63  ;;  %v7387_v63 = vld [vmem:[#allocation41_spill] sm:$0xff] }
 0x18e   :  { %4218 = vpow2.f32 %v4153_v43  ;;  %v7388_v43 = vld [vmem:[#allocation42_spill] sm:$0xff] }
 0x18f   :  { %4220 = vpow2.f32 %v4154_v26  ;;  %v7389_v26 = vld [vmem:[#allocation43_spill] sm:$0xff] }
 0x190   :  { %4222 = vtanh.f32 %v1620_v56 }
 0x197   :  { %v4217_v0 = vpop.eup %4216 }
 0x198   :  { %v4219_v2 = vpop.eup %4218  ;;  %v1625_v1 = vadd.f32 1.0, %v4217_v0  ;;  %v7390_v0 = vld [vmem:[#allocation44_spill] sm:$0xff] }
 0x199   :  { %v1631_v6 = vadd.f32 1.0, %v4219_v2  ;;  %v4221_v55 = vpop.eup %4220  ;;  %v7391_v2 = vld [vmem:[#allocation45_spill] sm:$0xff] }
 0x19a   :  { %4224 = vrcp.f32 %v1625_v1  ;;  %v4223_v3 = vpop.eup %4222  ;;  %v1638_v7 = vadd.f32 1.0, %v4221_v55  ;;  %v7392_v1 = vld [vmem:[#allocation46_spill] sm:$0xff]  ;;  %v1260_v55 = vld [vmem:[#allocation8] sm:$0xf] }
 0x19b   :  { %4226 = vrcp.f32 %v1631_v6  ;;  %v7393_v6 = vld [vmem:[#allocation47_spill] sm:$0xff] }
 0x19c   :  { %4228 = vrcp.f32 %v1638_v7 }
 0x1a4   :  { %v4225_v57 = vpop.eup %4224 }
 0x1a5   :  { %v4227_v52 = vpop.eup %4226  ;;  %v1642_v54 = vmul.f32 %v4225_v57, %v4223_v3  ;;  %v7394_v3 = vld [vmem:[#allocation78_spill] sm:$0xff] }
 0x1a6   :  { %v1641_v40 = vmul.f32 %v4227_v52, %v1525_v53  ;;  %v4229_v56 = vpop.eup %4228  ;;  %v7395_v53 = vsub.s32 0, %v7394_v3  ;;  %v7396_v7 = vsub.s32 1, %v7394_v3 }
 0x1a8   :  { %v5733_v17 = vadd.f32 %v1642_v54, %v1641_v40  ;;  %v5806_v57 = vrot.slane %v1260_v55, %v7395_v53  ;;  %v5810_v40 = vrot.slane %v1260_v55, %v7396_v7 }
 0x1aa   :  { %4230 = vtanh.f32 %v5733_v17 }
 0x1b4   :  { %v4231_v35 = vpop.eup %4230 }
 0x1b5   :  { %v1645_v58 = vmul.f32 %v4231_v35, %v4229_v56 }
 0x1b7   :  { %v1646_v59 = vpack.c.bf16 %v1645_v58, %v1645_v58 }
 0x1b9   :  { %1763 = vmatmul.mubr.bf16.vlgmr.msra.gmra.mrb[24].mxu0 %v1646_v59  ;;  %1804 = vmatmul.mubr.bf16.vlgmr.msra.gmra.mrb[24].mxu1 %v1646_v59 }
 0x1ba   :  { %1850 = vmatpush1.bf16.msra.mxu0 %v5315_v9  ;;  %1891 = vmatpush1.bf16.msra.mxu1 %v5317_v10  ;;  %v7368_v9 = vld [vmem:[#allocation22_spill] sm:$0xff]  ;;  %v7369_v10 = vld [vmem:[#allocation23_spill] sm:$0xff] }
 0x1bb   :  { %1851 = vmatprep.subr.bf16.mxu0 %v5319_v11  ;;  %1892 = vmatprep.subr.bf16.mxu1 %v5321_v12  ;;  %v7370_v11 = vld [vmem:[#allocation24_spill] sm:$0xff]  ;;  %v7371_v12 = vld [vmem:[#allocation25_spill] sm:$0xff] }
 0x1bc   :  { %1881 = vmatprep.mubr.bf16.mxu0 %v7310_v61  ;;  %1922 = vmatprep.mubr.bf16.mxu1 %v7310_v61 }
 0x1be   :  { %1852 = vmatpush1.bf16.msra.mxu0 %v5329_v13  ;;  %1893 = vmatpush1.bf16.msra.mxu1 %v5331_v14  ;;  %v7372_v13 = vld [vmem:[#allocation26_spill] sm:$0xff]  ;;  %v7373_v14 = vld [vmem:[#allocation27_spill] sm:$0xff] }
 0x1bf   :  { %1853 = vmatprep.subr.bf16.mxu0 %v5335_v15  ;;  %1894 = vmatprep.subr.bf16.mxu1 %v5337_v16  ;;  %v7374_v15 = vld [vmem:[#allocation28_spill] sm:$0xff]  ;;  %v7375_v16 = vld [vmem:[#allocation29_spill] sm:$0xff] }
 0x1c2   :  { %1854 = vmatpush1.bf16.msra.mxu0 %v5346_v18  ;;  %1895 = vmatpush1.bf16.msra.mxu1 %v5348_v19  ;;  %v7376_v18 = vld [vmem:[#allocation30_spill] sm:$0xff]  ;;  %v7377_v19 = vld [vmem:[#allocation31_spill] sm:$0xff] }
 0x1c3   :  { %1855 = vmatprep.subr.bf16.mxu0 %v5350_v20  ;;  %1896 = vmatprep.subr.bf16.mxu1 %v5352_v21  ;;  %v7378_v20 = vld [vmem:[#allocation32_spill] sm:$0xff]  ;;  %v7379_v21 = vld [vmem:[#allocation33_spill] sm:$0xff] }
 0x1c6   :  { %1856 = vmatpush1.bf16.msra.mxu0 %v5360_v22  ;;  %1897 = vmatpush1.bf16.msra.mxu1 %v5362_v23  ;;  %v1682_v22 = vpop.f32.mrb[20].mxu0  ;;  %v7380_v23 = vld [vmem:[#allocation34_spill] sm:$0xff] }
 0x1c7   :  { %1857 = vmatprep.subr.bf16.mxu0 %v5366_v24  ;;  %1898 = vmatprep.subr.bf16.mxu1 %v5368_v25  ;;  %v7381_v24 = vld [vmem:[#allocation35_spill] sm:$0xff]  ;;  %v1684_v25 = vpop.f32.mrb[21].mxu0 }
 0x1ca   :  { %1858 = vmatpush1.bf16.msra.mxu0 %v5377_v27  ;;  %1899 = vmatpush1.bf16.msra.mxu1 %v5379_v28  ;;  %v1686_v27 = vpop.f32.mrb[22].mxu0  ;;  %v1723_v28 = vpop.f32.mrb[20].mxu1 }
 0x1cb   :  { %1859 = vmatprep.subr.bf16.mxu0 %v5381_v29  ;;  %1900 = vmatprep.subr.bf16.mxu1 %v5383_v30  ;;  %v1687_v29 = vpop.f32.mrb[23].mxu0  ;;  %v1725_v30 = vpop.f32.mrb[21].mxu1 }
 0x1cc   :  { %v1727_v5 = vpop.f32.mrb[22].mxu1 }
 0x1cd   :  { %v1728_v8 = vpop.f32.mrb[23].mxu1 }
 0x1ce   :  { %1860 = vmatpush1.bf16.msra.mxu0 %v5391_v31  ;;  %1901 = vmatpush1.bf16.msra.mxu1 %v5393_v32  ;;  %v7382_v31 = vld [vmem:[#allocation36_spill] sm:$0xff]  ;;  %v7383_v32 = vld [vmem:[#allocation37_spill] sm:$0xff] }
 0x1cf   :  { %1861 = vmatprep.subr.bf16.mxu0 %v5397_v33  ;;  %1902 = vmatprep.subr.bf16.mxu1 %v5399_v34 }
 0x1d2   :  { %1862 = vmatpush1.bf16.msra.mxu0 %v5408_v36  ;;  %1903 = vmatpush1.bf16.msra.mxu1 %v5410_v37 }
 0x1d3   :  { %1863 = vmatprep.subr.bf16.mxu0 %v5412_v38  ;;  %1904 = vmatprep.subr.bf16.mxu1 %v5414_v39 }
 0x1d6   :  { %1864 = vmatpush1.bf16.msra.mxu0 %v5425_v41  ;;  %1905 = vmatpush1.bf16.msra.mxu1 %v5427_v42 }
 0x1d7   :  { %1960 = vmatprep.subr.bf16.mxu0 %v5435_v44  ;;  %2001 = vmatprep.subr.bf16.mxu1 %v5438_v45 }
 0x1d9   :  { %1882 = vmatmul.mubr.bf16.vlgmr.msra.gmra.mrb[28].mxu0 %v1646_v59  ;;  %1923 = vmatmul.mubr.bf16.vlgmr.msra.gmra.mrb[28].mxu1 %v1646_v59 }
 0x1da   :  { %1961 = vmatpush1.bf16.msra.mxu0 %v5440_v46  ;;  %2002 = vmatpush1.bf16.msra.mxu1 %v5444_v47 }
 0x1db   :  { %1962 = vmatprep.subr.bf16.mxu0 %v5447_v48  ;;  %2003 = vmatprep.subr.bf16.mxu1 %v5450_v49 }
 0x1dc   :  { %1992 = vmatprep.mubr.bf16.mxu0 %v7310_v61  ;;  %2033 = vmatprep.mubr.bf16.mxu1 %v7310_v61 }
 0x1de   :  { %1963 = vmatpush1.bf16.msra.mxu0 %v5452_v50  ;;  %2004 = vmatpush1.bf16.msra.mxu1 %v5456_v51 }
 0x1df   :  { %1964 = vmatprep.subr.bf16.mxu0 %v7368_v9  ;;  %2005 = vmatprep.subr.bf16.mxu1 %v7369_v10 }
 0x1e2   :  { %1965 = vmatpush1.bf16.msra.mxu0 %v7370_v11  ;;  %2006 = vmatpush1.bf16.msra.mxu1 %v7371_v12 }
 0x1e3   :  { %1966 = vmatprep.subr.bf16.mxu0 %v7372_v13  ;;  %2007 = vmatprep.subr.bf16.mxu1 %v7373_v14 }
 0x1e6   :  { %1967 = vmatpush1.bf16.msra.mxu0 %v7374_v15  ;;  %2008 = vmatpush1.bf16.msra.mxu1 %v7375_v16 }
 0x1e7   :  { %1968 = vmatprep.subr.bf16.mxu0 %v7376_v18  ;;  %2009 = vmatprep.subr.bf16.mxu1 %v7377_v19 }
 0x1ea   :  { %1969 = vmatpush1.bf16.msra.mxu0 %v7378_v20  ;;  %2010 = vmatpush1.bf16.msra.mxu1 %v7379_v21 }
 0x1eb   :  { %1970 = vmatprep.subr.bf16.mxu0 %v7380_v23  ;;  %2011 = vmatprep.subr.bf16.mxu1 %v7381_v24 }
 0x1ee   :  { %1971 = vmatpush1.bf16.msra.mxu0 %v7382_v31  ;;  %2012 = vmatpush1.bf16.msra.mxu1 %v7383_v32 }
 0x1ef   :  { %1972 = vmatprep.subr.bf16.mxu0 %v7384_v62  ;;  %2013 = vmatprep.subr.bf16.mxu1 %v7385_v60 }
 0x1f2   :  { %1973 = vmatpush1.bf16.msra.mxu0 %v7386_v4  ;;  %2014 = vmatpush1.bf16.msra.mxu1 %v7387_v63 }
 0x1f3   :  { %1974 = vmatprep.subr.bf16.mxu0 %v7388_v43  ;;  %2015 = vmatprep.subr.bf16.mxu1 %v7389_v26  ;;  %v7397_v43 = vsub.s32 3, %v7394_v3 }
 0x1f5   :  { %v5816_v7 = vrot.slane %v1260_v55, %v7397_v43 }
 0x1f6   :  { %1975 = vmatpush1.bf16.msra.mxu0 %v7390_v0  ;;  %2016 = vmatpush1.bf16.msra.mxu1 %v7391_v2 }
 0x1f7   :  { %2042 = vmatprep.subr.bf16.mxu0 %v7392_v1  ;;  %2083 = vmatprep.subr.bf16.mxu1 %v7393_v6 }
 0x28c   :  { %v1764_v52 = vpop.f32.mrb[24].mxu0  ;;  %v1805_v54 = vpop.f32.mrb[24].mxu1 }
 0x28d   :  { %v1765_v56 = vadd.f32 %v1764_v52, %v1682_v22  ;;  %v1806_v35 = vadd.f32 %v1805_v54, %v1723_v28  ;;  %v1766_v58 = vpop.f32.mrb[25].mxu0  ;;  %v1807_v59 = vpop.f32.mrb[25].mxu1 }
 0x28e   :  { %v1767_v27 = vadd.f32 %v1766_v58, %v1684_v25  ;;  %v1808_v29 = vadd.f32 %v1807_v59, %v1725_v30  ;;  %v1768_v5 = vpop.f32.mrb[26].mxu0  ;;  %v1809_v8 = vpop.f32.mrb[26].mxu1  ;;  %v7398_v25 = vsub.s32 2, %v7394_v3 }
 0x28f   :  { %v1812_v6 = vadd.f32 %v1765_v56, %v5806_v57  ;;  %v1769_v1 = vpop.f32.mrb[27].mxu0  ;;  %v1810_v2 = vpop.f32.mrb[27].mxu1  ;;  %v7401_v8 = vld [vmem:[#allocation80_spill] sm:$0xff] }
 0x290   :  { %v1813_v53 = vadd.f32 %v1767_v27, %v5810_v40  ;;  %v1815_v22 = vadd.f32 %v1808_v29, %v5816_v7  ;;  %v5821_v28 = vrot.slane %v1260_v55, %v7398_v25  ;;  %v7400_v29 = vld [vmem:[#allocation79_spill] sm:$0xff] }
 0x291   :  { %v4155_v0 = vmul.f32 -1.442695, %v1812_v6 }
 0x292   :  { %v4156_v26 = vmul.f32 -1.442695, %v1813_v53  ;;  %7399 = vst [vmem:[#allocation22_spill] sm:$0xff] %v5821_v28  ;;  %v4157_v30 = vmul.f32 -1.442695, %v1815_v22  ;;  %v1814_v1 = vadd.f32 %v1806_v35, %v5821_v28 }
 0x293   :  { %4232 = vpow2.f32 %v4155_v0 }
 0x294   :  { %4234 = vpow2.f32 %v4156_v26  ;;  %v4151_v26 = vld [vmem:[%s7020_s9 + $0x8] sm:$0xff] }
 0x295   :  { %4236 = vpow2.f32 %v4157_v30 }
 0x296   :  { %4238 = vtanh.f32 %v1814_v1  ;;  %v7402_v1 = vld [vmem:[#allocation81_spill] sm:$0xff] }
 0x29d   :  { %v4233_v2 = vpop.eup %4232 }
 0x29e   :  { %v4235_v52 = vpop.eup %4234  ;;  %v1819_v54 = vadd.f32 1.0, %v4233_v2 }
 0x29f   :  { %v1825_v6 = vadd.f32 1.0, %v4235_v52  ;;  %v4237_v43 = vpop.eup %4236  ;;  %v7403_v52 = vld [vmem:[#allocation82_spill] sm:$0xff] }
 0x2a0   :  { %4240 = vrcp.f32 %v1819_v54  ;;  %v4239_v0 = vpop.eup %4238  ;;  %v1832_v58 = vadd.f32 1.0, %v4237_v43 }
 0x2a1   :  { %4242 = vrcp.f32 %v1825_v6 }
 0x2a2   :  { %4244 = vrcp.f32 %v1832_v58  ;;  %v7404_v58 = vld [vmem:[#allocation48_spill] sm:$0xff] }
 0x2aa   :  { %v4241_v3 = vpop.eup %4240 }
 0x2ab   :  { %v4243_v55 = vpop.eup %4242  ;;  %v1836_v56 = vmul.f32 %v4241_v3, %v4239_v0 }
 0x2ac   :  { %v1835_v59 = vmul.f32 %v4243_v55, %v4151_v26  ;;  %v1883_v35 = vpop.f32.mrb[28].mxu0  ;;  %v1924_v27 = vpop.f32.mrb[28].mxu1 }
 0x2ad   :  { %v1931_v5 = vadd.f32 %v1883_v35, %v7400_v29  ;;  %v1933_v53 = vadd.f32 %v1924_v27, %v7401_v8  ;;  %v1885_v22 = vpop.f32.mrb[29].mxu0  ;;  %v1926_v25 = vpop.f32.mrb[29].mxu1 }
 0x2ae   :  { %v5829_v30 = vadd.f32 %v1836_v56, %v1835_v59  ;;  %v1932_v2 = vadd.f32 %v1885_v22, %v7402_v1  ;;  %v1934_v54 = vadd.f32 %v1926_v25, %v7403_v52  ;;  %v1887_v6 = vpop.f32.mrb[30].mxu0  ;;  %v1928_v28 = vpop.f32.mrb[30].mxu1  ;;  %v7406_v25 = vld [vmem:[#allocation50_spill] sm:$0xff]  ;;  %v7407_v1 = vld [vmem:[#allocation51_spill] sm:$0xff] }
 0x2af   :  { %v4158_v0 = vmul.f32 -1.442695, %v1931_v5  ;;  %v1888_v43 = vpop.f32.mrb[31].mxu0  ;;  %v1929_v26 = vpop.f32.mrb[31].mxu1  ;;  %v7405_v5 = vld [vmem:[#allocation49_spill] sm:$0xff]  ;;  %v7410_v52 = vld [vmem:[#allocation54_spill] sm:$0xff] }
 0x2b0   :  { %v4159_v3 = vmul.f32 -1.442695, %v1932_v2  ;;  %4246 = vtanh.f32 %v5829_v30  ;;  %v4160_v55 = vmul.f32 -1.442695, %v1934_v54  ;;  %v4245_v35 = vpop.eup %4244  ;;  %v7409_v2 = vld [vmem:[#allocation53_spill] sm:$0xff]  ;;  %v7411_v54 = vld [vmem:[#allocation55_spill] sm:$0xff] }
 0x2b1   :  { %4248 = vpow2.f32 %v4158_v0  ;;  %v7412_v26 = vld [vmem:[#allocation56_spill] sm:$0xff] }
 0x2b2   :  { %4250 = vpow2.f32 %v4159_v3  ;;  %v7413_v3 = vld [vmem:[#allocation57_spill] sm:$0xff] }
 0x2b3   :  { %4252 = vpow2.f32 %v4160_v55 }
 0x2b4   :  { %4254 = vtanh.f32 %v1933_v53  ;;  %v7408_v53 = vld [vmem:[#allocation52_spill] sm:$0xff] }
 0x2ba   :  { %v4247_v27 = vpop.eup %4246 }
 0x2bb   :  { %v4249_v56 = vpop.eup %4248  ;;  %v1839_v59 = vmul.f32 %v4247_v27, %v4245_v35 }
 0x2bc   :  { %v4251_v29 = vpop.eup %4250  ;;  %v1938_v8 = vadd.f32 1.0, %v4249_v56  ;;  %v7414_v56 = vld [vmem:[#allocation58_spill] sm:$0xff] }
 0x2bd   :  { %v1944_v22 = vadd.f32 1.0, %v4251_v29  ;;  %v1840_v28 = vpack.c.bf16 %v1839_v59, %v1839_v59  ;;  %v4253_v6 = vpop.eup %4252  ;;  %v7415_v59 = vld [vmem:[#allocation59_spill] sm:$0xff] }
 0x2be   :  { %4256 = vrcp.f32 %v1938_v8  ;;  %v4255_v0 = vpop.eup %4254  ;;  %v1951_v27 = vadd.f32 1.0, %v4253_v6  ;;  %v7427_v6 = vld [vmem:[#allocation71_spill] sm:$0xff] }
 0x2bf   :  { %4258 = vrcp.f32 %v1944_v22  ;;  %1841 = vst [vmem:[%s7018_s7] sm:$0xf] %v1840_v28  ;;  %1993 = vmatmul.mubr.bf16.vlgmr.msra.gmra.mrb[32].mxu0 %v1840_v28  ;;  %2034 = vmatmul.mubr.bf16.vlgmr.msra.gmra.mrb[32].mxu1 %v1840_v28  ;;  %v7416_v22 = vld [vmem:[#allocation60_spill] sm:$0xff]  ;;  %v7417_v28 = vld [vmem:[#allocation61_spill] sm:$0xff] }
 0x2c0   :  { %2043 = vmatpush1.bf16.msra.mxu0 %v7404_v58  ;;  %2084 = vmatpush1.bf16.msra.mxu1 %v7405_v5  ;;  %4260 = vrcp.f32 %v1951_v27  ;;  %v7418_v58 = vld [vmem:[#allocation62_spill] sm:$0xff]  ;;  %v7419_v5 = vld [vmem:[#allocation63_spill] sm:$0xff] }
 0x2c1   :  { %2044 = vmatprep.subr.bf16.mxu0 %v7406_v25  ;;  %2085 = vmatprep.subr.bf16.mxu1 %v7407_v1  ;;  %v7420_v25 = vld [vmem:[#allocation64_spill] sm:$0xff]  ;;  %v7421_v1 = vld [vmem:[#allocation65_spill] sm:$0xff] }
 0x2c2   :  { %2074 = vmatprep.mubr.bf16.mxu0 %v7310_v61  ;;  %2115 = vmatprep.mubr.bf16.mxu1 %v7310_v61 }
 0x2c4   :  { %2045 = vmatpush1.bf16.msra.mxu0 %v7408_v53  ;;  %2086 = vmatpush1.bf16.msra.mxu1 %v7409_v2  ;;  %v7422_v53 = vld [vmem:[#allocation66_spill] sm:$0xff]  ;;  %v7424_v2 = vld [vmem:[#allocation68_spill] sm:$0xff] }
 0x2c5   :  { %2046 = vmatprep.subr.bf16.mxu0 %v7410_v52  ;;  %2087 = vmatprep.subr.bf16.mxu1 %v7411_v54  ;;  %v7425_v52 = vld [vmem:[#allocation69_spill] sm:$0xff]  ;;  %v7426_v54 = vld [vmem:[#allocation70_spill] sm:$0xff] }
 0x2c8   :  { %v4257_v43 = vpop.eup %4256  ;;  %2047 = vmatpush1.bf16.msra.mxu0 %v7412_v26  ;;  %2088 = vmatpush1.bf16.msra.mxu1 %v7413_v3  ;;  %v7428_v26 = vld [vmem:[#allocation72_spill] sm:$0xff]  ;;  %v7429_v3 = vld [vmem:[#allocation73_spill] sm:$0xff] }
 0x2c9   :  { %v4259_v55 = vpop.eup %4258  ;;  %v1955_v35 = vmul.f32 %v4257_v43, %v4255_v0  ;;  %2048 = vmatprep.subr.bf16.mxu0 %v7414_v56  ;;  %2089 = vmatprep.subr.bf16.mxu1 %v7415_v59  ;;  %v7432_v56 = vld [vmem:[#allocation76_spill] sm:$0xff]  ;;  %v7433_v59 = vld [vmem:[#allocation77_spill] sm:$0xff] }
 0x2ca   :  { %v1954_v29 = vmul.f32 %v4259_v55, %v5733_v17  ;;  %v7423_v17 = vld [vmem:[#allocation67_spill] sm:$0xff]  ;;  %v4261_v0 = vpop.eup %4260  ;;  %v7430_v55 = vld [vmem:[#allocation74_spill] sm:$0xff] }
 0x2cc   :  { %v5852_v8 = vadd.f32 %v1955_v35, %v1954_v29  ;;  %2049 = vmatpush1.bf16.msra.mxu0 %v7416_v22  ;;  %2090 = vmatpush1.bf16.msra.mxu1 %v7417_v28  ;;  %v7431_v35 = vld [vmem:[#allocation75_spill] sm:$0xff]  ;;  %v5875_v22 = vld [vmem:[#allocation4 + $0x8] sm:$0xff]  ;;  %v5878_v28 = vld [vmem:[#allocation4 + $0x18] sm:$0xff] }
 0x2cd   :  { %2050 = vmatprep.subr.bf16.mxu0 %v7418_v58  ;;  %2091 = vmatprep.subr.bf16.mxu1 %v7419_v5  ;;  %v5883_v58 = vld [vmem:[#allocation4] sm:$0xff]  ;;  %v5886_v5 = vld [vmem:[#allocation4 + $0x10] sm:$0xff] }
 0x2ce   :  { %4262 = vtanh.f32 %v5852_v8 }
 0x2d0   :  { %2051 = vmatpush1.bf16.msra.mxu0 %v7420_v25  ;;  %2092 = vmatpush1.bf16.msra.mxu1 %v7421_v1  ;;  %v5889_v25 = vld [vmem:[#allocation4 + $0x28] sm:$0xff]  ;;  %v5892_v1 = vld [vmem:[#allocation4 + $0x38] sm:$0xff] }
 0x2d1   :  { %2052 = vmatprep.subr.bf16.mxu0 %v7422_v53  ;;  %2093 = vmatprep.subr.bf16.mxu1 %v7423_v17  ;;  %7434 = vst [vmem:[#allocation23_spill] sm:$0xff] %v5892_v1  ;;  %v5897_v53 = vld [vmem:[#allocation4 + $0x20] sm:$0xff]  ;;  %v5900_v17 = vld [vmem:[#allocation4 + $0x30] sm:$0xff] }
 0x2d2   :  { %7435 = vst [vmem:[#allocation24_spill] sm:$0xff] %v5897_v53  ;;  %7436 = vst [vmem:[#allocation25_spill] sm:$0xff] %v5900_v17 }
 0x2d4   :  { %2053 = vmatpush1.bf16.msra.mxu0 %v7424_v2  ;;  %2094 = vmatpush1.bf16.msra.mxu1 %v7425_v52  ;;  %v5903_v2 = vld [vmem:[#allocation4 + $0x48] sm:$0xff]  ;;  %v5906_v52 = vld [vmem:[#allocation4 + $0x58] sm:$0xff] }
 0x2d5   :  { %2054 = vmatprep.subr.bf16.mxu0 %v7426_v54  ;;  %2095 = vmatprep.subr.bf16.mxu1 %v7427_v6  ;;  %7437 = vst [vmem:[#allocation26_spill] sm:$0xff] %v5903_v2  ;;  %7438 = vst [vmem:[#allocation27_spill] sm:$0xff] %v5906_v52  ;;  %v5909_v54 = vld [vmem:[#allocation4 + $0x40] sm:$0xff]  ;;  %v5912_v6 = vld [vmem:[#allocation4 + $0x50] sm:$0xff] }
 0x2d6   :  { %7439 = vst [vmem:[#allocation28_spill] sm:$0xff] %v5909_v54  ;;  %7440 = vst [vmem:[#allocation29_spill] sm:$0xff] %v5912_v6 }
 0x2d8   :  { %v4263_v43 = vpop.eup %4262  ;;  %2055 = vmatpush1.bf16.msra.mxu0 %v7428_v26  ;;  %2096 = vmatpush1.bf16.msra.mxu1 %v7429_v3  ;;  %v5921_v26 = vld [vmem:[#allocation4 + $0x60] sm:$0xff]  ;;  %v5924_v3 = vld [vmem:[#allocation4 + $0x70] sm:$0xff] }
 0x2d9   :  { %2056 = vmatprep.subr.bf16.mxu0 %v7430_v55  ;;  %2097 = vmatprep.subr.bf16.mxu1 %v7431_v35  ;;  %v1958_v27 = vmul.f32 %v4263_v43, %v4261_v0  ;;  %v5915_v0 = vld [vmem:[#allocation4 + $0x68] sm:$0xff]  ;;  %v5918_v43 = vld [vmem:[#allocation4 + $0x78] sm:$0xff]  ;;  %7443 = vst [vmem:[#allocation32_spill] sm:$0xff] %v5921_v26  ;;  %7444 = vst [vmem:[#allocation33_spill] sm:$0xff] %v5924_v3 }
 0x2da   :  { %7441 = vst [vmem:[#allocation30_spill] sm:$0xff] %v5915_v0  ;;  %7442 = vst [vmem:[#allocation31_spill] sm:$0xff] %v5918_v43  ;;  %v5927_v55 = vld [vmem:[#allocation4 + $0x88] sm:$0xff]  ;;  %v5930_v35 = vld [vmem:[#allocation4 + $0x98] sm:$0xff] }
 0x2db   :  { %v5873_v29 = vpack.c.bf16 %v1958_v27, %v1958_v27  ;;  %7445 = vst [vmem:[#allocation34_spill] sm:$0xff] %v5927_v55  ;;  %7446 = vst [vmem:[#allocation35_spill] sm:$0xff] %v5930_v35  ;;  %v5933_v27 = vld [vmem:[#allocation4 + $0x80] sm:$0xff] }
 0x2dc   :  { %2057 = vmatpush1.bf16.msra.mxu0 %v7432_v56  ;;  %2098 = vmatpush1.bf16.msra.mxu1 %v7433_v59  ;;  %7447 = vst [vmem:[#allocation36_spill] sm:$0xff] %v5933_v27  ;;  %v5936_v56 = vld [vmem:[#allocation4 + $0x90] sm:$0xff]  ;;  %v5939_v59 = vld [vmem:[#allocation4 + $0xa8] sm:$0xff] }
 0x2dd   :  { %2162 = vmatprep.subr.bf16.mxu0 %v5875_v22  ;;  %2203 = vmatprep.subr.bf16.mxu1 %v5878_v28  ;;  %7448 = vst [vmem:[#allocation37_spill] sm:$0xff] %v5936_v56  ;;  %7449 = vst [vmem:[#allocation38_spill] sm:$0xff] %v5939_v59 }
 0x2df   :  { %2075 = vmatmul.mubr.bf16.vlgmr.msra.gmra.mrb[36].mxu0 %v5873_v29  ;;  %2116 = vmatmul.mubr.bf16.vlgmr.msra.gmra.mrb[36].mxu1 %v5873_v29 }
 0x2e0   :  { %2163 = vmatpush1.bf16.msra.mxu0 %v5883_v58  ;;  %2204 = vmatpush1.bf16.msra.mxu1 %v5886_v5 }
 0x2e1   :  { %2164 = vmatprep.subr.bf16.mxu0 %v5889_v25  ;;  %2205 = vmatprep.subr.bf16.mxu1 %v5892_v1 }
 0x2e2   :  { %2194 = vmatprep.mubr.bf16.mxu0 %v7310_v61  ;;  %2235 = vmatprep.mubr.bf16.mxu1 %v7310_v61 }
 0x2e4   :  { %2165 = vmatpush1.bf16.msra.mxu0 %v5897_v53  ;;  %2206 = vmatpush1.bf16.msra.mxu1 %v5900_v17 }
 0x2e5   :  { %2166 = vmatprep.subr.bf16.mxu0 %v5903_v2  ;;  %2207 = vmatprep.subr.bf16.mxu1 %v5906_v52 }
 0x2e8   :  { %2167 = vmatpush1.bf16.msra.mxu0 %v5909_v54  ;;  %2208 = vmatpush1.bf16.msra.mxu1 %v5912_v6 }
 0x2e9   :  { %2168 = vmatprep.subr.bf16.mxu0 %v5915_v0  ;;  %2209 = vmatprep.subr.bf16.mxu1 %v5918_v43 }
 0x2ec   :  { %2169 = vmatpush1.bf16.msra.mxu0 %v5921_v26  ;;  %2210 = vmatpush1.bf16.msra.mxu1 %v5924_v3  ;;  %v5942_v3 = vld [vmem:[#allocation4 + $0xb8] sm:$0xff] }
 0x2ed   :  { %2170 = vmatprep.subr.bf16.mxu0 %v5927_v55  ;;  %2211 = vmatprep.subr.bf16.mxu1 %v5930_v35  ;;  %7450 = vst [vmem:[#allocation39_spill] sm:$0xff] %v5942_v3  ;;  %v5945_v55 = vld [vmem:[#allocation4 + $0xa0] sm:$0xff]  ;;  %v5948_v35 = vld [vmem:[#allocation4 + $0xb0] sm:$0xff] }
 0x2ee   :  { %7451 = vst [vmem:[#allocation40_spill] sm:$0xff] %v5945_v55  ;;  %7452 = vst [vmem:[#allocation41_spill] sm:$0xff] %v5948_v35 }
 0x2f0   :  { %2171 = vmatpush1.bf16.msra.mxu0 %v5933_v27  ;;  %2212 = vmatpush1.bf16.msra.mxu1 %v5936_v56 }
 0x2f1   :  { %2172 = vmatprep.subr.bf16.mxu0 %v5939_v59  ;;  %2213 = vmatprep.subr.bf16.mxu1 %v5942_v3 }
 0x2f4   :  { %2173 = vmatpush1.bf16.msra.mxu0 %v5945_v55  ;;  %2214 = vmatpush1.bf16.msra.mxu1 %v5948_v35 }
 0x2f5   :  { %2174 = vmatprep.subr.bf16.mxu0 %v5397_v33  ;;  %2215 = vmatprep.subr.bf16.mxu1 %v5399_v34  ;;  %v7453_v33 = vld [vmem:[#allocation42_spill] sm:$0xff]  ;;  %v7454_v34 = vld [vmem:[#allocation43_spill] sm:$0xff] }
 0x2f8   :  { %2175 = vmatpush1.bf16.msra.mxu0 %v5408_v36  ;;  %2216 = vmatpush1.bf16.msra.mxu1 %v5410_v37  ;;  %v7455_v36 = vld [vmem:[#allocation44_spill] sm:$0xff]  ;;  %v7456_v37 = vld [vmem:[#allocation45_spill] sm:$0xff] }
 0x2f9   :  { %2176 = vmatprep.subr.bf16.mxu0 %v5412_v38  ;;  %2217 = vmatprep.subr.bf16.mxu1 %v5414_v39  ;;  %v7457_v38 = vld [vmem:[#allocation46_spill] sm:$0xff]  ;;  %v7458_v39 = vld [vmem:[#allocation47_spill] sm:$0xff] }
 0x2fc   :  { %2177 = vmatpush1.bf16.msra.mxu0 %v5425_v41  ;;  %2218 = vmatpush1.bf16.msra.mxu1 %v5427_v42 }
 0x2fd   :  { %2273 = vmatprep.subr.bf16.mxu0 %v5435_v44  ;;  %2314 = vmatprep.subr.bf16.mxu1 %v5438_v45 }
 0x2ff   :  { %2195 = vmatmul.mubr.bf16.vlgmr.msra.gmra.mrb[40].mxu0 %v5873_v29  ;;  %2236 = vmatmul.mubr.bf16.vlgmr.msra.gmra.mrb[40].mxu1 %v5873_v29 }
 0x300   :  { %2274 = vmatpush1.bf16.msra.mxu0 %v5440_v46  ;;  %2315 = vmatpush1.bf16.msra.mxu1 %v5444_v47 }
 0x301   :  { %2275 = vmatprep.subr.bf16.mxu0 %v5447_v48  ;;  %2316 = vmatprep.subr.bf16.mxu1 %v5450_v49 }
 0x302   :  { %2305 = vmatprep.mubr.bf16.mxu0 %v7310_v61  ;;  %2346 = vmatprep.mubr.bf16.mxu1 %v7310_v61 }
 0x304   :  { %2276 = vmatpush1.bf16.msra.mxu0 %v5452_v50  ;;  %2317 = vmatpush1.bf16.msra.mxu1 %v5456_v51 }
 0x305   :  { %2277 = vmatprep.subr.bf16.mxu0 %v7368_v9  ;;  %2318 = vmatprep.subr.bf16.mxu1 %v7369_v10 }
 0x308   :  { %2278 = vmatpush1.bf16.msra.mxu0 %v7370_v11  ;;  %2319 = vmatpush1.bf16.msra.mxu1 %v7371_v12 }
 0x309   :  { %2279 = vmatprep.subr.bf16.mxu0 %v7372_v13  ;;  %2320 = vmatprep.subr.bf16.mxu1 %v7373_v14 }
 0x30c   :  { %2280 = vmatpush1.bf16.msra.mxu0 %v7374_v15  ;;  %2321 = vmatpush1.bf16.msra.mxu1 %v7375_v16 }
 0x30d   :  { %2281 = vmatprep.subr.bf16.mxu0 %v7376_v18  ;;  %2322 = vmatprep.subr.bf16.mxu1 %v7377_v19 }
 0x310   :  { %2282 = vmatpush1.bf16.msra.mxu0 %v7378_v20  ;;  %2323 = vmatpush1.bf16.msra.mxu1 %v7379_v21 }
 0x311   :  { %2283 = vmatprep.subr.bf16.mxu0 %v7380_v23  ;;  %2324 = vmatprep.subr.bf16.mxu1 %v7381_v24 }
 0x314   :  { %2284 = vmatpush1.bf16.msra.mxu0 %v7382_v31  ;;  %2325 = vmatpush1.bf16.msra.mxu1 %v7383_v32 }
 0x315   :  { %2285 = vmatprep.subr.bf16.mxu0 %v7384_v62  ;;  %2326 = vmatprep.subr.bf16.mxu1 %v7385_v60  ;;  %v7459_v62 = vld [vmem:[#allocation22_spill] sm:$0xff] }
 0x318   :  { %2286 = vmatpush1.bf16.msra.mxu0 %v7386_v4  ;;  %2327 = vmatpush1.bf16.msra.mxu1 %v7387_v63 }
 0x319   :  { %2287 = vmatprep.subr.bf16.mxu0 %v7453_v33  ;;  %2328 = vmatprep.subr.bf16.mxu1 %v7454_v34 }
 0x31c   :  { %2288 = vmatpush1.bf16.msra.mxu0 %v7455_v36  ;;  %2329 = vmatpush1.bf16.msra.mxu1 %v7456_v37 }
 0x31d   :  { %2355 = vmatprep.subr.bf16.mxu0 %v7457_v38  ;;  %2396 = vmatprep.subr.bf16.mxu1 %v7458_v39 }
 0x392   :  { %v1994_v41 = vpop.f32.mrb[32].mxu0  ;;  %v2035_v42 = vpop.f32.mrb[32].mxu1 }
 0x393   :  { %v1996_v44 = vpop.f32.mrb[33].mxu0  ;;  %v2037_v45 = vpop.f32.mrb[33].mxu1 }
 0x394   :  { %v1998_v46 = vpop.f32.mrb[34].mxu0  ;;  %v2039_v47 = vpop.f32.mrb[34].mxu1 }
 0x395   :  { %v1999_v48 = vpop.f32.mrb[35].mxu0  ;;  %v2040_v49 = vpop.f32.mrb[35].mxu1  ;;  %v7460_v46 = vld [vmem:[#allocation83_spill] sm:$0xff] }
 0x396   :  { %v7461_v48 = vld [vmem:[#allocation84_spill] sm:$0xff] }
 0x3b2   :  { %v2076_v50 = vpop.f32.mrb[36].mxu0  ;;  %v2117_v51 = vpop.f32.mrb[36].mxu1 }
 0x3b3   :  { %v2077_v9 = vadd.f32 %v2076_v50, %v1994_v41  ;;  %v2118_v10 = vadd.f32 %v2117_v51, %v2035_v42  ;;  %v2078_v11 = vpop.f32.mrb[37].mxu0  ;;  %v2119_v12 = vpop.f32.mrb[37].mxu1 }
 0x3b4   :  { %v2079_v13 = vadd.f32 %v2078_v11, %v1996_v44  ;;  %v2120_v14 = vadd.f32 %v2119_v12, %v2037_v45  ;;  %v2080_v15 = vpop.f32.mrb[38].mxu0  ;;  %v2121_v16 = vpop.f32.mrb[38].mxu1  ;;  %v7463_v12 = vld [vmem:[#allocation86_spill] sm:$0xff] }
 0x3b5   :  { %v2124_v18 = vadd.f32 %v2077_v9, %v5806_v57  ;;  %v2081_v19 = vpop.f32.mrb[39].mxu0  ;;  %v2122_v20 = vpop.f32.mrb[39].mxu1  ;;  %v2126_v60 = vadd.f32 %v2118_v10, %v7459_v62  ;;  %v7462_v10 = vld [vmem:[#allocation85_spill] sm:$0xff] }
 0x3b6   :  { %v2125_v21 = vadd.f32 %v2079_v13, %v5810_v40  ;;  %v2127_v31 = vadd.f32 %v2120_v14, %v5816_v7 }
 0x3b7   :  { %v4161_v23 = vmul.f32 -1.442695, %v2124_v18 }
 0x3b8   :  { %v4162_v24 = vmul.f32 -1.442695, %v2125_v21  ;;  %v4163_v32 = vmul.f32 -1.442695, %v2127_v31 }
 0x3b9   :  { %4264 = vpow2.f32 %v4161_v23 }
 0x3ba   :  { %4266 = vpow2.f32 %v4162_v24 }
 0x3bb   :  { %4268 = vpow2.f32 %v4163_v32 }
 0x3bc   :  { %4270 = vtanh.f32 %v2126_v60 }
 0x3c3   :  { %v4265_v4 = vpop.eup %4264 }
 0x3c4   :  { %v4267_v63 = vpop.eup %4266  ;;  %v2131_v29 = vadd.f32 1.0, %v4265_v4 }
 0x3c5   :  { %v2137_v33 = vadd.f32 1.0, %v4267_v63  ;;  %v4269_v34 = vpop.eup %4268 }
 0x3c6   :  { %4272 = vrcp.f32 %v2131_v29  ;;  %v4271_v36 = vpop.eup %4270  ;;  %v2144_v41 = vadd.f32 1.0, %v4269_v34  ;;  %v6012_v29 = vld [vmem:[#allocation6] sm:$0xff]  ;;  %v6018_v34 = vld [vmem:[#allocation6 + $0x28] sm:$0xff] }
 0x3c7   :  { %4274 = vrcp.f32 %v2137_v33  ;;  %v6015_v33 = vld [vmem:[#allocation6 + $0x10] sm:$0xff] }
 0x3c8   :  { %4276 = vrcp.f32 %v2144_v41  ;;  %v6035_v41 = vld [vmem:[#allocation6 + $0x58] sm:$0xff] }
 0x3d0   :  { %v4273_v37 = vpop.eup %4272 }
 0x3d1   :  { %v4275_v38 = vpop.eup %4274  ;;  %v2148_v39 = vmul.f32 %v4273_v37, %v4271_v36  ;;  %v6021_v36 = vld [vmem:[#allocation6 + $0x38] sm:$0xff]  ;;  %v6026_v37 = vld [vmem:[#allocation6 + $0x20] sm:$0xff] }
 0x3d2   :  { %v2147_v42 = vmul.f32 %v4275_v38, %v5829_v30  ;;  %v2196_v44 = vpop.f32.mrb[40].mxu0  ;;  %v2237_v45 = vpop.f32.mrb[40].mxu1  ;;  %v6029_v38 = vld [vmem:[#allocation6 + $0x30] sm:$0xff] }
 0x3d3   :  { %v2244_v47 = vadd.f32 %v2196_v44, %v7460_v46  ;;  %v2246_v49 = vadd.f32 %v2237_v45, %v7461_v48  ;;  %v2198_v50 = vpop.f32.mrb[41].mxu0  ;;  %v2239_v51 = vpop.f32.mrb[41].mxu1  ;;  %v6038_v46 = vld [vmem:[#allocation6 + $0x40] sm:$0xff] }
 0x3d4   :  { %v6004_v9 = vadd.f32 %v2148_v39, %v2147_v42  ;;  %v2245_v11 = vadd.f32 %v2198_v50, %v7462_v10  ;;  %v2247_v13 = vadd.f32 %v2239_v51, %v7463_v12  ;;  %v2200_v14 = vpop.f32.mrb[42].mxu0  ;;  %v2241_v15 = vpop.f32.mrb[42].mxu1  ;;  %v6032_v39 = vld [vmem:[#allocation6 + $0x48] sm:$0xff]  ;;  %v6047_v10 = vld [vmem:[#allocation6 + $0x78] sm:$0xff] }
 0x3d5   :  { %v4165_v16 = vmul.f32 -1.442695, %v2244_v47  ;;  %v2201_v18 = vpop.f32.mrb[43].mxu0  ;;  %v2242_v30 = vpop.f32.mrb[43].mxu1  ;;  %v6041_v47 = vld [vmem:[#allocation6 + $0x50] sm:$0xff]  ;;  %v6044_v51 = vld [vmem:[#allocation6 + $0x68] sm:$0xff] }
 0x3d6   :  { %v4166_v19 = vmul.f32 -1.442695, %v2245_v11  ;;  %4278 = vtanh.f32 %v6004_v9  ;;  %v4167_v20 = vmul.f32 -1.442695, %v2247_v13  ;;  %v4277_v21 = vpop.eup %4276  ;;  %v6053_v13 = vld [vmem:[#allocation6 + $0x60] sm:$0xff]  ;;  %v6056_v14 = vld [vmem:[#allocation6 + $0x70] sm:$0xff] }
 0x3d7   :  { %4280 = vpow2.f32 %v4165_v16  ;;  %v6059_v15 = vld [vmem:[#allocation6 + $0x88] sm:$0xff]  ;;  %v6062_v16 = vld [vmem:[#allocation6 + $0x98] sm:$0xff]  ;;  %v6069_v18 = vld [vmem:[#allocation6 + $0x90] sm:$0xff] }
 0x3d8   :  { %4282 = vpow2.f32 %v4166_v19  ;;  %v6072_v30 = vld [vmem:[#allocation6 + $0xa8] sm:$0xff]  ;;  %v6075_v19 = vld [vmem:[#allocation6 + $0xb8] sm:$0xff] }
 0x3d9   :  { %4284 = vpow2.f32 %v4167_v20  ;;  %v6078_v20 = vld [vmem:[#allocation6 + $0xa0] sm:$0xff] }
 0x3da   :  { %4286 = vtanh.f32 %v2246_v49 }
 0x3e0   :  { %v4279_v23 = vpop.eup %4278 }
 0x3e1   :  { %v4281_v24 = vpop.eup %4280  ;;  %v2151_v31 = vmul.f32 %v4279_v23, %v4277_v21  ;;  %v6081_v21 = vld [vmem:[#allocation6 + $0xb0] sm:$0xff]  ;;  %v6084_v23 = vld [vmem:[#allocation6 + $0xc8] sm:$0xff] }
 0x3e2   :  { %v4283_v32 = vpop.eup %4282  ;;  %v2251_v60 = vadd.f32 1.0, %v4281_v24  ;;  %v6087_v24 = vld [vmem:[#allocation6 + $0xd8] sm:$0xff] }
 0x3e3   :  { %v2257_v4 = vadd.f32 1.0, %v4283_v32  ;;  %v2152_v63 = vpack.c.bf16 %v2151_v31, %v2151_v31  ;;  %v4285_v42 = vpop.eup %4284 }
 0x3e4   :  { %4288 = vrcp.f32 %v2251_v60  ;;  %v4287_v44 = vpop.eup %4286  ;;  %v2264_v50 = vadd.f32 1.0, %v4285_v42  ;;  %v6090_v60 = vld [vmem:[#allocation6 + $0xc0] sm:$0xff]  ;;  %v6099_v42 = vld [vmem:[#allocation6 + $0xf8] sm:$0xff] }
 0x3e5   :  { %4290 = vrcp.f32 %v2257_v4  ;;  %4164 = vst [vmem:[%s7018_s7 + $0x4] sm:$0xf] %v2152_v63  ;;  %2306 = vmatmul.mubr.bf16.vlgmr.msra.gmra.mrb[44].mxu0 %v2152_v63  ;;  %2347 = vmatmul.mubr.bf16.vlgmr.msra.gmra.mrb[44].mxu1 %v2152_v63  ;;  %v6093_v4 = vld [vmem:[#allocation6 + $0xd0] sm:$0xff]  ;;  %v6096_v63 = vld [vmem:[#allocation6 + $0xe8] sm:$0xff] }
 0x3e6   :  { %2356 = vmatpush1.bf16.msra.mxu0 %v6012_v29  ;;  %2397 = vmatpush1.bf16.msra.mxu1 %v6015_v33  ;;  %4292 = vrcp.f32 %v2264_v50  ;;  %v7464_v50 = vld [vmem:[#allocation33_spill] sm:$0xff] }
 0x3e7   :  { %2357 = vmatprep.subr.bf16.mxu0 %v6018_v34  ;;  %2398 = vmatprep.subr.bf16.mxu1 %v6021_v36 }
 0x3e8   :  { %2387 = vmatprep.mubr.bf16.mxu0 %v7310_v61  ;;  %2428 = vmatprep.mubr.bf16.mxu1 %v7310_v61 }
 0x3ea   :  { %2358 = vmatpush1.bf16.msra.mxu0 %v6026_v37  ;;  %2399 = vmatpush1.bf16.msra.mxu1 %v6029_v38 }
 0x3eb   :  { %2359 = vmatprep.subr.bf16.mxu0 %v6032_v39  ;;  %2400 = vmatprep.subr.bf16.mxu1 %v6035_v41 }
 0x3ee   :  { %v4289_v45 = vpop.eup %4288  ;;  %2360 = vmatpush1.bf16.msra.mxu0 %v6038_v46  ;;  %2401 = vmatpush1.bf16.msra.mxu1 %v6041_v47 }
 0x3ef   :  { %v4291_v48 = vpop.eup %4290  ;;  %v2268_v49 = vmul.f32 %v4289_v45, %v4287_v44  ;;  %2361 = vmatprep.subr.bf16.mxu0 %v6044_v51  ;;  %2402 = vmatprep.subr.bf16.mxu1 %v6047_v10 }
 0x3f0   :  { %v2267_v11 = vmul.f32 %v4291_v48, %v5852_v8  ;;  %v6066_v8 = vld [vmem:[#allocation6 + $0x80] sm:$0xff]  ;;  %v4293_v31 = vpop.eup %4292 }
 0x3f1   :  { %v6102_v48 = vld [vmem:[#allocation6 + $0xe0] sm:$0xff] }
 0x3f2   :  { %v6051_v12 = vadd.f32 %v2268_v49, %v2267_v11  ;;  %2362 = vmatpush1.bf16.msra.mxu0 %v6053_v13  ;;  %2403 = vmatpush1.bf16.msra.mxu1 %v6056_v14  ;;  %v6105_v49 = vld [vmem:[#allocation6 + $0xf0] sm:$0xff]  ;;  %v7465_v11 = vld [vmem:[#allocation34_spill] sm:$0xff] }
 0x3f3   :  { %2363 = vmatprep.subr.bf16.mxu0 %v6059_v15  ;;  %2404 = vmatprep.subr.bf16.mxu1 %v6062_v16 }
 0x3f4   :  { %4294 = vtanh.f32 %v6051_v12 }
 0x3f6   :  { %2364 = vmatpush1.bf16.msra.mxu0 %v6066_v8  ;;  %2405 = vmatpush1.bf16.msra.mxu1 %v6069_v18 }
 0x3f7   :  { %2365 = vmatprep.subr.bf16.mxu0 %v6072_v30  ;;  %2406 = vmatprep.subr.bf16.mxu1 %v6075_v19 }
 0x3fa   :  { %2366 = vmatpush1.bf16.msra.mxu0 %v6078_v20  ;;  %2407 = vmatpush1.bf16.msra.mxu1 %v6081_v21 }
 0x3fb   :  { %2367 = vmatprep.subr.bf16.mxu0 %v6084_v23  ;;  %2408 = vmatprep.subr.bf16.mxu1 %v6087_v24 }
 0x3fe   :  { %v4295_v32 = vpop.eup %4294  ;;  %2368 = vmatpush1.bf16.msra.mxu0 %v6090_v60  ;;  %2409 = vmatpush1.bf16.msra.mxu1 %v6093_v4 }
 0x3ff   :  { %2369 = vmatprep.subr.bf16.mxu0 %v6096_v63  ;;  %2410 = vmatprep.subr.bf16.mxu1 %v6099_v42  ;;  %v2271_v44 = vmul.f32 %v4295_v32, %v4293_v31  ;;  %v7466_v31 = vld [vmem:[#allocation35_spill] sm:$0xff]  ;;  %v6134_v32 = vld [vmem:[#allocation4 + $0xc8] sm:$0xff] }
 0x400   :  { %7467 = vst [vmem:[#allocation78_spill] sm:$0xff] %v6134_v32 }
 0x401   :  { %v2272_v45 = vpack.c.bf16 %v2271_v44, %v2271_v44  ;;  %v6137_v44 = vld [vmem:[#allocation4 + $0xd8] sm:$0xff] }
 0x402   :  { %2370 = vmatpush1.bf16.msra.mxu0 %v6102_v48  ;;  %2411 = vmatpush1.bf16.msra.mxu1 %v6105_v49  ;;  %7468 = vst [vmem:[#allocation79_spill] sm:$0xff] %v6137_v44 }
 0x403   :  { %2475 = vmatprep.subr.bf16.mxu0 %v5875_v22  ;;  %2516 = vmatprep.subr.bf16.mxu1 %v5878_v28 }
 0x405   :  { %2388 = vmatmul.mubr.bf16.vlgmr.msra.gmra.mrb[48].mxu0 %v2272_v45  ;;  %2429 = vmatmul.mubr.bf16.vlgmr.msra.gmra.mrb[48].mxu1 %v2272_v45 }
 0x406   :  { %2476 = vmatpush1.bf16.msra.mxu0 %v5883_v58  ;;  %2517 = vmatpush1.bf16.msra.mxu1 %v5886_v5 }
 0x407   :  { %2477 = vmatprep.subr.bf16.mxu0 %v5889_v25  ;;  %2518 = vmatprep.subr.bf16.mxu1 %v5892_v1 }
 0x408   :  { %2507 = vmatprep.mubr.bf16.mxu0 %v7310_v61  ;;  %2548 = vmatprep.mubr.bf16.mxu1 %v7310_v61 }
 0x40a   :  { %2478 = vmatpush1.bf16.msra.mxu0 %v5897_v53  ;;  %2519 = vmatpush1.bf16.msra.mxu1 %v5900_v17 }
 0x40b   :  { %2479 = vmatprep.subr.bf16.mxu0 %v5903_v2  ;;  %2520 = vmatprep.subr.bf16.mxu1 %v5906_v52 }
 0x40e   :  { %2480 = vmatpush1.bf16.msra.mxu0 %v5909_v54  ;;  %2521 = vmatpush1.bf16.msra.mxu1 %v5912_v6 }
 0x40f   :  { %2481 = vmatprep.subr.bf16.mxu0 %v5915_v0  ;;  %2522 = vmatprep.subr.bf16.mxu1 %v5918_v43 }
 0x412   :  { %2482 = vmatpush1.bf16.msra.mxu0 %v5921_v26  ;;  %2523 = vmatpush1.bf16.msra.mxu1 %v7464_v50 }
 0x413   :  { %2483 = vmatprep.subr.bf16.mxu0 %v7465_v11  ;;  %2524 = vmatprep.subr.bf16.mxu1 %v7466_v31  ;;  %v6140_v31 = vld [vmem:[#allocation4 + $0xc0] sm:$0xff] }
 0x414   :  { %7469 = vst [vmem:[#allocation80_spill] sm:$0xff] %v6140_v31 }
 0x416   :  { %2484 = vmatpush1.bf16.msra.mxu0 %v5933_v27  ;;  %2525 = vmatpush1.bf16.msra.mxu1 %v5936_v56  ;;  %v6143_v56 = vld [vmem:[#allocation4 + $0xd0] sm:$0xff] }
 0x417   :  { %2485 = vmatprep.subr.bf16.mxu0 %v5939_v59  ;;  %2526 = vmatprep.subr.bf16.mxu1 %v5942_v3  ;;  %7470 = vst [vmem:[#allocation81_spill] sm:$0xff] %v6143_v56  ;;  %v6146_v3 = vld [vmem:[#allocation4 + $0xe8] sm:$0xff] }
 0x418   :  { %7471 = vst [vmem:[#allocation82_spill] sm:$0xff] %v6146_v3 }
 0x41a   :  { %2486 = vmatpush1.bf16.msra.mxu0 %v5945_v55  ;;  %2527 = vmatpush1.bf16.msra.mxu1 %v5948_v35  ;;  %v6149_v35 = vld [vmem:[#allocation4 + $0xf8] sm:$0xff] }
 0x41b   :  { %2487 = vmatprep.subr.bf16.mxu0 %v6134_v32  ;;  %2528 = vmatprep.subr.bf16.mxu1 %v6137_v44  ;;  %7472 = vst [vmem:[#allocation48_spill] sm:$0xff] %v6149_v35  ;;  %v6152_v32 = vld [vmem:[#allocation4 + $0xe0] sm:$0xff]  ;;  %v6155_v44 = vld [vmem:[#allocation4 + $0xf0] sm:$0xff] }
 0x41c   :  { %7473 = vst [vmem:[#allocation49_spill] sm:$0xff] %v6152_v32  ;;  %7474 = vst [vmem:[#allocation50_spill] sm:$0xff] %v6155_v44 }
 0x41e   :  { %2488 = vmatpush1.bf16.msra.mxu0 %v6140_v31  ;;  %2529 = vmatpush1.bf16.msra.mxu1 %v6143_v56  ;;  %v6158_v31 = vld [vmem:[#allocation7 + $0x8] sm:$0xff]  ;;  %v6161_v56 = vld [vmem:[#allocation7 + $0x18] sm:$0xff] }
 0x41f   :  { %2489 = vmatprep.subr.bf16.mxu0 %v6146_v3  ;;  %2530 = vmatprep.subr.bf16.mxu1 %v6149_v35  ;;  %7475 = vst [vmem:[#allocation51_spill] sm:$0xff] %v6158_v31  ;;  %7476 = vst [vmem:[#allocation52_spill] sm:$0xff] %v6161_v56  ;;  %v6164_v3 = vld [vmem:[#allocation7] sm:$0xff]  ;;  %v6167_v35 = vld [vmem:[#allocation7 + $0x10] sm:$0xff] }
 0x420   :  { %7477 = vst [vmem:[#allocation53_spill] sm:$0xff] %v6164_v3  ;;  %7478 = vst [vmem:[#allocation54_spill] sm:$0xff] %v6167_v35 }
 0x422   :  { %2490 = vmatpush1.bf16.msra.mxu0 %v6152_v32  ;;  %2531 = vmatpush1.bf16.msra.mxu1 %v6155_v44  ;;  %v6170_v32 = vld [vmem:[#allocation7 + $0x28] sm:$0xff]  ;;  %v6173_v44 = vld [vmem:[#allocation7 + $0x38] sm:$0xff] }
 0x423   :  { %2586 = vmatprep.subr.bf16.mxu0 %v6158_v31  ;;  %2627 = vmatprep.subr.bf16.mxu1 %v6161_v56  ;;  %7479 = vst [vmem:[#allocation55_spill] sm:$0xff] %v6170_v32  ;;  %7480 = vst [vmem:[#allocation56_spill] sm:$0xff] %v6173_v44  ;;  %v6193_v56 = vld [vmem:[#allocation7 + $0x50] sm:$0xff] }
 0x424   :  { %7486 = vst [vmem:[#allocation62_spill] sm:$0xff] %v6193_v56 }
 0x425   :  { %2508 = vmatmul.mubr.bf16.vlgmr.msra.gmra.mrb[52].mxu0 %v2272_v45  ;;  %2549 = vmatmul.mubr.bf16.vlgmr.msra.gmra.mrb[52].mxu1 %v2272_v45  ;;  %v6178_v45 = vld [vmem:[#allocation7 + $0x20] sm:$0xff] }
 0x426   :  { %2587 = vmatpush1.bf16.msra.mxu0 %v6164_v3  ;;  %2628 = vmatpush1.bf16.msra.mxu1 %v6167_v35  ;;  %7481 = vst [vmem:[#allocation57_spill] sm:$0xff] %v6178_v45  ;;  %v6181_v3 = vld [vmem:[#allocation7 + $0x30] sm:$0xff]  ;;  %v6184_v35 = vld [vmem:[#allocation7 + $0x48] sm:$0xff] }
 0x427   :  { %2588 = vmatprep.subr.bf16.mxu0 %v6170_v32  ;;  %2629 = vmatprep.subr.bf16.mxu1 %v6173_v44  ;;  %7482 = vst [vmem:[#allocation58_spill] sm:$0xff] %v6181_v3  ;;  %7483 = vst [vmem:[#allocation59_spill] sm:$0xff] %v6184_v35  ;;  %v6187_v32 = vld [vmem:[#allocation7 + $0x58] sm:$0xff]  ;;  %v6190_v44 = vld [vmem:[#allocation7 + $0x40] sm:$0xff] }
 0x428   :  { %2618 = vmatprep.mubr.bf16.mxu0 %v7310_v61  ;;  %2659 = vmatprep.mubr.bf16.mxu1 %v7310_v61  ;;  %7484 = vst [vmem:[#allocation60_spill] sm:$0xff] %v6187_v32  ;;  %7485 = vst [vmem:[#allocation61_spill] sm:$0xff] %v6190_v44 }
 0x42a   :  { %2589 = vmatpush1.bf16.msra.mxu0 %v6178_v45  ;;  %2630 = vmatpush1.bf16.msra.mxu1 %v6181_v3  ;;  %v6196_v45 = vld [vmem:[#allocation7 + $0x68] sm:$0xff]  ;;  %v6199_v3 = vld [vmem:[#allocation7 + $0x78] sm:$0xff] }
 0x42b   :  { %2590 = vmatprep.subr.bf16.mxu0 %v6184_v35  ;;  %2631 = vmatprep.subr.bf16.mxu1 %v6187_v32  ;;  %7487 = vst [vmem:[#allocation63_spill] sm:$0xff] %v6196_v45  ;;  %7488 = vst [vmem:[#allocation64_spill] sm:$0xff] %v6199_v3  ;;  %v6202_v35 = vld [vmem:[#allocation7 + $0x60] sm:$0xff]  ;;  %v6205_v32 = vld [vmem:[#allocation7 + $0x70] sm:$0xff] }
 0x42c   :  { %7489 = vst [vmem:[#allocation65_spill] sm:$0xff] %v6202_v35  ;;  %7490 = vst [vmem:[#allocation66_spill] sm:$0xff] %v6205_v32 }
 0x42e   :  { %2591 = vmatpush1.bf16.msra.mxu0 %v6190_v44  ;;  %2632 = vmatpush1.bf16.msra.mxu1 %v6193_v56  ;;  %v6208_v44 = vld [vmem:[#allocation7 + $0x88] sm:$0xff]  ;;  %v6211_v56 = vld [vmem:[#allocation7 + $0x98] sm:$0xff] }
 0x42f   :  { %2592 = vmatprep.subr.bf16.mxu0 %v6196_v45  ;;  %2633 = vmatprep.subr.bf16.mxu1 %v6199_v3  ;;  %7491 = vst [vmem:[#allocation67_spill] sm:$0xff] %v6208_v44  ;;  %7492 = vst [vmem:[#allocation68_spill] sm:$0xff] %v6211_v56  ;;  %v6214_v45 = vld [vmem:[#allocation7 + $0x80] sm:$0xff]  ;;  %v6217_v3 = vld [vmem:[#allocation7 + $0x90] sm:$0xff] }
 0x430   :  { %7493 = vst [vmem:[#allocation69_spill] sm:$0xff] %v6214_v45  ;;  %7494 = vst [vmem:[#allocation70_spill] sm:$0xff] %v6217_v3 }
 0x432   :  { %2593 = vmatpush1.bf16.msra.mxu0 %v6202_v35  ;;  %2634 = vmatpush1.bf16.msra.mxu1 %v6205_v32  ;;  %v6220_v35 = vld [vmem:[#allocation7 + $0xa8] sm:$0xff]  ;;  %v6223_v32 = vld [vmem:[#allocation7 + $0xb8] sm:$0xff] }
 0x433   :  { %2594 = vmatprep.subr.bf16.mxu0 %v6208_v44  ;;  %2635 = vmatprep.subr.bf16.mxu1 %v6211_v56  ;;  %7495 = vst [vmem:[#allocation71_spill] sm:$0xff] %v6220_v35  ;;  %7496 = vst [vmem:[#allocation72_spill] sm:$0xff] %v6223_v32  ;;  %v6226_v44 = vld [vmem:[#allocation7 + $0xa0] sm:$0xff]  ;;  %v6229_v56 = vld [vmem:[#allocation7 + $0xb0] sm:$0xff] }
 0x434   :  { %7497 = vst [vmem:[#allocation73_spill] sm:$0xff] %v6226_v44  ;;  %7498 = vst [vmem:[#allocation74_spill] sm:$0xff] %v6229_v56 }
 0x436   :  { %2595 = vmatpush1.bf16.msra.mxu0 %v6214_v45  ;;  %2636 = vmatpush1.bf16.msra.mxu1 %v6217_v3  ;;  %v6232_v45 = vld [vmem:[#allocation7 + $0xc8] sm:$0xff]  ;;  %v6235_v3 = vld [vmem:[#allocation7 + $0xd8] sm:$0xff] }
 0x437   :  { %2596 = vmatprep.subr.bf16.mxu0 %v6220_v35  ;;  %2637 = vmatprep.subr.bf16.mxu1 %v6223_v32  ;;  %7499 = vst [vmem:[#allocation75_spill] sm:$0xff] %v6232_v45  ;;  %7500 = vst [vmem:[#allocation76_spill] sm:$0xff] %v6235_v3  ;;  %v6238_v35 = vld [vmem:[#allocation7 + $0xc0] sm:$0xff]  ;;  %v6241_v32 = vld [vmem:[#allocation7 + $0xd0] sm:$0xff] }
 0x438   :  { %7501 = vst [vmem:[#allocation77_spill] sm:$0xff] %v6238_v35  ;;  %7502 = vst [vmem:[#allocation42_spill] sm:$0xff] %v6241_v32 }
 0x43a   :  { %2597 = vmatpush1.bf16.msra.mxu0 %v6226_v44  ;;  %2638 = vmatpush1.bf16.msra.mxu1 %v6229_v56  ;;  %v6244_v44 = vld [vmem:[#allocation7 + $0xe8] sm:$0xff]  ;;  %v6247_v56 = vld [vmem:[#allocation7 + $0xf8] sm:$0xff] }
 0x43b   :  { %2598 = vmatprep.subr.bf16.mxu0 %v6232_v45  ;;  %2639 = vmatprep.subr.bf16.mxu1 %v6235_v3  ;;  %7503 = vst [vmem:[#allocation43_spill] sm:$0xff] %v6244_v44  ;;  %7504 = vst [vmem:[#allocation44_spill] sm:$0xff] %v6247_v56  ;;  %v6250_v45 = vld [vmem:[#allocation7 + $0xe0] sm:$0xff]  ;;  %v6253_v3 = vld [vmem:[#allocation7 + $0xf0] sm:$0xff] }
 0x43c   :  { %7505 = vst [vmem:[#allocation45_spill] sm:$0xff] %v6250_v45  ;;  %7506 = vst [vmem:[#allocation46_spill] sm:$0xff] %v6253_v3 }
 0x43e   :  { %2599 = vmatpush1.bf16.msra.mxu0 %v6238_v35  ;;  %2640 = vmatpush1.bf16.msra.mxu1 %v6241_v32  ;;  %v6256_v35 = vld [vmem:[#allocation6 + $0x8] sm:$0xff]  ;;  %v6259_v32 = vld [vmem:[#allocation6 + $0x18] sm:$0xff] }
 0x43f   :  { %2600 = vmatprep.subr.bf16.mxu0 %v6244_v44  ;;  %2641 = vmatprep.subr.bf16.mxu1 %v6247_v56  ;;  %7507 = vst [vmem:[#allocation47_spill] sm:$0xff] %v6256_v35  ;;  %7508 = vst [vmem:[#allocation22_spill] sm:$0xff] %v6259_v32 }
 0x442   :  { %2601 = vmatpush1.bf16.msra.mxu0 %v6250_v45  ;;  %2642 = vmatpush1.bf16.msra.mxu1 %v6253_v3 }
 0x443   :  { %2668 = vmatprep.subr.bf16.mxu0 %v6256_v35  ;;  %2709 = vmatprep.subr.bf16.mxu1 %v6259_v32 }
 0x4b8   :  { %v2307_v44 = vpop.f32.mrb[44].mxu0  ;;  %v2348_v31 = vpop.f32.mrb[44].mxu1 }
 0x4b9   :  { %v2309_v55 = vpop.f32.mrb[45].mxu0  ;;  %v2350_v56 = vpop.f32.mrb[45].mxu1 }
 0x4ba   :  { %v2311_v59 = vpop.f32.mrb[46].mxu0  ;;  %v2352_v27 = vpop.f32.mrb[46].mxu1 }
 0x4bb   :  { %v2312_v11 = vpop.f32.mrb[47].mxu0  ;;  %v2353_v45 = vpop.f32.mrb[47].mxu1 }
 0x4d8   :  { %v2389_v50 = vpop.f32.mrb[48].mxu0  ;;  %v2430_v26 = vpop.f32.mrb[48].mxu1 }
 0x4d9   :  { %v2390_v43 = vadd.f32 %v2389_v50, %v2307_v44  ;;  %v2431_v3 = vadd.f32 %v2430_v26, %v2348_v31  ;;  %v2391_v0 = vpop.f32.mrb[49].mxu0  ;;  %v2432_v6 = vpop.f32.mrb[49].mxu1  ;;  %v7510_v44 = vld [vmem:[#allocation88_spill] sm:$0xff] }
 0x4da   :  { %v2392_v54 = vadd.f32 %v2391_v0, %v2309_v55  ;;  %v2433_v35 = vadd.f32 %v2432_v6, %v2350_v56  ;;  %v2393_v52 = vpop.f32.mrb[50].mxu0  ;;  %v2434_v2 = vpop.f32.mrb[50].mxu1 }
 0x4db   :  { %v2437_v32 = vadd.f32 %v2390_v43, %v5806_v57  ;;  %v2394_v17 = vpop.f32.mrb[51].mxu0  ;;  %v2435_v53 = vpop.f32.mrb[51].mxu1  ;;  %v2439_v26 = vadd.f32 %v2431_v3, %v7459_v62 }
 0x4dc   :  { %v2438_v1 = vadd.f32 %v2392_v54, %v5810_v40  ;;  %v2440_v11 = vadd.f32 %v2433_v35, %v5816_v7 }
 0x4dd   :  { %v4168_v59 = vmul.f32 -1.442695, %v2437_v32  ;;  %v7509_v32 = vld [vmem:[#allocation87_spill] sm:$0xff] }
 0x4de   :  { %v4169_v27 = vmul.f32 -1.442695, %v2438_v1  ;;  %v4170_v50 = vmul.f32 -1.442695, %v2440_v11 }
 0x4df   :  { %4296 = vpow2.f32 %v4168_v59 }
 0x4e0   :  { %4298 = vpow2.f32 %v4169_v27 }
 0x4e1   :  { %4300 = vpow2.f32 %v4170_v50  ;;  %v7511_v50 = vld [vmem:[#allocation89_spill] sm:$0xff] }
 0x4e2   :  { %4302 = vtanh.f32 %v2439_v26 }
 0x4e9   :  { %v4297_v31 = vpop.eup %4296 }
 0x4ea   :  { %v4299_v0 = vpop.eup %4298  ;;  %v2444_v6 = vadd.f32 1.0, %v4297_v31  ;;  %v7512_v31 = vld [vmem:[#allocation90_spill] sm:$0xff] }
 0x4eb   :  { %v2450_v2 = vadd.f32 1.0, %v4299_v0  ;;  %v4301_v53 = vpop.eup %4300 }
 0x4ec   :  { %4304 = vrcp.f32 %v2444_v6  ;;  %v4303_v17 = vpop.eup %4302  ;;  %v2457_v43 = vadd.f32 1.0, %v4301_v53 }
 0x4ed   :  { %4306 = vrcp.f32 %v2450_v2 }
 0x4ee   :  { %4308 = vrcp.f32 %v2457_v43 }
 0x4f6   :  { %v4305_v52 = vpop.eup %4304 }
 0x4f7   :  { %v4307_v54 = vpop.eup %4306  ;;  %v2461_v1 = vmul.f32 %v4305_v52, %v4303_v17 }
 0x4f8   :  { %v2460_v55 = vmul.f32 %v4307_v54, %v6004_v9  ;;  %v2509_v35 = vpop.f32.mrb[52].mxu0  ;;  %v2550_v56 = vpop.f32.mrb[52].mxu1 }
 0x4f9   :  { %v2557_v3 = vadd.f32 %v2509_v35, %v7509_v32  ;;  %v2559_v45 = vadd.f32 %v2550_v56, %v7510_v44  ;;  %v2511_v59 = vpop.f32.mrb[53].mxu0  ;;  %v2552_v27 = vpop.f32.mrb[53].mxu1 }
 0x4fa   :  { %v6269_v11 = vadd.f32 %v2461_v1, %v2460_v55  ;;  %v2558_v26 = vadd.f32 %v2511_v59, %v7511_v50  ;;  %v2560_v0 = vadd.f32 %v2552_v27, %v7512_v31  ;;  %v2513_v6 = vpop.f32.mrb[54].mxu0  ;;  %v2554_v2 = vpop.f32.mrb[54].mxu1 }
 0x4fb   :  { %v4172_v53 = vmul.f32 -1.442695, %v2557_v3  ;;  %v2514_v17 = vpop.f32.mrb[55].mxu0  ;;  %v2555_v9 = vpop.f32.mrb[55].mxu1 }
 0x4fc   :  { %v4173_v52 = vmul.f32 -1.442695, %v2558_v26  ;;  %4310 = vtanh.f32 %v6269_v11  ;;  %v4174_v54 = vmul.f32 -1.442695, %v2560_v0  ;;  %v4309_v35 = vpop.eup %4308  ;;  %v7513_v9 = vld [vmem:[#allocation23_spill] sm:$0xff] }
 0x4fd   :  { %4312 = vpow2.f32 %v4172_v53 }
 0x4fe   :  { %4314 = vpow2.f32 %v4173_v52  ;;  %v7514_v52 = vld [vmem:[#allocation24_spill] sm:$0xff] }
 0x4ff   :  { %4316 = vpow2.f32 %v4174_v54  ;;  %v7515_v54 = vld [vmem:[#allocation25_spill] sm:$0xff] }
 0x500   :  { %4318 = vtanh.f32 %v2559_v45 }
 0x506   :  { %v4311_v56 = vpop.eup %4310 }
 0x507   :  { %v4313_v1 = vpop.eup %4312  ;;  %v2464_v55 = vmul.f32 %v4311_v56, %v4309_v35  ;;  %v7518_v35 = vld [vmem:[#allocation28_spill] sm:$0xff] }
 0x508   :  { %v4315_v32 = vpop.eup %4314  ;;  %v2564_v44 = vadd.f32 1.0, %v4313_v1  ;;  %v7522_v56 = vld [vmem:[#allocation32_spill] sm:$0xff]  ;;  %v7523_v1 = vld [vmem:[#allocation33_spill] sm:$0xff] }
 0x509   :  { %v2570_v59 = vadd.f32 1.0, %v4315_v32  ;;  %v2465_v27 = vpack.c.bf16 %v2464_v55, %v2464_v55  ;;  %v4317_v43 = vpop.eup %4316  ;;  %v7524_v55 = vld [vmem:[#allocation34_spill] sm:$0xff]  ;;  %v7525_v32 = vld [vmem:[#allocation35_spill] sm:$0xff] }
 0x50a   :  { %4320 = vrcp.f32 %v2564_v44  ;;  %v4319_v3 = vpop.eup %4318  ;;  %v2577_v31 = vadd.f32 1.0, %v4317_v43  ;;  %v7526_v44 = vld [vmem:[#allocation36_spill] sm:$0xff]  ;;  %v7529_v43 = vld [vmem:[#allocation39_spill] sm:$0xff] }
 0x50b   :  { %4322 = vrcp.f32 %v2570_v59  ;;  %4171 = vst [vmem:[%s7018_s7 + $0x8] sm:$0xf] %v2465_v27  ;;  %2619 = vmatmul.mubr.bf16.vlgmr.msra.gmra.mrb[56].mxu0 %v2465_v27  ;;  %2660 = vmatmul.mubr.bf16.vlgmr.msra.gmra.mrb[56].mxu1 %v2465_v27  ;;  %v7527_v59 = vld [vmem:[#allocation37_spill] sm:$0xff]  ;;  %v7528_v27 = vld [vmem:[#allocation38_spill] sm:$0xff] }
 0x50c   :  { %2669 = vmatpush1.bf16.msra.mxu0 %v6012_v29  ;;  %2710 = vmatpush1.bf16.msra.mxu1 %v6015_v33  ;;  %4324 = vrcp.f32 %v2577_v31  ;;  %v7534_v31 = vld [vmem:[#allocation80_spill] sm:$0xff] }
 0x50d   :  { %2670 = vmatprep.subr.bf16.mxu0 %v6018_v34  ;;  %2711 = vmatprep.subr.bf16.mxu1 %v6021_v36 }
 0x50e   :  { %2700 = vmatprep.mubr.bf16.mxu0 %v7310_v61  ;;  %2741 = vmatprep.mubr.bf16.mxu1 %v7310_v61 }
 0x510   :  { %2671 = vmatpush1.bf16.msra.mxu0 %v6026_v37  ;;  %2712 = vmatpush1.bf16.msra.mxu1 %v6029_v38 }
 0x511   :  { %2672 = vmatprep.subr.bf16.mxu0 %v6032_v39  ;;  %2713 = vmatprep.subr.bf16.mxu1 %v6035_v41 }
 0x514   :  { %v4321_v45 = vpop.eup %4320  ;;  %2673 = vmatpush1.bf16.msra.mxu0 %v6038_v46  ;;  %2714 = vmatpush1.bf16.msra.mxu1 %v6041_v47 }
 0x515   :  { %v4323_v50 = vpop.eup %4322  ;;  %v2581_v26 = vmul.f32 %v4321_v45, %v4319_v3  ;;  %2674 = vmatprep.subr.bf16.mxu0 %v6044_v51  ;;  %2715 = vmatprep.subr.bf16.mxu1 %v6047_v10  ;;  %v7530_v3 = vld [vmem:[#allocation40_spill] sm:$0xff]  ;;  %v7531_v45 = vld [vmem:[#allocation41_spill] sm:$0xff] }
 0x516   :  { %v2580_v0 = vmul.f32 %v4323_v50, %v6051_v12  ;;  %v4325_v12 = vpop.eup %4324  ;;  %v7532_v50 = vld [vmem:[#allocation78_spill] sm:$0xff] }
 0x518   :  { %v6292_v6 = vadd.f32 %v2581_v26, %v2580_v0  ;;  %2675 = vmatpush1.bf16.msra.mxu0 %v6053_v13  ;;  %2716 = vmatpush1.bf16.msra.mxu1 %v6056_v14  ;;  %v7533_v26 = vld [vmem:[#allocation79_spill] sm:$0xff]  ;;  %v7535_v0 = vld [vmem:[#allocation81_spill] sm:$0xff] }
 0x519   :  { %2676 = vmatprep.subr.bf16.mxu0 %v6059_v15  ;;  %2717 = vmatprep.subr.bf16.mxu1 %v6062_v16 }
 0x51a   :  { %4326 = vtanh.f32 %v6292_v6 }
 0x51c   :  { %2677 = vmatpush1.bf16.msra.mxu0 %v6066_v8  ;;  %2718 = vmatpush1.bf16.msra.mxu1 %v6069_v18 }
 0x51d   :  { %2678 = vmatprep.subr.bf16.mxu0 %v6072_v30  ;;  %2719 = vmatprep.subr.bf16.mxu1 %v6075_v19 }
 0x520   :  { %2679 = vmatpush1.bf16.msra.mxu0 %v6078_v20  ;;  %2720 = vmatpush1.bf16.msra.mxu1 %v6081_v21 }
 0x521   :  { %2680 = vmatprep.subr.bf16.mxu0 %v6084_v23  ;;  %2721 = vmatprep.subr.bf16.mxu1 %v6087_v24 }
 0x524   :  { %v4327_v2 = vpop.eup %4326  ;;  %2681 = vmatpush1.bf16.msra.mxu0 %v6090_v60  ;;  %2722 = vmatpush1.bf16.msra.mxu1 %v6093_v4 }
 0x525   :  { %2682 = vmatprep.subr.bf16.mxu0 %v6096_v63  ;;  %2723 = vmatprep.subr.bf16.mxu1 %v6099_v42  ;;  %v2584_v53 = vmul.f32 %v4327_v2, %v4325_v12  ;;  %v7536_v12 = vld [vmem:[#allocation82_spill] sm:$0xff]  ;;  %v7537_v2 = vld [vmem:[#allocation48_spill] sm:$0xff] }
 0x527   :  { %v2585_v17 = vpack.c.bf16 %v2584_v53, %v2584_v53  ;;  %v7538_v53 = vld [vmem:[#allocation49_spill] sm:$0xff] }
 0x528   :  { %2683 = vmatpush1.bf16.msra.mxu0 %v6102_v48  ;;  %2724 = vmatpush1.bf16.msra.mxu1 %v6105_v49 }
 0x529   :  { %2788 = vmatprep.subr.bf16.mxu0 %v5875_v22  ;;  %2829 = vmatprep.subr.bf16.mxu1 %v5878_v28  ;;  %v7516_v22 = vld [vmem:[#allocation26_spill] sm:$0xff]  ;;  %v7517_v28 = vld [vmem:[#allocation27_spill] sm:$0xff] }
 0x52b   :  { %2701 = vmatmul.mubr.bf16.vlgmr.msra.gmra.mrb[60].mxu0 %v2585_v17  ;;  %2742 = vmatmul.mubr.bf16.vlgmr.msra.gmra.mrb[60].mxu1 %v2585_v17 }
 0x52c   :  { %2789 = vmatpush1.bf16.msra.mxu0 %v5883_v58  ;;  %2830 = vmatpush1.bf16.msra.mxu1 %v5886_v5  ;;  %v7519_v58 = vld [vmem:[#allocation29_spill] sm:$0xff]  ;;  %v7520_v5 = vld [vmem:[#allocation30_spill] sm:$0xff] }
 0x52d   :  { %2790 = vmatprep.subr.bf16.mxu0 %v5889_v25  ;;  %2831 = vmatprep.subr.bf16.mxu1 %v7513_v9  ;;  %v7521_v25 = vld [vmem:[#allocation31_spill] sm:$0xff]  ;;  %v7539_v9 = vld [vmem:[#allocation50_spill] sm:$0xff] }
 0x52e   :  { %2820 = vmatprep.mubr.bf16.mxu0 %v7310_v61  ;;  %2861 = vmatprep.mubr.bf16.mxu1 %v7310_v61 }
 0x530   :  { %2791 = vmatpush1.bf16.msra.mxu0 %v7514_v52  ;;  %2832 = vmatpush1.bf16.msra.mxu1 %v7515_v54  ;;  %v7540_v52 = vld [vmem:[#allocation51_spill] sm:$0xff]  ;;  %v7541_v54 = vld [vmem:[#allocation52_spill] sm:$0xff] }
 0x531   :  { %2792 = vmatprep.subr.bf16.mxu0 %v7516_v22  ;;  %2833 = vmatprep.subr.bf16.mxu1 %v7517_v28  ;;  %v7542_v22 = vld [vmem:[#allocation53_spill] sm:$0xff]  ;;  %v7543_v28 = vld [vmem:[#allocation54_spill] sm:$0xff] }
 0x534   :  { %2793 = vmatpush1.bf16.msra.mxu0 %v7518_v35  ;;  %2834 = vmatpush1.bf16.msra.mxu1 %v7519_v58  ;;  %v7544_v35 = vld [vmem:[#allocation55_spill] sm:$0xff]  ;;  %v7545_v58 = vld [vmem:[#allocation56_spill] sm:$0xff] }
 0x535   :  { %2794 = vmatprep.subr.bf16.mxu0 %v7520_v5  ;;  %2835 = vmatprep.subr.bf16.mxu1 %v7521_v25  ;;  %v7546_v5 = vld [vmem:[#allocation57_spill] sm:$0xff]  ;;  %v7547_v25 = vld [vmem:[#allocation58_spill] sm:$0xff] }
 0x538   :  { %2795 = vmatpush1.bf16.msra.mxu0 %v7522_v56  ;;  %2836 = vmatpush1.bf16.msra.mxu1 %v7523_v1  ;;  %v7548_v56 = vld [vmem:[#allocation59_spill] sm:$0xff]  ;;  %v7549_v1 = vld [vmem:[#allocation60_spill] sm:$0xff] }
 0x539   :  { %2796 = vmatprep.subr.bf16.mxu0 %v7524_v55  ;;  %2837 = vmatprep.subr.bf16.mxu1 %v7525_v32  ;;  %v7551_v55 = vld [vmem:[#allocation62_spill] sm:$0xff]  ;;  %v7552_v32 = vld [vmem:[#allocation63_spill] sm:$0xff] }
 0x53c   :  { %2797 = vmatpush1.bf16.msra.mxu0 %v7526_v44  ;;  %2838 = vmatpush1.bf16.msra.mxu1 %v7527_v59  ;;  %v7553_v44 = vld [vmem:[#allocation64_spill] sm:$0xff]  ;;  %v7554_v59 = vld [vmem:[#allocation65_spill] sm:$0xff] }
 0x53d   :  { %2798 = vmatprep.subr.bf16.mxu0 %v7528_v27  ;;  %2839 = vmatprep.subr.bf16.mxu1 %v7529_v43  ;;  %v7555_v27 = vld [vmem:[#allocation66_spill] sm:$0xff]  ;;  %v7556_v43 = vld [vmem:[#allocation67_spill] sm:$0xff] }
 0x540   :  { %2799 = vmatpush1.bf16.msra.mxu0 %v7530_v3  ;;  %2840 = vmatpush1.bf16.msra.mxu1 %v7531_v45  ;;  %v7557_v3 = vld [vmem:[#allocation68_spill] sm:$0xff]  ;;  %v7558_v45 = vld [vmem:[#allocation69_spill] sm:$0xff] }
 0x541   :  { %2800 = vmatprep.subr.bf16.mxu0 %v7532_v50  ;;  %2841 = vmatprep.subr.bf16.mxu1 %v7533_v26 }
 0x544   :  { %2801 = vmatpush1.bf16.msra.mxu0 %v7534_v31  ;;  %2842 = vmatpush1.bf16.msra.mxu1 %v7535_v0 }
 0x545   :  { %2802 = vmatprep.subr.bf16.mxu0 %v7536_v12  ;;  %2843 = vmatprep.subr.bf16.mxu1 %v7537_v2 }
 0x548   :  { %2803 = vmatpush1.bf16.msra.mxu0 %v7538_v53  ;;  %2844 = vmatpush1.bf16.msra.mxu1 %v7539_v9 }
 0x549   :  { %2899 = vmatprep.subr.bf16.mxu0 %v7540_v52  ;;  %2940 = vmatprep.subr.bf16.mxu1 %v7541_v54 }
 0x54b   :  { %2821 = vmatmul.mubr.bf16.vlgmr.msra.gmra.mrb[64].mxu0 %v2585_v17  ;;  %2862 = vmatmul.mubr.bf16.vlgmr.msra.gmra.mrb[64].mxu1 %v2585_v17  ;;  %v7550_v17 = vld [vmem:[#allocation61_spill] sm:$0xff] }
 0x54c   :  { %2900 = vmatpush1.bf16.msra.mxu0 %v7542_v22  ;;  %2941 = vmatpush1.bf16.msra.mxu1 %v7543_v28 }
 0x54d   :  { %2901 = vmatprep.subr.bf16.mxu0 %v7544_v35  ;;  %2942 = vmatprep.subr.bf16.mxu1 %v7545_v58 }
 0x54e   :  { %2931 = vmatprep.mubr.bf16.mxu0 %v7310_v61  ;;  %2972 = vmatprep.mubr.bf16.mxu1 %v7310_v61 }
 0x550   :  { %2902 = vmatpush1.bf16.msra.mxu0 %v7546_v5  ;;  %2943 = vmatpush1.bf16.msra.mxu1 %v7547_v25 }
 0x551   :  { %2903 = vmatprep.subr.bf16.mxu0 %v7548_v56  ;;  %2944 = vmatprep.subr.bf16.mxu1 %v7549_v1  ;;  %v7559_v56 = vld [vmem:[#allocation70_spill] sm:$0xff]  ;;  %v7560_v1 = vld [vmem:[#allocation71_spill] sm:$0xff] }
 0x554   :  { %2904 = vmatpush1.bf16.msra.mxu0 %v7550_v17  ;;  %2945 = vmatpush1.bf16.msra.mxu1 %v7551_v55  ;;  %v7561_v17 = vld [vmem:[#allocation72_spill] sm:$0xff]  ;;  %v7562_v55 = vld [vmem:[#allocation73_spill] sm:$0xff] }
 0x555   :  { %2905 = vmatprep.subr.bf16.mxu0 %v7552_v32  ;;  %2946 = vmatprep.subr.bf16.mxu1 %v7553_v44  ;;  %v7563_v32 = vld [vmem:[#allocation74_spill] sm:$0xff]  ;;  %v7564_v44 = vld [vmem:[#allocation75_spill] sm:$0xff] }
 0x558   :  { %2906 = vmatpush1.bf16.msra.mxu0 %v7554_v59  ;;  %2947 = vmatpush1.bf16.msra.mxu1 %v7555_v27  ;;  %v7565_v59 = vld [vmem:[#allocation76_spill] sm:$0xff]  ;;  %v7566_v27 = vld [vmem:[#allocation77_spill] sm:$0xff] }
 0x559   :  { %2907 = vmatprep.subr.bf16.mxu0 %v7556_v43  ;;  %2948 = vmatprep.subr.bf16.mxu1 %v7557_v3  ;;  %v7567_v43 = vld [vmem:[#allocation42_spill] sm:$0xff]  ;;  %v7568_v3 = vld [vmem:[#allocation43_spill] sm:$0xff] }
 0x55c   :  { %2908 = vmatpush1.bf16.msra.mxu0 %v7558_v45  ;;  %2949 = vmatpush1.bf16.msra.mxu1 %v7559_v56  ;;  %v7569_v45 = vld [vmem:[#allocation44_spill] sm:$0xff]  ;;  %v7570_v56 = vld [vmem:[#allocation45_spill] sm:$0xff] }
 0x55d   :  { %2909 = vmatprep.subr.bf16.mxu0 %v7560_v1  ;;  %2950 = vmatprep.subr.bf16.mxu1 %v7561_v17  ;;  %v7571_v1 = vld [vmem:[#allocation46_spill] sm:$0xff]  ;;  %v7572_v17 = vld [vmem:[#allocation47_spill] sm:$0xff] }
 0x560   :  { %2910 = vmatpush1.bf16.msra.mxu0 %v7562_v55  ;;  %2951 = vmatpush1.bf16.msra.mxu1 %v7563_v32  ;;  %v7573_v55 = vld [vmem:[#allocation22_spill] sm:$0xff] }
 0x561   :  { %2911 = vmatprep.subr.bf16.mxu0 %v7564_v44  ;;  %2952 = vmatprep.subr.bf16.mxu1 %v7565_v59 }
 0x564   :  { %2912 = vmatpush1.bf16.msra.mxu0 %v7566_v27  ;;  %2953 = vmatpush1.bf16.msra.mxu1 %v7567_v43 }
 0x565   :  { %2913 = vmatprep.subr.bf16.mxu0 %v7568_v3  ;;  %2954 = vmatprep.subr.bf16.mxu1 %v7569_v45 }
 0x568   :  { %2914 = vmatpush1.bf16.msra.mxu0 %v7570_v56  ;;  %2955 = vmatpush1.bf16.msra.mxu1 %v7571_v1 }
 0x569   :  { %2981 = vmatprep.subr.bf16.mxu0 %v7572_v17  ;;  %3022 = vmatprep.subr.bf16.mxu1 %v7573_v55 }
 0x5de   :  { %v2620_v32 = vpop.f32.mrb[56].mxu0  ;;  %v2661_v44 = vpop.f32.mrb[56].mxu1 }
 0x5df   :  { %v2622_v25 = vpop.f32.mrb[57].mxu0  ;;  %v2663_v59 = vpop.f32.mrb[57].mxu1 }
 0x5e0   :  { %v2624_v5 = vpop.f32.mrb[58].mxu0  ;;  %v2665_v27 = vpop.f32.mrb[58].mxu1 }
 0x5e1   :  { %v2625_v58 = vpop.f32.mrb[59].mxu0  ;;  %v2666_v43 = vpop.f32.mrb[59].mxu1 }
 0x5fe   :  { %v2702_v35 = vpop.f32.mrb[60].mxu0  ;;  %v2743_v3 = vpop.f32.mrb[60].mxu1 }
 0x5ff   :  { %v2703_v28 = vadd.f32 %v2702_v35, %v2620_v32  ;;  %v2744_v45 = vadd.f32 %v2743_v3, %v2661_v44  ;;  %v2704_v22 = vpop.f32.mrb[61].mxu0  ;;  %v2745_v56 = vpop.f32.mrb[61].mxu1  ;;  %v7575_v3 = vld [vmem:[#allocation92_spill] sm:$0xff] }
 0x600   :  { %v2705_v54 = vadd.f32 %v2704_v22, %v2622_v25  ;;  %v2746_v1 = vadd.f32 %v2745_v56, %v2663_v59  ;;  %v2706_v52 = vpop.f32.mrb[62].mxu0  ;;  %v2747_v17 = vpop.f32.mrb[62].mxu1  ;;  %v7574_v59 = vld [vmem:[#allocation91_spill] sm:$0xff] }
 0x601   :  { %v2750_v55 = vadd.f32 %v2703_v28, %v5806_v57  ;;  %v2707_v9 = vpop.f32.mrb[63].mxu0  ;;  %v2748_v53 = vpop.f32.mrb[63].mxu1  ;;  %v2752_v32 = vadd.f32 %v2744_v45, %v7459_v62 }
 0x602   :  { %v2751_v2 = vadd.f32 %v2705_v54, %v5810_v40  ;;  %v2753_v58 = vadd.f32 %v2746_v1, %v5816_v7 }
 0x603   :  { %v4175_v5 = vmul.f32 -1.442695, %v2750_v55 }
 0x604   :  { %v4176_v27 = vmul.f32 -1.442695, %v2751_v2  ;;  %v4177_v35 = vmul.f32 -1.442695, %v2753_v58 }
 0x605   :  { %4328 = vpow2.f32 %v4175_v5 }
 0x606   :  { %4330 = vpow2.f32 %v4176_v27 }
 0x607   :  { %4332 = vpow2.f32 %v4177_v35  ;;  %v7576_v35 = vld [vmem:[#allocation93_spill] sm:$0xff] }
 0x608   :  { %4334 = vtanh.f32 %v2752_v32 }
 0x60f   :  { %v4329_v44 = vpop.eup %4328 }
 0x610   :  { %v4331_v22 = vpop.eup %4330  ;;  %v2757_v25 = vadd.f32 1.0, %v4329_v44  ;;  %v7577_v44 = vld [vmem:[#allocation94_spill] sm:$0xff] }
 0x611   :  { %v2763_v52 = vadd.f32 1.0, %v4331_v22  ;;  %v4333_v53 = vpop.eup %4332 }
 0x612   :  { %4336 = vrcp.f32 %v2757_v25  ;;  %v4335_v9 = vpop.eup %4334  ;;  %v2770_v56 = vadd.f32 1.0, %v4333_v53 }
 0x613   :  { %4338 = vrcp.f32 %v2763_v52 }
 0x614   :  { %4340 = vrcp.f32 %v2770_v56 }
 0x61c   :  { %v4337_v54 = vpop.eup %4336 }
 0x61d   :  { %v4339_v28 = vpop.eup %4338  ;;  %v2774_v2 = vmul.f32 %v4337_v54, %v4335_v9 }
 0x61e   :  { %v2773_v17 = vmul.f32 %v4339_v28, %v6269_v11  ;;  %v2822_v1 = vpop.f32.mrb[64].mxu0  ;;  %v2863_v55 = vpop.f32.mrb[64].mxu1 }
 0x61f   :  { %v2870_v43 = vadd.f32 %v2822_v1, %v7574_v59  ;;  %v2872_v45 = vadd.f32 %v2863_v55, %v7575_v3  ;;  %v2824_v5 = vpop.f32.mrb[65].mxu0  ;;  %v2865_v27 = vpop.f32.mrb[65].mxu1 }
 0x620   :  { %v6390_v58 = vadd.f32 %v2774_v2, %v2773_v17  ;;  %v2871_v32 = vadd.f32 %v2824_v5, %v7576_v35  ;;  %v2873_v22 = vadd.f32 %v2865_v27, %v7577_v44  ;;  %v2826_v25 = vpop.f32.mrb[66].mxu0  ;;  %v2867_v52 = vpop.f32.mrb[66].mxu1  ;;  %v6506_v35 = vld [vmem:[#allocation4 + $0xa0] sm:$0xff]  ;;  %v7596_v44 = vld [vmem:[#allocation48_spill] sm:$0xff] }
 0x621   :  { %v4179_v53 = vmul.f32 -1.442695, %v2870_v43  ;;  %v2827_v9 = vpop.f32.mrb[67].mxu0  ;;  %v2868_v11 = vpop.f32.mrb[67].mxu1  ;;  %7594 = vst [vmem:[#allocation31_spill] sm:$0xff] %v6506_v35  ;;  %v7598_v25 = vld [vmem:[#allocation50_spill] sm:$0xff] }
 0x622   :  { %v4180_v54 = vmul.f32 -1.442695, %v2871_v32  ;;  %4342 = vtanh.f32 %v6390_v58  ;;  %v4181_v28 = vmul.f32 -1.442695, %v2873_v22  ;;  %v4341_v1 = vpop.eup %4340  ;;  %v6509_v32 = vld [vmem:[#allocation4 + $0xb0] sm:$0xff]  ;;  %v7597_v22 = vld [vmem:[#allocation49_spill] sm:$0xff] }
 0x623   :  { %4344 = vpow2.f32 %v4179_v53  ;;  %7595 = vst [vmem:[#allocation32_spill] sm:$0xff] %v6509_v32  ;;  %v7599_v52 = vld [vmem:[#allocation51_spill] sm:$0xff]  ;;  %v7600_v53 = vld [vmem:[#allocation52_spill] sm:$0xff]  ;;  %v7606_v9 = vld [vmem:[#allocation58_spill] sm:$0xff] }
 0x624   :  { %4346 = vpow2.f32 %v4180_v54  ;;  %v7607_v11 = vld [vmem:[#allocation59_spill] sm:$0xff]  ;;  %v7608_v54 = vld [vmem:[#allocation60_spill] sm:$0xff] }
 0x625   :  { %4348 = vpow2.f32 %v4181_v28  ;;  %v7609_v28 = vld [vmem:[#allocation61_spill] sm:$0xff] }
 0x626   :  { %4350 = vtanh.f32 %v2872_v45  ;;  %v6503_v45 = vld [vmem:[#allocation4 + $0xb8] sm:$0xff] }
 0x627   :  { %7593 = vst [vmem:[#allocation30_spill] sm:$0xff] %v6503_v45 }
 0x62c   :  { %v4343_v55 = vpop.eup %4342 }
 0x62d   :  { %v4345_v2 = vpop.eup %4344  ;;  %v2777_v17 = vmul.f32 %v4343_v55, %v4341_v1  ;;  %v7610_v1 = vld [vmem:[#allocation62_spill] sm:$0xff]  ;;  %v7611_v55 = vld [vmem:[#allocation63_spill] sm:$0xff] }
 0x62e   :  { %v4347_v59 = vpop.eup %4346  ;;  %v2877_v3 = vadd.f32 1.0, %v4345_v2  ;;  %v7612_v2 = vld [vmem:[#allocation64_spill] sm:$0xff] }
 0x62f   :  { %v2883_v5 = vadd.f32 1.0, %v4347_v59  ;;  %v2778_v27 = vpack.c.bf16 %v2777_v17, %v2777_v17  ;;  %v4349_v56 = vpop.eup %4348  ;;  %v7613_v17 = vld [vmem:[#allocation65_spill] sm:$0xff]  ;;  %v7614_v59 = vld [vmem:[#allocation66_spill] sm:$0xff] }
 0x630   :  { %4352 = vrcp.f32 %v2877_v3  ;;  %v7615_v3 = vld [vmem:[#allocation67_spill] sm:$0xff] }
 0x631   :  { %4354 = vrcp.f32 %v2883_v5  ;;  %4178 = vst [vmem:[%s7018_s7 + $0xc] sm:$0xf] %v2778_v27  ;;  %2932 = vmatmul.mubr.bf16.vlgmr.msra.gmra.mrb[68].mxu0 %v2778_v27  ;;  %2973 = vmatmul.mubr.bf16.vlgmr.msra.gmra.mrb[68].mxu1 %v2778_v27  ;;  %v7616_v5 = vld [vmem:[#allocation68_spill] sm:$0xff]  ;;  %v7617_v27 = vld [vmem:[#allocation69_spill] sm:$0xff] }
 0x632   :  { %2982 = vmatpush1.bf16.msra.mxu0 %v6012_v29  ;;  %3023 = vmatpush1.bf16.msra.mxu1 %v6015_v33  ;;  %v4351_v29 = vpop.eup %4350 }
 0x633   :  { %2983 = vmatprep.subr.bf16.mxu0 %v6018_v34  ;;  %3024 = vmatprep.subr.bf16.mxu1 %v6021_v36  ;;  %v2890_v36 = vadd.f32 1.0, %v4349_v56  ;;  %v7618_v56 = vld [vmem:[#allocation70_spill] sm:$0xff] }
 0x634   :  { %3013 = vmatprep.mubr.bf16.mxu0 %v7310_v61  ;;  %3054 = vmatprep.mubr.bf16.mxu1 %v7310_v61 }
 0x635   :  { %4356 = vrcp.f32 %v2890_v36  ;;  %v7623_v36 = vld [vmem:[#allocation75_spill] sm:$0xff] }
 0x636   :  { %2984 = vmatpush1.bf16.msra.mxu0 %v6026_v37  ;;  %3025 = vmatpush1.bf16.msra.mxu1 %v6029_v38 }
 0x637   :  { %2985 = vmatprep.subr.bf16.mxu0 %v6032_v39  ;;  %3026 = vmatprep.subr.bf16.mxu1 %v6035_v41 }
 0x63a   :  { %v4353_v43 = vpop.eup %4352  ;;  %2986 = vmatpush1.bf16.msra.mxu0 %v6038_v46  ;;  %3027 = vmatpush1.bf16.msra.mxu1 %v6041_v47 }
 0x63b   :  { %v4355_v33 = vpop.eup %4354  ;;  %v2894_v34 = vmul.f32 %v4353_v43, %v4351_v29  ;;  %2987 = vmatprep.subr.bf16.mxu0 %v6044_v51  ;;  %3028 = vmatprep.subr.bf16.mxu1 %v6047_v10  ;;  %v6436_v51 = vld [vmem:[#allocation4 + $0x8] sm:$0xff]  ;;  %v6439_v10 = vld [vmem:[#allocation4 + $0x18] sm:$0xff]  ;;  %v7619_v29 = vld [vmem:[#allocation71_spill] sm:$0xff] }
 0x63c   :  { %v2893_v37 = vmul.f32 %v4355_v33, %v6292_v6  ;;  %v6500_v6 = vld [vmem:[#allocation4 + $0xa8] sm:$0xff]  ;;  %v7620_v43 = vld [vmem:[#allocation72_spill] sm:$0xff]  ;;  %v7621_v33 = vld [vmem:[#allocation73_spill] sm:$0xff] }
 0x63d   :  { %7592 = vst [vmem:[#allocation29_spill] sm:$0xff] %v6500_v6 }
 0x63e   :  { %v6413_v38 = vadd.f32 %v2894_v34, %v2893_v37  ;;  %2988 = vmatpush1.bf16.msra.mxu0 %v6053_v13  ;;  %3029 = vmatpush1.bf16.msra.mxu1 %v6056_v14  ;;  %v6444_v13 = vld [vmem:[#allocation4] sm:$0xff]  ;;  %v6447_v14 = vld [vmem:[#allocation4 + $0x10] sm:$0xff]  ;;  %v7622_v34 = vld [vmem:[#allocation74_spill] sm:$0xff] }
 0x63f   :  { %2989 = vmatprep.subr.bf16.mxu0 %v6059_v15  ;;  %3030 = vmatprep.subr.bf16.mxu1 %v6062_v16  ;;  %v4357_v39 = vpop.eup %4356  ;;  %v6450_v15 = vld [vmem:[#allocation4 + $0x28] sm:$0xff]  ;;  %v6453_v16 = vld [vmem:[#allocation4 + $0x38] sm:$0xff] }
 0x640   :  { %4358 = vtanh.f32 %v6413_v38  ;;  %v7624_v37 = vld [vmem:[#allocation76_spill] sm:$0xff] }
 0x642   :  { %2990 = vmatpush1.bf16.msra.mxu0 %v6066_v8  ;;  %3031 = vmatpush1.bf16.msra.mxu1 %v6069_v18  ;;  %v6458_v8 = vld [vmem:[#allocation4 + $0x20] sm:$0xff]  ;;  %v6461_v18 = vld [vmem:[#allocation4 + $0x30] sm:$0xff] }
 0x643   :  { %2991 = vmatprep.subr.bf16.mxu0 %v6072_v30  ;;  %3032 = vmatprep.subr.bf16.mxu1 %v6075_v19  ;;  %7578 = vst [vmem:[#allocation83_spill] sm:$0xff] %v6458_v8  ;;  %7579 = vst [vmem:[#allocation84_spill] sm:$0xff] %v6461_v18  ;;  %v6464_v30 = vld [vmem:[#allocation4 + $0x48] sm:$0xff]  ;;  %v6467_v19 = vld [vmem:[#allocation4 + $0x58] sm:$0xff] }
 0x644   :  { %7580 = vst [vmem:[#allocation85_spill] sm:$0xff] %v6464_v30  ;;  %7581 = vst [vmem:[#allocation86_spill] sm:$0xff] %v6467_v19 }
 0x646   :  { %2992 = vmatpush1.bf16.msra.mxu0 %v6078_v20  ;;  %3033 = vmatpush1.bf16.msra.mxu1 %v6081_v21  ;;  %v6470_v20 = vld [vmem:[#allocation4 + $0x40] sm:$0xff]  ;;  %v6473_v21 = vld [vmem:[#allocation4 + $0x50] sm:$0xff] }
 0x647   :  { %2993 = vmatprep.subr.bf16.mxu0 %v6084_v23  ;;  %3034 = vmatprep.subr.bf16.mxu1 %v6087_v24  ;;  %7582 = vst [vmem:[#allocation87_spill] sm:$0xff] %v6470_v20  ;;  %7583 = vst [vmem:[#allocation88_spill] sm:$0xff] %v6473_v21  ;;  %v6476_v23 = vld [vmem:[#allocation4 + $0x68] sm:$0xff]  ;;  %v6479_v24 = vld [vmem:[#allocation4 + $0x78] sm:$0xff] }
 0x648   :  { %7584 = vst [vmem:[#allocation89_spill] sm:$0xff] %v6476_v23  ;;  %7585 = vst [vmem:[#allocation90_spill] sm:$0xff] %v6479_v24 }
 0x64a   :  { %v4359_v41 = vpop.eup %4358  ;;  %2994 = vmatpush1.bf16.msra.mxu0 %v6090_v60  ;;  %3035 = vmatpush1.bf16.msra.mxu1 %v6093_v4  ;;  %v6482_v60 = vld [vmem:[#allocation4 + $0x60] sm:$0xff]  ;;  %v6485_v4 = vld [vmem:[#allocation4 + $0x70] sm:$0xff] }
 0x64b   :  { %2995 = vmatprep.subr.bf16.mxu0 %v6096_v63  ;;  %3036 = vmatprep.subr.bf16.mxu1 %v6099_v42  ;;  %v2897_v46 = vmul.f32 %v4359_v41, %v4357_v39  ;;  %7586 = vst [vmem:[#allocation23_spill] sm:$0xff] %v6482_v60  ;;  %7587 = vst [vmem:[#allocation24_spill] sm:$0xff] %v6485_v4  ;;  %v6488_v63 = vld [vmem:[#allocation4 + $0x88] sm:$0xff]  ;;  %v6491_v42 = vld [vmem:[#allocation4 + $0x98] sm:$0xff] }
 0x64c   :  { %7588 = vst [vmem:[#allocation25_spill] sm:$0xff] %v6488_v63  ;;  %7589 = vst [vmem:[#allocation26_spill] sm:$0xff] %v6491_v42  ;;  %v7625_v39 = vld [vmem:[#allocation77_spill] sm:$0xff]  ;;  %v7626_v41 = vld [vmem:[#allocation42_spill] sm:$0xff] }
 0x64d   :  { %v6432_v47 = vpack.c.bf16 %v2897_v46, %v2897_v46  ;;  %v7627_v46 = vld [vmem:[#allocation43_spill] sm:$0xff] }
 0x64e   :  { %2996 = vmatpush1.bf16.msra.mxu0 %v6102_v48  ;;  %3037 = vmatpush1.bf16.msra.mxu1 %v6105_v49  ;;  %v6494_v48 = vld [vmem:[#allocation4 + $0x80] sm:$0xff]  ;;  %v6497_v49 = vld [vmem:[#allocation4 + $0x90] sm:$0xff] }
 0x64f   :  { %3101 = vmatprep.subr.bf16.mxu0 %v6436_v51  ;;  %3142 = vmatprep.subr.bf16.mxu1 %v6439_v10  ;;  %7590 = vst [vmem:[#allocation27_spill] sm:$0xff] %v6494_v48  ;;  %7591 = vst [vmem:[#allocation28_spill] sm:$0xff] %v6497_v49 }
 0x651   :  { %3014 = vmatmul.mubr.bf16.vlgmr.msra.gmra.mrb[72].mxu0 %v6432_v47  ;;  %3055 = vmatmul.mubr.bf16.vlgmr.msra.gmra.mrb[72].mxu1 %v6432_v47 }
 0x652   :  { %3102 = vmatpush1.bf16.msra.mxu0 %v6444_v13  ;;  %3143 = vmatpush1.bf16.msra.mxu1 %v6447_v14 }
 0x653   :  { %3103 = vmatprep.subr.bf16.mxu0 %v6450_v15  ;;  %3144 = vmatprep.subr.bf16.mxu1 %v6453_v16 }
 0x654   :  { %3133 = vmatprep.mubr.bf16.mxu0 %v7310_v61  ;;  %3174 = vmatprep.mubr.bf16.mxu1 %v7310_v61 }
 0x656   :  { %3104 = vmatpush1.bf16.msra.mxu0 %v6458_v8  ;;  %3145 = vmatpush1.bf16.msra.mxu1 %v6461_v18 }
 0x657   :  { %3105 = vmatprep.subr.bf16.mxu0 %v6464_v30  ;;  %3146 = vmatprep.subr.bf16.mxu1 %v6467_v19 }
 0x65a   :  { %3106 = vmatpush1.bf16.msra.mxu0 %v6470_v20  ;;  %3147 = vmatpush1.bf16.msra.mxu1 %v6473_v21 }
 0x65b   :  { %3107 = vmatprep.subr.bf16.mxu0 %v6476_v23  ;;  %3148 = vmatprep.subr.bf16.mxu1 %v6479_v24 }
 0x65e   :  { %3108 = vmatpush1.bf16.msra.mxu0 %v6482_v60  ;;  %3149 = vmatpush1.bf16.msra.mxu1 %v6485_v4 }
 0x65f   :  { %3109 = vmatprep.subr.bf16.mxu0 %v6488_v63  ;;  %3150 = vmatprep.subr.bf16.mxu1 %v6491_v42 }
 0x662   :  { %3110 = vmatpush1.bf16.msra.mxu0 %v6494_v48  ;;  %3151 = vmatpush1.bf16.msra.mxu1 %v6497_v49 }
 0x663   :  { %3111 = vmatprep.subr.bf16.mxu0 %v6500_v6  ;;  %3152 = vmatprep.subr.bf16.mxu1 %v6503_v45 }
 0x666   :  { %3112 = vmatpush1.bf16.msra.mxu0 %v6506_v35  ;;  %3153 = vmatpush1.bf16.msra.mxu1 %v6509_v32 }
 0x667   :  { %3113 = vmatprep.subr.bf16.mxu0 %v7532_v50  ;;  %3154 = vmatprep.subr.bf16.mxu1 %v7533_v26  ;;  %v7601_v50 = vld [vmem:[#allocation53_spill] sm:$0xff]  ;;  %v7602_v26 = vld [vmem:[#allocation54_spill] sm:$0xff] }
 0x66a   :  { %3114 = vmatpush1.bf16.msra.mxu0 %v7534_v31  ;;  %3155 = vmatpush1.bf16.msra.mxu1 %v7535_v0  ;;  %v7603_v31 = vld [vmem:[#allocation55_spill] sm:$0xff]  ;;  %v7604_v0 = vld [vmem:[#allocation56_spill] sm:$0xff] }
 0x66b   :  { %3115 = vmatprep.subr.bf16.mxu0 %v7536_v12  ;;  %3156 = vmatprep.subr.bf16.mxu1 %v7596_v44  ;;  %v7605_v12 = vld [vmem:[#allocation57_spill] sm:$0xff] }
 0x66c   :  { %v7629_v44 = vld [vmem:[#allocation45_spill] sm:$0xff] }
 0x66e   :  { %3116 = vmatpush1.bf16.msra.mxu0 %v7597_v22  ;;  %3157 = vmatpush1.bf16.msra.mxu1 %v7598_v25  ;;  %v7630_v22 = vld [vmem:[#allocation46_spill] sm:$0xff]  ;;  %v7631_v25 = vld [vmem:[#allocation47_spill] sm:$0xff] }
 0x66f   :  { %3212 = vmatprep.subr.bf16.mxu0 %v7599_v52  ;;  %3253 = vmatprep.subr.bf16.mxu1 %v7600_v53  ;;  %v7632_v52 = vld [vmem:[#allocation22_spill] sm:$0xff] }
 0x671   :  { %3134 = vmatmul.mubr.bf16.vlgmr.msra.gmra.mrb[76].mxu0 %v6432_v47  ;;  %3175 = vmatmul.mubr.bf16.vlgmr.msra.gmra.mrb[76].mxu1 %v6432_v47  ;;  %v7628_v47 = vld [vmem:[#allocation44_spill] sm:$0xff] }
 0x672   :  { %3213 = vmatpush1.bf16.msra.mxu0 %v7601_v50  ;;  %3254 = vmatpush1.bf16.msra.mxu1 %v7602_v26 }
 0x673   :  { %3214 = vmatprep.subr.bf16.mxu0 %v7603_v31  ;;  %3255 = vmatprep.subr.bf16.mxu1 %v7604_v0 }
 0x674   :  { %3244 = vmatprep.mubr.bf16.mxu0 %v7310_v61  ;;  %3285 = vmatprep.mubr.bf16.mxu1 %v7310_v61 }
 0x676   :  { %3215 = vmatpush1.bf16.msra.mxu0 %v7605_v12  ;;  %3256 = vmatpush1.bf16.msra.mxu1 %v7606_v9 }
 0x677   :  { %3216 = vmatprep.subr.bf16.mxu0 %v7607_v11  ;;  %3257 = vmatprep.subr.bf16.mxu1 %v7608_v54 }
 0x67a   :  { %3217 = vmatpush1.bf16.msra.mxu0 %v7609_v28  ;;  %3258 = vmatpush1.bf16.msra.mxu1 %v7610_v1 }
 0x67b   :  { %3218 = vmatprep.subr.bf16.mxu0 %v7611_v55  ;;  %3259 = vmatprep.subr.bf16.mxu1 %v7612_v2 }
 0x67e   :  { %3219 = vmatpush1.bf16.msra.mxu0 %v7613_v17  ;;  %3260 = vmatpush1.bf16.msra.mxu1 %v7614_v59 }
 0x67f   :  { %3220 = vmatprep.subr.bf16.mxu0 %v7615_v3  ;;  %3261 = vmatprep.subr.bf16.mxu1 %v7616_v5 }
 0x682   :  { %3221 = vmatpush1.bf16.msra.mxu0 %v7617_v27  ;;  %3262 = vmatpush1.bf16.msra.mxu1 %v7618_v56 }
 0x683   :  { %3222 = vmatprep.subr.bf16.mxu0 %v7619_v29  ;;  %3263 = vmatprep.subr.bf16.mxu1 %v7620_v43 }
 0x686   :  { %3223 = vmatpush1.bf16.msra.mxu0 %v7621_v33  ;;  %3264 = vmatpush1.bf16.msra.mxu1 %v7622_v34 }
 0x687   :  { %3224 = vmatprep.subr.bf16.mxu0 %v7623_v36  ;;  %3265 = vmatprep.subr.bf16.mxu1 %v7624_v37 }
 0x68a   :  { %3225 = vmatpush1.bf16.msra.mxu0 %v7625_v39  ;;  %3266 = vmatpush1.bf16.msra.mxu1 %v7626_v41 }
 0x68b   :  { %3226 = vmatprep.subr.bf16.mxu0 %v7627_v46  ;;  %3267 = vmatprep.subr.bf16.mxu1 %v7628_v47 }
 0x68e   :  { %3227 = vmatpush1.bf16.msra.mxu0 %v7629_v44  ;;  %3268 = vmatpush1.bf16.msra.mxu1 %v7630_v22 }
 0x68f   :  { %3294 = vmatprep.subr.bf16.mxu0 %v7631_v25  ;;  %3335 = vmatprep.subr.bf16.mxu1 %v7632_v52 }
 0x704   :  { %v2933_v53 = vpop.f32.mrb[68].mxu0  ;;  %v2974_v50 = vpop.f32.mrb[68].mxu1 }
 0x705   :  { %v2935_v26 = vpop.f32.mrb[69].mxu0  ;;  %v2976_v31 = vpop.f32.mrb[69].mxu1 }
 0x706   :  { %v2937_v0 = vpop.f32.mrb[70].mxu0  ;;  %v2978_v12 = vpop.f32.mrb[70].mxu1 }
 0x707   :  { %v2938_v9 = vpop.f32.mrb[71].mxu0  ;;  %v2979_v11 = vpop.f32.mrb[71].mxu1 }
 0x708   :  { %v7633_v11 = vld [vmem:[#allocation95_spill] sm:$0xff] }
 0x724   :  { %v3015_v54 = vpop.f32.mrb[72].mxu0  ;;  %v3056_v28 = vpop.f32.mrb[72].mxu1 }
 0x725   :  { %v3016_v1 = vadd.f32 %v3015_v54, %v2933_v53  ;;  %v3057_v55 = vadd.f32 %v3056_v28, %v2974_v50  ;;  %v3017_v2 = vpop.f32.mrb[73].mxu0  ;;  %v3058_v17 = vpop.f32.mrb[73].mxu1  ;;  %v7634_v28 = vld [vmem:[#allocation96_spill] sm:$0xff] }
 0x726   :  { %v3018_v59 = vadd.f32 %v3017_v2, %v2935_v26  ;;  %v3059_v3 = vadd.f32 %v3058_v17, %v2976_v31  ;;  %v3019_v5 = vpop.f32.mrb[74].mxu0  ;;  %v3060_v27 = vpop.f32.mrb[74].mxu1 }
 0x727   :  { %v3063_v56 = vadd.f32 %v3016_v1, %v5806_v57  ;;  %v3020_v29 = vpop.f32.mrb[75].mxu0  ;;  %v3061_v43 = vpop.f32.mrb[75].mxu1  ;;  %v3065_v41 = vadd.f32 %v3057_v55, %v7459_v62  ;;  %v7636_v5 = vld [vmem:[#allocation98_spill] sm:$0xff] }
 0x728   :  { %v3064_v33 = vadd.f32 %v3018_v59, %v5810_v40  ;;  %v3066_v37 = vadd.f32 %v3059_v3, %v5816_v7  ;;  %v7635_v59 = vld [vmem:[#allocation97_spill] sm:$0xff] }
 0x729   :  { %v4182_v34 = vmul.f32 -1.442695, %v3063_v56 }
 0x72a   :  { %v4183_v36 = vmul.f32 -1.442695, %v3064_v33  ;;  %v4184_v39 = vmul.f32 -1.442695, %v3066_v37 }
 0x72b   :  { %4360 = vpow2.f32 %v4182_v34 }
 0x72c   :  { %4362 = vpow2.f32 %v4183_v36 }
 0x72d   :  { %4364 = vpow2.f32 %v4184_v39 }
 0x72e   :  { %4366 = vtanh.f32 %v3065_v41 }
 0x735   :  { %v4361_v46 = vpop.eup %4360 }
 0x736   :  { %v4363_v47 = vpop.eup %4362  ;;  %v3070_v44 = vadd.f32 1.0, %v4361_v46 }
 0x737   :  { %v3076_v22 = vadd.f32 1.0, %v4363_v47  ;;  %v4365_v25 = vpop.eup %4364 }
 0x738   :  { %4368 = vrcp.f32 %v3070_v44  ;;  %v4367_v52 = vpop.eup %4366  ;;  %v3083_v31 = vadd.f32 1.0, %v4365_v25 }
 0x739   :  { %4370 = vrcp.f32 %v3076_v22 }
 0x73a   :  { %4372 = vrcp.f32 %v3083_v31  ;;  %v6587_v31 = vld [vmem:[#allocation6 + $0x20] sm:$0xff] }
 0x742   :  { %v4369_v53 = vpop.eup %4368 }
 0x743   :  { %v4371_v50 = vpop.eup %4370  ;;  %v3087_v26 = vmul.f32 %v4369_v53, %v4367_v52  ;;  %v6573_v52 = vld [vmem:[#allocation6] sm:$0xff]  ;;  %v6576_v53 = vld [vmem:[#allocation6 + $0x10] sm:$0xff] }
 0x744   :  { %v3086_v0 = vmul.f32 %v4371_v50, %v6390_v58  ;;  %v3135_v12 = vpop.f32.mrb[76].mxu0  ;;  %v3176_v9 = vpop.f32.mrb[76].mxu1  ;;  %v6579_v50 = vld [vmem:[#allocation6 + $0x28] sm:$0xff] }
 0x745   :  { %v3183_v54 = vadd.f32 %v3135_v12, %v7633_v11  ;;  %v3185_v1 = vadd.f32 %v3176_v9, %v7634_v28  ;;  %v3137_v55 = vpop.f32.mrb[77].mxu0  ;;  %v3178_v2 = vpop.f32.mrb[77].mxu1  ;;  %v6593_v12 = vld [vmem:[#allocation6 + $0x48] sm:$0xff]  ;;  %v6596_v9 = vld [vmem:[#allocation6 + $0x58] sm:$0xff] }
 0x746   :  { %v6565_v17 = vadd.f32 %v3087_v26, %v3086_v0  ;;  %v3184_v3 = vadd.f32 %v3137_v55, %v7635_v59  ;;  %v3186_v27 = vadd.f32 %v3178_v2, %v7636_v5  ;;  %v3139_v56 = vpop.f32.mrb[78].mxu0  ;;  %v3180_v29 = vpop.f32.mrb[78].mxu1  ;;  %v6582_v26 = vld [vmem:[#allocation6 + $0x38] sm:$0xff]  ;;  %v6590_v0 = vld [vmem:[#allocation6 + $0x30] sm:$0xff]  ;;  %v6605_v5 = vld [vmem:[#allocation6 + $0x68] sm:$0xff] }
 0x747   :  { %v4186_v43 = vmul.f32 -1.442695, %v3183_v54  ;;  %v3140_v33 = vpop.f32.mrb[79].mxu0  ;;  %v3181_v58 = vpop.f32.mrb[79].mxu1  ;;  %v6602_v55 = vld [vmem:[#allocation6 + $0x50] sm:$0xff] }
 0x748   :  { %v4187_v34 = vmul.f32 -1.442695, %v3184_v3  ;;  %4374 = vtanh.f32 %v6565_v17  ;;  %v4188_v36 = vmul.f32 -1.442695, %v3186_v27  ;;  %v4373_v37 = vpop.eup %4372  ;;  %v6608_v27 = vld [vmem:[#allocation6 + $0x78] sm:$0xff]  ;;  %v6617_v33 = vld [vmem:[#allocation6 + $0x70] sm:$0xff] }
 0x749   :  { %4376 = vpow2.f32 %v4186_v43  ;;  %v6614_v43 = vld [vmem:[#allocation6 + $0x60] sm:$0xff]  ;;  %v6620_v58 = vld [vmem:[#allocation6 + $0x88] sm:$0xff] }
 0x74a   :  { %4378 = vpow2.f32 %v4187_v34  ;;  %v6623_v34 = vld [vmem:[#allocation6 + $0x98] sm:$0xff] }
 0x74b   :  { %4380 = vpow2.f32 %v4188_v36  ;;  %v6630_v36 = vld [vmem:[#allocation6 + $0x90] sm:$0xff] }
 0x74c   :  { %4382 = vtanh.f32 %v3185_v1  ;;  %v6599_v1 = vld [vmem:[#allocation6 + $0x40] sm:$0xff] }
 0x752   :  { %v4375_v39 = vpop.eup %4374 }
 0x753   :  { %v4377_v41 = vpop.eup %4376  ;;  %v3090_v46 = vmul.f32 %v4375_v39, %v4373_v37  ;;  %v6633_v37 = vld [vmem:[#allocation6 + $0xa8] sm:$0xff]  ;;  %v6636_v39 = vld [vmem:[#allocation6 + $0xb8] sm:$0xff] }
 0x754   :  { %v4379_v47 = vpop.eup %4378  ;;  %v3190_v44 = vadd.f32 1.0, %v4377_v41  ;;  %v6639_v41 = vld [vmem:[#allocation6 + $0xa0] sm:$0xff] }
 0x755   :  { %v3196_v22 = vadd.f32 1.0, %v4379_v47  ;;  %v3091_v25 = vpack.c.bf16 %v3090_v46, %v3090_v46  ;;  %v4381_v11 = vpop.eup %4380  ;;  %v6642_v46 = vld [vmem:[#allocation6 + $0xb0] sm:$0xff]  ;;  %v6645_v47 = vld [vmem:[#allocation6 + $0xc8] sm:$0xff] }
 0x756   :  { %4384 = vrcp.f32 %v3190_v44  ;;  %v4383_v54 = vpop.eup %4382  ;;  %v3203_v3 = vadd.f32 1.0, %v4381_v11  ;;  %v6648_v44 = vld [vmem:[#allocation6 + $0xd8] sm:$0xff]  ;;  %v6651_v11 = vld [vmem:[#allocation6 + $0xc0] sm:$0xff] }
 0x757   :  { %4386 = vrcp.f32 %v3196_v22  ;;  %4185 = vst [vmem:[%s7018_s7 + $0x10] sm:$0xf] %v3091_v25  ;;  %3245 = vmatmul.mubr.bf16.vlgmr.msra.gmra.mrb[80].mxu0 %v3091_v25  ;;  %3286 = vmatmul.mubr.bf16.vlgmr.msra.gmra.mrb[80].mxu1 %v3091_v25  ;;  %7637 = vst [vmem:[#allocation33_spill] sm:$0xff] %v6648_v44 }
 0x758   :  { %3295 = vmatpush1.bf16.msra.mxu0 %v6573_v52  ;;  %3336 = vmatpush1.bf16.msra.mxu1 %v6576_v53  ;;  %4388 = vrcp.f32 %v3203_v3 }
 0x759   :  { %3296 = vmatprep.subr.bf16.mxu0 %v6579_v50  ;;  %3337 = vmatprep.subr.bf16.mxu1 %v6582_v26 }
 0x75a   :  { %3326 = vmatprep.mubr.bf16.mxu0 %v7310_v61  ;;  %3367 = vmatprep.mubr.bf16.mxu1 %v7310_v61 }
 0x75c   :  { %3297 = vmatpush1.bf16.msra.mxu0 %v6587_v31  ;;  %3338 = vmatpush1.bf16.msra.mxu1 %v6590_v0 }
 0x75d   :  { %3298 = vmatprep.subr.bf16.mxu0 %v6593_v12  ;;  %3339 = vmatprep.subr.bf16.mxu1 %v6596_v9 }
 0x760   :  { %v4385_v28 = vpop.eup %4384  ;;  %3299 = vmatpush1.bf16.msra.mxu0 %v6599_v1  ;;  %3340 = vmatpush1.bf16.msra.mxu1 %v6602_v55 }
 0x761   :  { %v4387_v2 = vpop.eup %4386  ;;  %v3207_v59 = vmul.f32 %v4385_v28, %v4383_v54  ;;  %3300 = vmatprep.subr.bf16.mxu0 %v6605_v5  ;;  %3341 = vmatprep.subr.bf16.mxu1 %v6608_v27  ;;  %v6654_v54 = vld [vmem:[#allocation6 + $0xd0] sm:$0xff]  ;;  %v6657_v28 = vld [vmem:[#allocation6 + $0xe8] sm:$0xff] }
 0x762   :  { %v3206_v56 = vmul.f32 %v4387_v2, %v6413_v38  ;;  %v6627_v38 = vld [vmem:[#allocation6 + $0x80] sm:$0xff]  ;;  %v4389_v22 = vpop.eup %4388  ;;  %v6660_v2 = vld [vmem:[#allocation6 + $0xf8] sm:$0xff] }
 0x764   :  { %v6612_v29 = vadd.f32 %v3207_v59, %v3206_v56  ;;  %3301 = vmatpush1.bf16.msra.mxu0 %v6614_v43  ;;  %3342 = vmatpush1.bf16.msra.mxu1 %v6617_v33  ;;  %v6663_v56 = vld [vmem:[#allocation6 + $0xe0] sm:$0xff] }
 0x765   :  { %3302 = vmatprep.subr.bf16.mxu0 %v6620_v58  ;;  %3343 = vmatprep.subr.bf16.mxu1 %v6623_v34 }
 0x766   :  { %4390 = vtanh.f32 %v6612_v29 }
 0x768   :  { %3303 = vmatpush1.bf16.msra.mxu0 %v6627_v38  ;;  %3344 = vmatpush1.bf16.msra.mxu1 %v6630_v36 }
 0x769   :  { %3304 = vmatprep.subr.bf16.mxu0 %v6633_v37  ;;  %3345 = vmatprep.subr.bf16.mxu1 %v6636_v39 }
 0x76c   :  { %3305 = vmatpush1.bf16.msra.mxu0 %v6639_v41  ;;  %3346 = vmatpush1.bf16.msra.mxu1 %v6642_v46 }
 0x76d   :  { %3306 = vmatprep.subr.bf16.mxu0 %v6645_v47  ;;  %3347 = vmatprep.subr.bf16.mxu1 %v6648_v44  ;;  %v6666_v44 = vld [vmem:[#allocation6 + $0xf0] sm:$0xff] }
 0x770   :  { %v4391_v25 = vpop.eup %4390  ;;  %3307 = vmatpush1.bf16.msra.mxu0 %v6651_v11  ;;  %3348 = vmatpush1.bf16.msra.mxu1 %v6654_v54 }
 0x771   :  { %3308 = vmatprep.subr.bf16.mxu0 %v6657_v28  ;;  %3349 = vmatprep.subr.bf16.mxu1 %v6660_v2  ;;  %v3210_v59 = vmul.f32 %v4391_v25, %v4389_v22  ;;  %v6695_v22 = vld [vmem:[#allocation4 + $0xc8] sm:$0xff]  ;;  %v6698_v25 = vld [vmem:[#allocation4 + $0xd8] sm:$0xff] }
 0x772   :  { %7638 = vst [vmem:[#allocation34_spill] sm:$0xff] %v6695_v22  ;;  %7639 = vst [vmem:[#allocation35_spill] sm:$0xff] %v6698_v25 }
 0x773   :  { %v3211_v3 = vpack.c.bf16 %v3210_v59, %v3210_v59  ;;  %v6701_v59 = vld [vmem:[#allocation4 + $0xc0] sm:$0xff] }
 0x774   :  { %3309 = vmatpush1.bf16.msra.mxu0 %v6663_v56  ;;  %3350 = vmatpush1.bf16.msra.mxu1 %v6666_v44  ;;  %7640 = vst [vmem:[#allocation36_spill] sm:$0xff] %v6701_v59 }
 0x775   :  { %3414 = vmatprep.subr.bf16.mxu0 %v6436_v51  ;;  %3455 = vmatprep.subr.bf16.mxu1 %v6439_v10 }
 0x777   :  { %3327 = vmatmul.mubr.bf16.vlgmr.msra.gmra.mrb[84].mxu0 %v3211_v3  ;;  %3368 = vmatmul.mubr.bf16.vlgmr.msra.gmra.mrb[84].mxu1 %v3211_v3 }
 0x778   :  { %3415 = vmatpush1.bf16.msra.mxu0 %v6444_v13  ;;  %3456 = vmatpush1.bf16.msra.mxu1 %v6447_v14 }
 0x779   :  { %3416 = vmatprep.subr.bf16.mxu0 %v6450_v15  ;;  %3457 = vmatprep.subr.bf16.mxu1 %v6453_v16 }
 0x77a   :  { %3446 = vmatprep.mubr.bf16.mxu0 %v7310_v61  ;;  %3487 = vmatprep.mubr.bf16.mxu1 %v7310_v61 }
 0x77c   :  { %3417 = vmatpush1.bf16.msra.mxu0 %v6458_v8  ;;  %3458 = vmatpush1.bf16.msra.mxu1 %v6461_v18 }
 0x77d   :  { %3418 = vmatprep.subr.bf16.mxu0 %v6464_v30  ;;  %3459 = vmatprep.subr.bf16.mxu1 %v6467_v19 }
 0x780   :  { %3419 = vmatpush1.bf16.msra.mxu0 %v6470_v20  ;;  %3460 = vmatpush1.bf16.msra.mxu1 %v6473_v21 }
 0x781   :  { %3420 = vmatprep.subr.bf16.mxu0 %v6476_v23  ;;  %3461 = vmatprep.subr.bf16.mxu1 %v6479_v24 }
 0x784   :  { %3421 = vmatpush1.bf16.msra.mxu0 %v6482_v60  ;;  %3462 = vmatpush1.bf16.msra.mxu1 %v6485_v4 }
 0x785   :  { %3422 = vmatprep.subr.bf16.mxu0 %v6488_v63  ;;  %3463 = vmatprep.subr.bf16.mxu1 %v6491_v42 }
 0x788   :  { %3423 = vmatpush1.bf16.msra.mxu0 %v6494_v48  ;;  %3464 = vmatpush1.bf16.msra.mxu1 %v6497_v49  ;;  %v6704_v49 = vld [vmem:[#allocation4 + $0xd0] sm:$0xff] }
 0x789   :  { %3424 = vmatprep.subr.bf16.mxu0 %v6500_v6  ;;  %3465 = vmatprep.subr.bf16.mxu1 %v6503_v45  ;;  %7641 = vst [vmem:[#allocation37_spill] sm:$0xff] %v6704_v49  ;;  %v6707_v45 = vld [vmem:[#allocation4 + $0xe8] sm:$0xff] }
 0x78a   :  { %7642 = vst [vmem:[#allocation38_spill] sm:$0xff] %v6707_v45 }
 0x78c   :  { %3425 = vmatpush1.bf16.msra.mxu0 %v6506_v35  ;;  %3466 = vmatpush1.bf16.msra.mxu1 %v6509_v32  ;;  %v6710_v32 = vld [vmem:[#allocation4 + $0xf8] sm:$0xff] }
 0x78d   :  { %3426 = vmatprep.subr.bf16.mxu0 %v6695_v22  ;;  %3467 = vmatprep.subr.bf16.mxu1 %v6698_v25  ;;  %7643 = vst [vmem:[#allocation39_spill] sm:$0xff] %v6710_v32  ;;  %v6713_v22 = vld [vmem:[#allocation4 + $0xe0] sm:$0xff]  ;;  %v6716_v25 = vld [vmem:[#allocation4 + $0xf0] sm:$0xff] }
 0x78e   :  { %7644 = vst [vmem:[#allocation40_spill] sm:$0xff] %v6713_v22  ;;  %7645 = vst [vmem:[#allocation41_spill] sm:$0xff] %v6716_v25 }
 0x790   :  { %3427 = vmatpush1.bf16.msra.mxu0 %v6701_v59  ;;  %3468 = vmatpush1.bf16.msra.mxu1 %v6704_v49  ;;  %v6719_v59 = vld [vmem:[#allocation7 + $0x8] sm:$0xff]  ;;  %v6722_v49 = vld [vmem:[#allocation7 + $0x18] sm:$0xff] }
 0x791   :  { %3428 = vmatprep.subr.bf16.mxu0 %v6707_v45  ;;  %3469 = vmatprep.subr.bf16.mxu1 %v6710_v32  ;;  %7646 = vst [vmem:[#allocation78_spill] sm:$0xff] %v6719_v59  ;;  %7647 = vst [vmem:[#allocation79_spill] sm:$0xff] %v6722_v49  ;;  %v6725_v45 = vld [vmem:[#allocation7] sm:$0xff]  ;;  %v6728_v32 = vld [vmem:[#allocation7 + $0x10] sm:$0xff] }
 0x792   :  { %7648 = vst [vmem:[#allocation80_spill] sm:$0xff] %v6725_v45  ;;  %7649 = vst [vmem:[#allocation81_spill] sm:$0xff] %v6728_v32 }
 0x794   :  { %3429 = vmatpush1.bf16.msra.mxu0 %v6713_v22  ;;  %3470 = vmatpush1.bf16.msra.mxu1 %v6716_v25  ;;  %v6731_v22 = vld [vmem:[#allocation7 + $0x28] sm:$0xff]  ;;  %v6734_v25 = vld [vmem:[#allocation7 + $0x38] sm:$0xff] }
 0x795   :  { %3525 = vmatprep.subr.bf16.mxu0 %v6719_v59  ;;  %3566 = vmatprep.subr.bf16.mxu1 %v6722_v49  ;;  %7650 = vst [vmem:[#allocation82_spill] sm:$0xff] %v6731_v22  ;;  %7651 = vst [vmem:[#allocation91_spill] sm:$0xff] %v6734_v25  ;;  %v6754_v49 = vld [vmem:[#allocation7 + $0x50] sm:$0xff] }
 0x796   :  { %7657 = vst [vmem:[#allocation50_spill] sm:$0xff] %v6754_v49 }
 0x797   :  { %3447 = vmatmul.mubr.bf16.vlgmr.msra.gmra.mrb[88].mxu0 %v3211_v3  ;;  %3488 = vmatmul.mubr.bf16.vlgmr.msra.gmra.mrb[88].mxu1 %v3211_v3  ;;  %v6739_v3 = vld [vmem:[#allocation7 + $0x20] sm:$0xff] }
 0x798   :  { %3526 = vmatpush1.bf16.msra.mxu0 %v6725_v45  ;;  %3567 = vmatpush1.bf16.msra.mxu1 %v6728_v32  ;;  %7652 = vst [vmem:[#allocation92_spill] sm:$0xff] %v6739_v3  ;;  %v6742_v45 = vld [vmem:[#allocation7 + $0x30] sm:$0xff]  ;;  %v6745_v32 = vld [vmem:[#allocation7 + $0x48] sm:$0xff] }
 0x799   :  { %3527 = vmatprep.subr.bf16.mxu0 %v6731_v22  ;;  %3568 = vmatprep.subr.bf16.mxu1 %v6734_v25  ;;  %7653 = vst [vmem:[#allocation93_spill] sm:$0xff] %v6742_v45  ;;  %7654 = vst [vmem:[#allocation94_spill] sm:$0xff] %v6745_v32  ;;  %v6748_v22 = vld [vmem:[#allocation7 + $0x58] sm:$0xff]  ;;  %v6751_v25 = vld [vmem:[#allocation7 + $0x40] sm:$0xff] }
 0x79a   :  { %3557 = vmatprep.mubr.bf16.mxu0 %v7310_v61  ;;  %3598 = vmatprep.mubr.bf16.mxu1 %v7310_v61  ;;  %7655 = vst [vmem:[#allocation48_spill] sm:$0xff] %v6748_v22  ;;  %7656 = vst [vmem:[#allocation49_spill] sm:$0xff] %v6751_v25 }
 0x79c   :  { %3528 = vmatpush1.bf16.msra.mxu0 %v6739_v3  ;;  %3569 = vmatpush1.bf16.msra.mxu1 %v6742_v45  ;;  %v6757_v3 = vld [vmem:[#allocation7 + $0x68] sm:$0xff]  ;;  %v6760_v45 = vld [vmem:[#allocation7 + $0x78] sm:$0xff] }
 0x79d   :  { %3529 = vmatprep.subr.bf16.mxu0 %v6745_v32  ;;  %3570 = vmatprep.subr.bf16.mxu1 %v6748_v22  ;;  %7658 = vst [vmem:[#allocation51_spill] sm:$0xff] %v6757_v3  ;;  %7659 = vst [vmem:[#allocation52_spill] sm:$0xff] %v6760_v45  ;;  %v6763_v32 = vld [vmem:[#allocation7 + $0x60] sm:$0xff]  ;;  %v6766_v22 = vld [vmem:[#allocation7 + $0x70] sm:$0xff] }
 0x79e   :  { %7660 = vst [vmem:[#allocation53_spill] sm:$0xff] %v6763_v32  ;;  %7661 = vst [vmem:[#allocation54_spill] sm:$0xff] %v6766_v22 }
 0x7a0   :  { %3530 = vmatpush1.bf16.msra.mxu0 %v6751_v25  ;;  %3571 = vmatpush1.bf16.msra.mxu1 %v6754_v49  ;;  %v6769_v25 = vld [vmem:[#allocation7 + $0x88] sm:$0xff]  ;;  %v6772_v49 = vld [vmem:[#allocation7 + $0x98] sm:$0xff] }
 0x7a1   :  { %3531 = vmatprep.subr.bf16.mxu0 %v6757_v3  ;;  %3572 = vmatprep.subr.bf16.mxu1 %v6760_v45  ;;  %7662 = vst [vmem:[#allocation55_spill] sm:$0xff] %v6769_v25  ;;  %7663 = vst [vmem:[#allocation56_spill] sm:$0xff] %v6772_v49  ;;  %v6775_v3 = vld [vmem:[#allocation7 + $0x80] sm:$0xff]  ;;  %v6778_v45 = vld [vmem:[#allocation7 + $0x90] sm:$0xff] }
 0x7a2   :  { %7664 = vst [vmem:[#allocation57_spill] sm:$0xff] %v6775_v3  ;;  %7665 = vst [vmem:[#allocation58_spill] sm:$0xff] %v6778_v45 }
 0x7a4   :  { %3532 = vmatpush1.bf16.msra.mxu0 %v6763_v32  ;;  %3573 = vmatpush1.bf16.msra.mxu1 %v6766_v22  ;;  %v6781_v32 = vld [vmem:[#allocation7 + $0xa8] sm:$0xff]  ;;  %v6784_v22 = vld [vmem:[#allocation7 + $0xb8] sm:$0xff] }
 0x7a5   :  { %3533 = vmatprep.subr.bf16.mxu0 %v6769_v25  ;;  %3574 = vmatprep.subr.bf16.mxu1 %v6772_v49  ;;  %7666 = vst [vmem:[#allocation59_spill] sm:$0xff] %v6781_v32  ;;  %7667 = vst [vmem:[#allocation60_spill] sm:$0xff] %v6784_v22  ;;  %v6787_v25 = vld [vmem:[#allocation7 + $0xa0] sm:$0xff]  ;;  %v6790_v49 = vld [vmem:[#allocation7 + $0xb0] sm:$0xff] }
 0x7a6   :  { %7668 = vst [vmem:[#allocation61_spill] sm:$0xff] %v6787_v25  ;;  %7669 = vst [vmem:[#allocation62_spill] sm:$0xff] %v6790_v49 }
 0x7a8   :  { %3534 = vmatpush1.bf16.msra.mxu0 %v6775_v3  ;;  %3575 = vmatpush1.bf16.msra.mxu1 %v6778_v45  ;;  %v6793_v3 = vld [vmem:[#allocation7 + $0xc8] sm:$0xff]  ;;  %v6796_v45 = vld [vmem:[#allocation7 + $0xd8] sm:$0xff] }
 0x7a9   :  { %3535 = vmatprep.subr.bf16.mxu0 %v6781_v32  ;;  %3576 = vmatprep.subr.bf16.mxu1 %v6784_v22  ;;  %7670 = vst [vmem:[#allocation63_spill] sm:$0xff] %v6793_v3  ;;  %7671 = vst [vmem:[#allocation64_spill] sm:$0xff] %v6796_v45  ;;  %v6799_v32 = vld [vmem:[#allocation7 + $0xc0] sm:$0xff]  ;;  %v6802_v22 = vld [vmem:[#allocation7 + $0xd0] sm:$0xff] }
 0x7aa   :  { %7672 = vst [vmem:[#allocation65_spill] sm:$0xff] %v6799_v32  ;;  %7673 = vst [vmem:[#allocation66_spill] sm:$0xff] %v6802_v22 }
 0x7ac   :  { %3536 = vmatpush1.bf16.msra.mxu0 %v6787_v25  ;;  %3577 = vmatpush1.bf16.msra.mxu1 %v6790_v49  ;;  %v6805_v25 = vld [vmem:[#allocation7 + $0xe8] sm:$0xff]  ;;  %v6808_v49 = vld [vmem:[#allocation7 + $0xf8] sm:$0xff] }
 0x7ad   :  { %3537 = vmatprep.subr.bf16.mxu0 %v6793_v3  ;;  %3578 = vmatprep.subr.bf16.mxu1 %v6796_v45  ;;  %7674 = vst [vmem:[#allocation67_spill] sm:$0xff] %v6805_v25  ;;  %7675 = vst [vmem:[#allocation68_spill] sm:$0xff] %v6808_v49  ;;  %v6811_v3 = vld [vmem:[#allocation7 + $0xe0] sm:$0xff]  ;;  %v6814_v45 = vld [vmem:[#allocation7 + $0xf0] sm:$0xff] }
 0x7ae   :  { %7676 = vst [vmem:[#allocation69_spill] sm:$0xff] %v6811_v3  ;;  %7677 = vst [vmem:[#allocation70_spill] sm:$0xff] %v6814_v45 }
 0x7b0   :  { %3538 = vmatpush1.bf16.msra.mxu0 %v6799_v32  ;;  %3579 = vmatpush1.bf16.msra.mxu1 %v6802_v22  ;;  %v6817_v32 = vld [vmem:[#allocation6 + $0x8] sm:$0xff]  ;;  %v6820_v22 = vld [vmem:[#allocation6 + $0x18] sm:$0xff] }
 0x7b1   :  { %3539 = vmatprep.subr.bf16.mxu0 %v6805_v25  ;;  %3580 = vmatprep.subr.bf16.mxu1 %v6808_v49  ;;  %7678 = vst [vmem:[#allocation71_spill] sm:$0xff] %v6817_v32  ;;  %7679 = vst [vmem:[#allocation72_spill] sm:$0xff] %v6820_v22 }
 0x7b4   :  { %3540 = vmatpush1.bf16.msra.mxu0 %v6811_v3  ;;  %3581 = vmatpush1.bf16.msra.mxu1 %v6814_v45 }
 0x7b5   :  { %3607 = vmatprep.subr.bf16.mxu0 %v6817_v32  ;;  %3648 = vmatprep.subr.bf16.mxu1 %v6820_v22 }
 0x82a   :  { %v3246_v25 = vpop.f32.mrb[80].mxu0  ;;  %v3287_v59 = vpop.f32.mrb[80].mxu1 }
 0x82b   :  { %v3248_v35 = vpop.f32.mrb[81].mxu0  ;;  %v3289_v49 = vpop.f32.mrb[81].mxu1 }
 0x82c   :  { %v3250_v6 = vpop.f32.mrb[82].mxu0  ;;  %v3291_v48 = vpop.f32.mrb[82].mxu1 }
 0x82d   :  { %v3251_v42 = vpop.f32.mrb[83].mxu0  ;;  %v3292_v3 = vpop.f32.mrb[83].mxu1 }
 0x84a   :  { %v3328_v63 = vpop.f32.mrb[84].mxu0  ;;  %v3369_v4 = vpop.f32.mrb[84].mxu1 }
 0x84b   :  { %v3329_v60 = vadd.f32 %v3328_v63, %v3246_v25  ;;  %v3370_v45 = vadd.f32 %v3369_v4, %v3287_v59  ;;  %v3330_v24 = vpop.f32.mrb[85].mxu0  ;;  %v3371_v23 = vpop.f32.mrb[85].mxu1  ;;  %v7681_v59 = vld [vmem:[#allocation100_spill] sm:$0xff] }
 0x84c   :  { %v3331_v21 = vadd.f32 %v3330_v24, %v3248_v35  ;;  %v3372_v32 = vadd.f32 %v3371_v23, %v3289_v49  ;;  %v3332_v20 = vpop.f32.mrb[86].mxu0  ;;  %v3373_v19 = vpop.f32.mrb[86].mxu1 }
 0x84d   :  { %v3376_v22 = vadd.f32 %v3329_v60, %v5806_v57  ;;  %v3333_v30 = vpop.f32.mrb[87].mxu0  ;;  %v3374_v18 = vpop.f32.mrb[87].mxu1  ;;  %v3378_v4 = vadd.f32 %v3370_v45, %v7459_v62 }
 0x84e   :  { %v3377_v8 = vadd.f32 %v3331_v21, %v5810_v40  ;;  %v3379_v42 = vadd.f32 %v3372_v32, %v5816_v7 }
 0x84f   :  { %v4189_v6 = vmul.f32 -1.442695, %v3376_v22  ;;  %v7680_v22 = vld [vmem:[#allocation99_spill] sm:$0xff] }
 0x850   :  { %v4190_v48 = vmul.f32 -1.442695, %v3377_v8  ;;  %v4191_v63 = vmul.f32 -1.442695, %v3379_v42 }
 0x851   :  { %4392 = vpow2.f32 %v4189_v6 }
 0x852   :  { %4394 = vpow2.f32 %v4190_v48 }
 0x853   :  { %4396 = vpow2.f32 %v4191_v63  ;;  %v7682_v63 = vld [vmem:[#allocation101_spill] sm:$0xff] }
 0x854   :  { %4398 = vtanh.f32 %v3378_v4 }
 0x85b   :  { %v4393_v25 = vpop.eup %4392 }
 0x85c   :  { %v4395_v24 = vpop.eup %4394  ;;  %v3383_v23 = vadd.f32 1.0, %v4393_v25  ;;  %v7683_v25 = vld [vmem:[#allocation102_spill] sm:$0xff] }
 0x85d   :  { %v3389_v19 = vadd.f32 1.0, %v4395_v24  ;;  %v4397_v18 = vpop.eup %4396 }
 0x85e   :  { %4400 = vrcp.f32 %v3383_v23  ;;  %v4399_v30 = vpop.eup %4398  ;;  %v3396_v60 = vadd.f32 1.0, %v4397_v18 }
 0x85f   :  { %4402 = vrcp.f32 %v3389_v19 }
 0x860   :  { %4404 = vrcp.f32 %v3396_v60 }
 0x868   :  { %v4401_v20 = vpop.eup %4400 }
 0x869   :  { %v4403_v21 = vpop.eup %4402  ;;  %v3400_v8 = vmul.f32 %v4401_v20, %v4399_v30 }
 0x86a   :  { %v3399_v49 = vmul.f32 %v4403_v21, %v6565_v17  ;;  %v3448_v35 = vpop.f32.mrb[88].mxu0  ;;  %v3489_v32 = vpop.f32.mrb[88].mxu1 }
 0x86b   :  { %v3496_v45 = vadd.f32 %v3448_v35, %v7680_v22  ;;  %v3498_v3 = vadd.f32 %v3489_v32, %v7681_v59  ;;  %v3450_v6 = vpop.f32.mrb[89].mxu0  ;;  %v3491_v48 = vpop.f32.mrb[89].mxu1 }
 0x86c   :  { %v6830_v42 = vadd.f32 %v3400_v8, %v3399_v49  ;;  %v3497_v4 = vadd.f32 %v3450_v6, %v7682_v63  ;;  %v3499_v24 = vadd.f32 %v3491_v48, %v7683_v25  ;;  %v3452_v23 = vpop.f32.mrb[90].mxu0  ;;  %v3493_v19 = vpop.f32.mrb[90].mxu1 }
 0x86d   :  { %v4193_v18 = vmul.f32 -1.442695, %v3496_v45  ;;  %v3453_v30 = vpop.f32.mrb[91].mxu0  ;;  %v3494_v17 = vpop.f32.mrb[91].mxu1 }
 0x86e   :  { %v4194_v20 = vmul.f32 -1.442695, %v3497_v4  ;;  %4406 = vtanh.f32 %v6830_v42  ;;  %v4195_v21 = vmul.f32 -1.442695, %v3499_v24  ;;  %v4405_v35 = vpop.eup %4404 }
 0x86f   :  { %4408 = vpow2.f32 %v4193_v18 }
 0x870   :  { %4410 = vpow2.f32 %v4194_v20  ;;  %v7685_v20 = vld [vmem:[#allocation83_spill] sm:$0xff] }
 0x871   :  { %4412 = vpow2.f32 %v4195_v21  ;;  %v7686_v21 = vld [vmem:[#allocation84_spill] sm:$0xff] }
 0x872   :  { %4414 = vtanh.f32 %v3498_v3 }
 0x878   :  { %v4407_v32 = vpop.eup %4406 }
 0x879   :  { %v4409_v8 = vpop.eup %4408  ;;  %v3403_v49 = vmul.f32 %v4407_v32, %v4405_v35  ;;  %v7689_v35 = vld [vmem:[#allocation87_spill] sm:$0xff]  ;;  %v7694_v32 = vld [vmem:[#allocation24_spill] sm:$0xff] }
 0x87a   :  { %v4411_v22 = vpop.eup %4410  ;;  %v3503_v59 = vadd.f32 1.0, %v4409_v8  ;;  %v7695_v8 = vld [vmem:[#allocation25_spill] sm:$0xff] }
 0x87b   :  { %v3509_v6 = vadd.f32 1.0, %v4411_v22  ;;  %v3404_v48 = vpack.c.bf16 %v3403_v49, %v3403_v49  ;;  %v4413_v60 = vpop.eup %4412  ;;  %v7696_v49 = vld [vmem:[#allocation26_spill] sm:$0xff]  ;;  %v7697_v22 = vld [vmem:[#allocation27_spill] sm:$0xff] }
 0x87c   :  { %4416 = vrcp.f32 %v3503_v59  ;;  %v4415_v45 = vpop.eup %4414  ;;  %v3516_v25 = vadd.f32 1.0, %v4413_v60  ;;  %v7698_v59 = vld [vmem:[#allocation28_spill] sm:$0xff]  ;;  %v7701_v60 = vld [vmem:[#allocation31_spill] sm:$0xff] }
 0x87d   :  { %4418 = vrcp.f32 %v3509_v6  ;;  %4192 = vst [vmem:[%s7018_s7 + $0x14] sm:$0xf] %v3404_v48  ;;  %3558 = vmatmul.mubr.bf16.vlgmr.msra.gmra.mrb[92].mxu0 %v3404_v48  ;;  %3599 = vmatmul.mubr.bf16.vlgmr.msra.gmra.mrb[92].mxu1 %v3404_v48  ;;  %v7699_v6 = vld [vmem:[#allocation29_spill] sm:$0xff]  ;;  %v7700_v48 = vld [vmem:[#allocation30_spill] sm:$0xff] }
 0x87e   :  { %3608 = vmatpush1.bf16.msra.mxu0 %v6573_v52  ;;  %3649 = vmatpush1.bf16.msra.mxu1 %v6576_v53  ;;  %4420 = vrcp.f32 %v3516_v25  ;;  %v7706_v25 = vld [vmem:[#allocation37_spill] sm:$0xff] }
 0x87f   :  { %3609 = vmatprep.subr.bf16.mxu0 %v6579_v50  ;;  %3650 = vmatprep.subr.bf16.mxu1 %v6582_v26 }
 0x880   :  { %3639 = vmatprep.mubr.bf16.mxu0 %v7310_v61  ;;  %3680 = vmatprep.mubr.bf16.mxu1 %v7310_v61 }
 0x882   :  { %3610 = vmatpush1.bf16.msra.mxu0 %v6587_v31  ;;  %3651 = vmatpush1.bf16.msra.mxu1 %v6590_v0 }
 0x883   :  { %3611 = vmatprep.subr.bf16.mxu0 %v6593_v12  ;;  %3652 = vmatprep.subr.bf16.mxu1 %v6596_v9 }
 0x886   :  { %v4417_v3 = vpop.eup %4416  ;;  %3612 = vmatpush1.bf16.msra.mxu0 %v6599_v1  ;;  %3653 = vmatpush1.bf16.msra.mxu1 %v6602_v55 }
 0x887   :  { %v4419_v63 = vpop.eup %4418  ;;  %v3520_v4 = vmul.f32 %v4417_v3, %v4415_v45  ;;  %3613 = vmatprep.subr.bf16.mxu0 %v6605_v5  ;;  %3654 = vmatprep.subr.bf16.mxu1 %v6608_v27  ;;  %v7702_v45 = vld [vmem:[#allocation32_spill] sm:$0xff]  ;;  %v7703_v3 = vld [vmem:[#allocation34_spill] sm:$0xff] }
 0x888   :  { %v3519_v24 = vmul.f32 %v4419_v63, %v6612_v29  ;;  %v7684_v29 = vld [vmem:[#allocation33_spill] sm:$0xff]  ;;  %v4421_v19 = vpop.eup %4420  ;;  %v7704_v63 = vld [vmem:[#allocation35_spill] sm:$0xff] }
 0x88a   :  { %v6853_v23 = vadd.f32 %v3520_v4, %v3519_v24  ;;  %3614 = vmatpush1.bf16.msra.mxu0 %v6614_v43  ;;  %3655 = vmatpush1.bf16.msra.mxu1 %v6617_v33  ;;  %v7705_v4 = vld [vmem:[#allocation36_spill] sm:$0xff]  ;;  %v7707_v24 = vld [vmem:[#allocation38_spill] sm:$0xff] }
 0x88b   :  { %3615 = vmatprep.subr.bf16.mxu0 %v6620_v58  ;;  %3656 = vmatprep.subr.bf16.mxu1 %v6623_v34 }
 0x88c   :  { %4422 = vtanh.f32 %v6853_v23 }
 0x88e   :  { %3616 = vmatpush1.bf16.msra.mxu0 %v6627_v38  ;;  %3657 = vmatpush1.bf16.msra.mxu1 %v6630_v36 }
 0x88f   :  { %3617 = vmatprep.subr.bf16.mxu0 %v6633_v37  ;;  %3658 = vmatprep.subr.bf16.mxu1 %v6636_v39 }
 0x892   :  { %3618 = vmatpush1.bf16.msra.mxu0 %v6639_v41  ;;  %3659 = vmatpush1.bf16.msra.mxu1 %v6642_v46 }
 0x893   :  { %3619 = vmatprep.subr.bf16.mxu0 %v6645_v47  ;;  %3660 = vmatprep.subr.bf16.mxu1 %v7684_v29 }
 0x896   :  { %v4423_v18 = vpop.eup %4422  ;;  %3620 = vmatpush1.bf16.msra.mxu0 %v6651_v11  ;;  %3661 = vmatpush1.bf16.msra.mxu1 %v6654_v54 }
 0x897   :  { %3621 = vmatprep.subr.bf16.mxu0 %v6657_v28  ;;  %3662 = vmatprep.subr.bf16.mxu1 %v6660_v2  ;;  %v3523_v30 = vmul.f32 %v4423_v18, %v4421_v19  ;;  %v7708_v19 = vld [vmem:[#allocation39_spill] sm:$0xff]  ;;  %v7709_v18 = vld [vmem:[#allocation40_spill] sm:$0xff] }
 0x899   :  { %v3524_v17 = vpack.c.bf16 %v3523_v30, %v3523_v30  ;;  %v7710_v30 = vld [vmem:[#allocation41_spill] sm:$0xff] }
 0x89a   :  { %3622 = vmatpush1.bf16.msra.mxu0 %v6663_v56  ;;  %3663 = vmatpush1.bf16.msra.mxu1 %v6666_v44 }
 0x89b   :  { %3727 = vmatprep.subr.bf16.mxu0 %v6436_v51  ;;  %3768 = vmatprep.subr.bf16.mxu1 %v6439_v10  ;;  %v7687_v51 = vld [vmem:[#allocation85_spill] sm:$0xff]  ;;  %v7688_v10 = vld [vmem:[#allocation86_spill] sm:$0xff] }
 0x89d   :  { %3640 = vmatmul.mubr.bf16.vlgmr.msra.gmra.mrb[96].mxu0 %v3524_v17  ;;  %3681 = vmatmul.mubr.bf16.vlgmr.msra.gmra.mrb[96].mxu1 %v3524_v17 }
 0x89e   :  { %3728 = vmatpush1.bf16.msra.mxu0 %v6444_v13  ;;  %3769 = vmatpush1.bf16.msra.mxu1 %v6447_v14  ;;  %v7690_v13 = vld [vmem:[#allocation88_spill] sm:$0xff]  ;;  %v7691_v14 = vld [vmem:[#allocation89_spill] sm:$0xff] }
 0x89f   :  { %3729 = vmatprep.subr.bf16.mxu0 %v6450_v15  ;;  %3770 = vmatprep.subr.bf16.mxu1 %v6453_v16  ;;  %v7692_v15 = vld [vmem:[#allocation90_spill] sm:$0xff]  ;;  %v7693_v16 = vld [vmem:[#allocation23_spill] sm:$0xff] }
 0x8a0   :  { %3759 = vmatprep.mubr.bf16.mxu0 %v7310_v61  ;;  %3800 = vmatprep.mubr.bf16.mxu1 %v7310_v61 }
 0x8a2   :  { %3730 = vmatpush1.bf16.msra.mxu0 %v7685_v20  ;;  %3771 = vmatpush1.bf16.msra.mxu1 %v7686_v21  ;;  %v7711_v20 = vld [vmem:[#allocation78_spill] sm:$0xff]  ;;  %v7712_v21 = vld [vmem:[#allocation79_spill] sm:$0xff] }
 0x8a3   :  { %3731 = vmatprep.subr.bf16.mxu0 %v7687_v51  ;;  %3772 = vmatprep.subr.bf16.mxu1 %v7688_v10  ;;  %v7713_v51 = vld [vmem:[#allocation80_spill] sm:$0xff]  ;;  %v7714_v10 = vld [vmem:[#allocation81_spill] sm:$0xff] }
 0x8a6   :  { %3732 = vmatpush1.bf16.msra.mxu0 %v7689_v35  ;;  %3773 = vmatpush1.bf16.msra.mxu1 %v7690_v13  ;;  %v7715_v35 = vld [vmem:[#allocation82_spill] sm:$0xff]  ;;  %v7716_v13 = vld [vmem:[#allocation91_spill] sm:$0xff] }
 0x8a7   :  { %3733 = vmatprep.subr.bf16.mxu0 %v7691_v14  ;;  %3774 = vmatprep.subr.bf16.mxu1 %v7692_v15  ;;  %v7717_v14 = vld [vmem:[#allocation92_spill] sm:$0xff]  ;;  %v7718_v15 = vld [vmem:[#allocation93_spill] sm:$0xff] }
 0x8aa   :  { %3734 = vmatpush1.bf16.msra.mxu0 %v7693_v16  ;;  %3775 = vmatpush1.bf16.msra.mxu1 %v7694_v32  ;;  %v7719_v16 = vld [vmem:[#allocation94_spill] sm:$0xff]  ;;  %v7720_v32 = vld [vmem:[#allocation48_spill] sm:$0xff] }
 0x8ab   :  { %3735 = vmatprep.subr.bf16.mxu0 %v7695_v8  ;;  %3776 = vmatprep.subr.bf16.mxu1 %v7696_v49  ;;  %v7722_v8 = vld [vmem:[#allocation50_spill] sm:$0xff]  ;;  %v7723_v49 = vld [vmem:[#allocation51_spill] sm:$0xff] }
 0x8ae   :  { %3736 = vmatpush1.bf16.msra.mxu0 %v7697_v22  ;;  %3777 = vmatpush1.bf16.msra.mxu1 %v7698_v59  ;;  %v7724_v22 = vld [vmem:[#allocation52_spill] sm:$0xff]  ;;  %v7725_v59 = vld [vmem:[#allocation53_spill] sm:$0xff] }
 0x8af   :  { %3737 = vmatprep.subr.bf16.mxu0 %v7699_v6  ;;  %3778 = vmatprep.subr.bf16.mxu1 %v7700_v48  ;;  %v7726_v6 = vld [vmem:[#allocation54_spill] sm:$0xff]  ;;  %v7727_v48 = vld [vmem:[#allocation55_spill] sm:$0xff] }
 0x8b2   :  { %3738 = vmatpush1.bf16.msra.mxu0 %v7701_v60  ;;  %3779 = vmatpush1.bf16.msra.mxu1 %v7702_v45  ;;  %v7728_v60 = vld [vmem:[#allocation56_spill] sm:$0xff]  ;;  %v7729_v45 = vld [vmem:[#allocation57_spill] sm:$0xff] }
 0x8b3   :  { %3739 = vmatprep.subr.bf16.mxu0 %v7703_v3  ;;  %3780 = vmatprep.subr.bf16.mxu1 %v7704_v63  ;;  %v7730_v3 = vld [vmem:[#allocation58_spill] sm:$0xff]  ;;  %v7731_v63 = vld [vmem:[#allocation59_spill] sm:$0xff] }
 0x8b6   :  { %3740 = vmatpush1.bf16.msra.mxu0 %v7705_v4  ;;  %3781 = vmatpush1.bf16.msra.mxu1 %v7706_v25  ;;  %v7732_v4 = vld [vmem:[#allocation60_spill] sm:$0xff]  ;;  %v7733_v25 = vld [vmem:[#allocation61_spill] sm:$0xff] }
 0x8b7   :  { %3741 = vmatprep.subr.bf16.mxu0 %v7707_v24  ;;  %3782 = vmatprep.subr.bf16.mxu1 %v7708_v19  ;;  %v7734_v24 = vld [vmem:[#allocation62_spill] sm:$0xff]  ;;  %v7735_v19 = vld [vmem:[#allocation63_spill] sm:$0xff] }
 0x8ba   :  { %3742 = vmatpush1.bf16.msra.mxu0 %v7709_v18  ;;  %3783 = vmatpush1.bf16.msra.mxu1 %v7710_v30  ;;  %v7736_v18 = vld [vmem:[#allocation64_spill] sm:$0xff]  ;;  %v7737_v30 = vld [vmem:[#allocation65_spill] sm:$0xff] }
 0x8bb   :  { %3838 = vmatprep.subr.bf16.mxu0 %v7711_v20  ;;  %3879 = vmatprep.subr.bf16.mxu1 %v7712_v21  ;;  %v7738_v20 = vld [vmem:[#allocation66_spill] sm:$0xff]  ;;  %v7739_v21 = vld [vmem:[#allocation67_spill] sm:$0xff] }
 0x8bd   :  { %3760 = vmatmul.mubr.bf16.vlgmr.msra.gmra.mrb[100].mxu0 %v3524_v17  ;;  %3801 = vmatmul.mubr.bf16.vlgmr.msra.gmra.mrb[100].mxu1 %v3524_v17  ;;  %v7721_v17 = vld [vmem:[#allocation49_spill] sm:$0xff] }
 0x8be   :  { %3839 = vmatpush1.bf16.msra.mxu0 %v7713_v51  ;;  %3880 = vmatpush1.bf16.msra.mxu1 %v7714_v10  ;;  %v7740_v51 = vld [vmem:[#allocation68_spill] sm:$0xff]  ;;  %v7741_v10 = vld [vmem:[#allocation69_spill] sm:$0xff] }
 0x8bf   :  { %3840 = vmatprep.subr.bf16.mxu0 %v7715_v35  ;;  %3881 = vmatprep.subr.bf16.mxu1 %v7716_v13  ;;  %v7742_v35 = vld [vmem:[#allocation70_spill] sm:$0xff]  ;;  %v7743_v13 = vld [vmem:[#allocation71_spill] sm:$0xff] }
 0x8c0   :  { %3870 = vmatprep.mubr.bf16.mxu0 %v7310_v61  ;;  %3911 = vmatprep.mubr.bf16.mxu1 %v7310_v61 }
 0x8c2   :  { %3841 = vmatpush1.bf16.msra.mxu0 %v7717_v14  ;;  %3882 = vmatpush1.bf16.msra.mxu1 %v7718_v15  ;;  %v7744_v14 = vld [vmem:[#allocation72_spill] sm:$0xff] }
 0x8c3   :  { %3842 = vmatprep.subr.bf16.mxu0 %v7719_v16  ;;  %3883 = vmatprep.subr.bf16.mxu1 %v7720_v32 }
 0x8c6   :  { %3843 = vmatpush1.bf16.msra.mxu0 %v7721_v17  ;;  %3884 = vmatpush1.bf16.msra.mxu1 %v7722_v8 }
 0x8c7   :  { %3844 = vmatprep.subr.bf16.mxu0 %v7723_v49  ;;  %3885 = vmatprep.subr.bf16.mxu1 %v7724_v22 }
 0x8ca   :  { %3845 = vmatpush1.bf16.msra.mxu0 %v7725_v59  ;;  %3886 = vmatpush1.bf16.msra.mxu1 %v7726_v6 }
 0x8cb   :  { %3846 = vmatprep.subr.bf16.mxu0 %v7727_v48  ;;  %3887 = vmatprep.subr.bf16.mxu1 %v7728_v60 }
 0x8ce   :  { %3847 = vmatpush1.bf16.msra.mxu0 %v7729_v45  ;;  %3888 = vmatpush1.bf16.msra.mxu1 %v7730_v3 }
 0x8cf   :  { %3848 = vmatprep.subr.bf16.mxu0 %v7731_v63  ;;  %3889 = vmatprep.subr.bf16.mxu1 %v7732_v4 }
 0x8d2   :  { %3849 = vmatpush1.bf16.msra.mxu0 %v7733_v25  ;;  %3890 = vmatpush1.bf16.msra.mxu1 %v7734_v24 }
 0x8d3   :  { %3850 = vmatprep.subr.bf16.mxu0 %v7735_v19  ;;  %3891 = vmatprep.subr.bf16.mxu1 %v7736_v18 }
 0x8d6   :  { %3851 = vmatpush1.bf16.msra.mxu0 %v7737_v30  ;;  %3892 = vmatpush1.bf16.msra.mxu1 %v7738_v20 }
 0x8d7   :  { %3852 = vmatprep.subr.bf16.mxu0 %v7739_v21  ;;  %3893 = vmatprep.subr.bf16.mxu1 %v7740_v51 }
 0x8da   :  { %3853 = vmatpush1.bf16.msra.mxu0 %v7741_v10  ;;  %3894 = vmatpush1.bf16.msra.mxu1 %v7742_v35 }
 0x8db   :  { %3920 = vmatprep.subr.bf16.mxu0 %v7743_v13  ;;  %3961 = vmatprep.subr.bf16.mxu1 %v7744_v14 }
 0x950   :  { %v3559_v15 = vpop.f32.mrb[92].mxu0  ;;  %v3600_v16 = vpop.f32.mrb[92].mxu1 }
 0x951   :  { %v3561_v32 = vpop.f32.mrb[93].mxu0  ;;  %v3602_v17 = vpop.f32.mrb[93].mxu1 }
 0x952   :  { %v3563_v8 = vpop.f32.mrb[94].mxu0  ;;  %v3604_v49 = vpop.f32.mrb[94].mxu1 }
 0x953   :  { %v3564_v22 = vpop.f32.mrb[95].mxu0  ;;  %v3605_v59 = vpop.f32.mrb[95].mxu1 }
 0x970   :  { %v3641_v6 = vpop.f32.mrb[96].mxu0  ;;  %v3682_v48 = vpop.f32.mrb[96].mxu1 }
 0x971   :  { %v3642_v60 = vadd.f32 %v3641_v6, %v3559_v15  ;;  %v3683_v45 = vadd.f32 %v3682_v48, %v3600_v16  ;;  %v3643_v3 = vpop.f32.mrb[97].mxu0  ;;  %v3684_v63 = vpop.f32.mrb[97].mxu1 }
 0x972   :  { %v3644_v4 = vadd.f32 %v3643_v3, %v3561_v32  ;;  %v3685_v25 = vadd.f32 %v3684_v63, %v3602_v17  ;;  %v3645_v24 = vpop.f32.mrb[98].mxu0  ;;  %v3686_v19 = vpop.f32.mrb[98].mxu1 }
 0x973   :  { %v3689_v18 = vadd.f32 %v3642_v60, %v5806_v57  ;;  %v3646_v30 = vpop.f32.mrb[99].mxu0  ;;  %v3687_v20 = vpop.f32.mrb[99].mxu1  ;;  %v3691_v14 = vadd.f32 %v3683_v45, %v7459_v62 }
 0x974   :  { %v3690_v21 = vadd.f32 %v3644_v4, %v5810_v40  ;;  %v3692_v35 = vadd.f32 %v3685_v25, %v5816_v7  ;;  %v7745_v4 = vld [vmem:[#allocation103_spill] sm:$0xff]  ;;  %v7746_v25 = vld [vmem:[#allocation104_spill] sm:$0xff]  ;;  %v7747_v20 = vld [vmem:[#allocation105_spill] sm:$0xff] }
 0x975   :  { %v4196_v51 = vmul.f32 -1.442695, %v3689_v18 }
 0x976   :  { %v4197_v10 = vmul.f32 -1.442695, %v3690_v21  ;;  %v4198_v13 = vmul.f32 -1.442695, %v3692_v35 }
 0x977   :  { %4424 = vpow2.f32 %v4196_v51  ;;  %v7748_v51 = vld [vmem:[#allocation106_spill] sm:$0xff] }
 0x978   :  { %4426 = vpow2.f32 %v4197_v10 }
 0x979   :  { %4428 = vpow2.f32 %v4198_v13 }
 0x97a   :  { %4430 = vtanh.f32 %v3691_v14 }
 0x981   :  { %v4425_v15 = vpop.eup %4424 }
 0x982   :  { %v4427_v16 = vpop.eup %4426  ;;  %v3696_v32 = vadd.f32 1.0, %v4425_v15 }
 0x983   :  { %v3702_v17 = vadd.f32 1.0, %v4427_v16  ;;  %v4429_v8 = vpop.eup %4428 }
 0x984   :  { %4432 = vrcp.f32 %v3696_v32  ;;  %v4431_v49 = vpop.eup %4430  ;;  %v3709_v48 = vadd.f32 1.0, %v4429_v8 }
 0x985   :  { %4434 = vrcp.f32 %v3702_v17 }
 0x986   :  { %4436 = vrcp.f32 %v3709_v48 }
 0x98e   :  { %v4433_v22 = vpop.eup %4432 }
 0x98f   :  { %v4435_v59 = vpop.eup %4434  ;;  %v3713_v6 = vmul.f32 %v4433_v22, %v4431_v49 }
 0x990   :  { %v3712_v60 = vmul.f32 %v4435_v59, %v6830_v42  ;;  %v3761_v3 = vpop.f32.mrb[100].mxu0  ;;  %v3802_v63 = vpop.f32.mrb[100].mxu1 }
 0x991   :  { %v3809_v45 = vadd.f32 %v3761_v3, %v7745_v4  ;;  %v3811_v24 = vadd.f32 %v3802_v63, %v7746_v25  ;;  %v3763_v19 = vpop.f32.mrb[101].mxu0  ;;  %v3804_v18 = vpop.f32.mrb[101].mxu1 }
 0x992   :  { %v6951_v30 = vadd.f32 %v3713_v6, %v3712_v60  ;;  %v3810_v21 = vadd.f32 %v3763_v19, %v7747_v20  ;;  %v3812_v10 = vadd.f32 %v3804_v18, %v7748_v51  ;;  %v3765_v35 = vpop.f32.mrb[102].mxu0  ;;  %v3806_v13 = vpop.f32.mrb[102].mxu1 }
 0x993   :  { %v4200_v14 = vmul.f32 -1.442695, %v3809_v45  ;;  %v3766_v15 = vpop.f32.mrb[103].mxu0  ;;  %v3807_v42 = vpop.f32.mrb[103].mxu1 }
 0x994   :  { %v4201_v16 = vmul.f32 -1.442695, %v3810_v21  ;;  %4438 = vtanh.f32 %v6951_v30  ;;  %v4202_v32 = vmul.f32 -1.442695, %v3812_v10  ;;  %v4437_v17 = vpop.eup %4436 }
 0x995   :  { %4440 = vpow2.f32 %v4200_v14 }
 0x996   :  { %4442 = vpow2.f32 %v4201_v16 }
 0x997   :  { %4444 = vpow2.f32 %v4202_v32 }
 0x998   :  { %4446 = vtanh.f32 %v3811_v24 }
 0x99e   :  { %v4439_v8 = vpop.eup %4438 }
 0x99f   :  { %v4441_v49 = vpop.eup %4440  ;;  %v3716_v22 = vmul.f32 %v4439_v8, %v4437_v17 }
 0x9a0   :  { %v4443_v59 = vpop.eup %4442  ;;  %v3816_v6 = vadd.f32 1.0, %v4441_v49 }
 0x9a1   :  { %v3822_v60 = vadd.f32 1.0, %v4443_v59  ;;  %v3717_v3 = vpack.c.bf16 %v3716_v22, %v3716_v22  ;;  %v4445_v48 = vpop.eup %4444 }
 0x9a2   :  { %4448 = vrcp.f32 %v3816_v6 }
 0x9a3   :  { %4450 = vrcp.f32 %v3822_v60  ;;  %4199 = vst [vmem:[%s7018_s7 + $0x18] sm:$0xf] %v3717_v3  ;;  %3871 = vmatmul.mubr.bf16.vlgmr.msra.gmra.mrb[104].mxu0 %v3717_v3  ;;  %3912 = vmatmul.mubr.bf16.vlgmr.msra.gmra.mrb[104].mxu1 %v3717_v3 }
 0x9a4   :  { %3921 = vmatpush1.bf16.msra.mxu0 %v6573_v52  ;;  %3962 = vmatpush1.bf16.msra.mxu1 %v6576_v53  ;;  %v4447_v52 = vpop.eup %4446 }
 0x9a5   :  { %3922 = vmatprep.subr.bf16.mxu0 %v6579_v50  ;;  %3963 = vmatprep.subr.bf16.mxu1 %v6582_v26  ;;  %v3829_v26 = vadd.f32 1.0, %v4445_v48 }
 0x9a6   :  { %3952 = vmatprep.mubr.bf16.mxu0 %v7310_v61  ;;  %3993 = vmatprep.mubr.bf16.mxu1 %v7310_v61 }
 0x9a7   :  { %4452 = vrcp.f32 %v3829_v26 }
 0x9a8   :  { %3923 = vmatpush1.bf16.msra.mxu0 %v6587_v31  ;;  %3964 = vmatpush1.bf16.msra.mxu1 %v6590_v0 }
 0x9a9   :  { %3924 = vmatprep.subr.bf16.mxu0 %v6593_v12  ;;  %3965 = vmatprep.subr.bf16.mxu1 %v6596_v9 }
 0x9ac   :  { %v4449_v63 = vpop.eup %4448  ;;  %3925 = vmatpush1.bf16.msra.mxu0 %v6599_v1  ;;  %3966 = vmatpush1.bf16.msra.mxu1 %v6602_v55 }
 0x9ad   :  { %v4451_v53 = vpop.eup %4450  ;;  %v3833_v50 = vmul.f32 %v4449_v63, %v4447_v52  ;;  %3926 = vmatprep.subr.bf16.mxu0 %v6605_v5  ;;  %3967 = vmatprep.subr.bf16.mxu1 %v6608_v27 }
 0x9ae   :  { %v3832_v61 = vmul.f32 %v4451_v53, %v6853_v23 }
 0x9b0   :  { %v3834_v31 = vadd.f32 %v3833_v50, %v3832_v61  ;;  %3927 = vmatpush1.bf16.msra.mxu0 %v6614_v43  ;;  %3968 = vmatpush1.bf16.msra.mxu1 %v6617_v33 }
 0x9b1   :  { %3928 = vmatprep.subr.bf16.mxu0 %v6620_v58  ;;  %3969 = vmatprep.subr.bf16.mxu1 %v6623_v34  ;;  %v4453_v0 = vpop.eup %4452 }
 0x9b2   :  { %4454 = vtanh.f32 %v3834_v31  ;;  %4034 = vst [vmem:[%s7020_s9] sm:$0xff] %v3834_v31 }
 0x9b4   :  { %3929 = vmatpush1.bf16.msra.mxu0 %v6627_v38  ;;  %3970 = vmatpush1.bf16.msra.mxu1 %v6630_v36 }
 0x9b5   :  { %3930 = vmatprep.subr.bf16.mxu0 %v6633_v37  ;;  %3971 = vmatprep.subr.bf16.mxu1 %v6636_v39 }
 0x9b8   :  { %3931 = vmatpush1.bf16.msra.mxu0 %v6639_v41  ;;  %3972 = vmatpush1.bf16.msra.mxu1 %v6642_v46 }
 0x9b9   :  { %3932 = vmatprep.subr.bf16.mxu0 %v6645_v47  ;;  %3973 = vmatprep.subr.bf16.mxu1 %v7684_v29 }
 0x9bc   :  { %v4455_v12 = vpop.eup %4454  ;;  %3933 = vmatpush1.bf16.msra.mxu0 %v6651_v11  ;;  %3974 = vmatpush1.bf16.msra.mxu1 %v6654_v54 }
 0x9bd   :  { %3934 = vmatprep.subr.bf16.mxu0 %v6657_v28  ;;  %3975 = vmatprep.subr.bf16.mxu1 %v6660_v2  ;;  %v3836_v9 = vmul.f32 %v4455_v12, %v4453_v0 }
 0x9bf   :  { %v3837_v1 = vpack.c.bf16 %v3836_v9, %v3836_v9  ;;  %4033 = vst [vmem:[%s7019_s8] sm:$0xff] %v3836_v9 }
 0x9c0   :  { %3935 = vmatpush1.bf16.msra.mxu0 %v6663_v56  ;;  %3976 = vmatpush1.bf16.msra.mxu1 %v6666_v44 }
 0x9c3   :  { %3953 = vmatmul.mubr.bf16.vlgmr.msra.gmra.mrb[108].mxu0 %v3837_v1  ;;  %3994 = vmatmul.mubr.bf16.vlgmr.msra.gmra.mrb[108].mxu1 %v3837_v1 }
 0xa76   :  { %v3872_v55 = vpop.f32.mrb[104].mxu0  ;;  %v3913_v5 = vpop.f32.mrb[104].mxu1 }
 0xa77   :  { %v3874_v27 = vpop.f32.mrb[105].mxu0  ;;  %v3915_v43 = vpop.f32.mrb[105].mxu1 }
 0xa78   :  { %v3876_v33 = vpop.f32.mrb[106].mxu0  ;;  %v3917_v58 = vpop.f32.mrb[106].mxu1 }
 0xa79   :  { %v3877_v34 = vpop.f32.mrb[107].mxu0  ;;  %v3918_v38 = vpop.f32.mrb[107].mxu1 }
 0xa96   :  { %v3954_v36 = vpop.f32.mrb[108].mxu0  ;;  %v3995_v37 = vpop.f32.mrb[108].mxu1 }
 0xa97   :  { %v3955_v39 = vadd.f32 %v3954_v36, %v3872_v55  ;;  %v3996_v41 = vadd.f32 %v3995_v37, %v3913_v5  ;;  %v3956_v46 = vpop.f32.mrb[109].mxu0  ;;  %v3997_v47 = vpop.f32.mrb[109].mxu1 }
 0xa98   :  { %v3957_v11 = vadd.f32 %v3956_v46, %v3874_v27  ;;  %v3998_v54 = vadd.f32 %v3997_v47, %v3915_v43  ;;  %v3958_v28 = vpop.f32.mrb[110].mxu0  ;;  %v3999_v44 = vpop.f32.mrb[110].mxu1 }
 0xa99   :  { %v4002_v2 = vadd.f32 %v3955_v39, %v5806_v57  ;;  %v3959_v56 = vpop.f32.mrb[111].mxu0  ;;  %v4000_v23 = vpop.f32.mrb[111].mxu1  ;;  %v4004_v19 = vadd.f32 %v3996_v41, %v7459_v62 }
 0xa9a   :  { %v4003_v29 = vadd.f32 %v3957_v11, %v5810_v40  ;;  %v4005_v25 = vadd.f32 %v3998_v54, %v5816_v7 }
 0xa9b   :  { %v4203_v4 = vmul.f32 -1.442695, %v4002_v2 }
 0xa9c   :  { %v4204_v45 = vmul.f32 -1.442695, %v4003_v29  ;;  %v4205_v24 = vmul.f32 -1.442695, %v4005_v25 }
 0xa9d   :  { %4456 = vpow2.f32 %v4203_v4 }
 0xa9e   :  { %4458 = vpow2.f32 %v4204_v45 }
 0xa9f   :  { %4460 = vpow2.f32 %v4205_v24 }
 0xaa0   :  { %4462 = vtanh.f32 %v4004_v19 }
 0xaa7   :  { %v4457_v18 = vpop.eup %4456 }
 0xaa8   :  { %v4459_v20 = vpop.eup %4458  ;;  %v4009_v21 = vadd.f32 1.0, %v4457_v18 }
 0xaa9   :  { %v4015_v51 = vadd.f32 1.0, %v4459_v20  ;;  %v4461_v57 = vpop.eup %4460 }
 0xaaa   :  { %4464 = vrcp.f32 %v4009_v21  ;;  %v4463_v10 = vpop.eup %4462  ;;  %v4022_v14 = vadd.f32 1.0, %v4461_v57 }
 0xaab   :  { %4466 = vrcp.f32 %v4015_v51 }
 0xaac   :  { %4468 = vrcp.f32 %v4022_v14 }
 0xab4   :  { %v4465_v40 = vpop.eup %4464 }
 0xab5   :  { %v4467_v35 = vpop.eup %4466  ;;  %v4026_v13 = vmul.f32 %v4465_v40, %v4463_v10 }
 0xab6   :  { %v4025_v15 = vmul.f32 %v4467_v35, %v6951_v30  ;;  %v4469_v62 = vpop.eup %4468 }
 0xab8   :  { %v4027_v7 = vadd.f32 %v4026_v13, %v4025_v15 }
 0xaba   :  { %4470 = vtanh.f32 %v4027_v7  ;;  %4208 = vst [vmem:[%s7020_s9 + $0x8] sm:$0xff] %v4027_v7 }
 0xac4   :  { %v4471_v42 = vpop.eup %4470 }
 0xac5   :  { %v4029_v16 = vmul.f32 %v4471_v42, %v4469_v62 }
 0xac7   :  { %v4030_v32 = vpack.c.bf16 %v4029_v16, %v4029_v16  ;;  %4207 = vst [vmem:[%s7019_s8 + $0x8] sm:$0xff] %v4029_v16 }
 0xac9   :  { %4206 = vst [vmem:[%s7018_s7 + $0x1c] sm:$0xf] %v4030_v32 }
 0xaca   :  { %4049 = vsyncmov [#allocation9] }
 0xacd   :  { %s4050_s26 = vpop.sfrf %4049 }
 0xace   :  { %p4209_p0 = scmp.ne.s32.totalorder %s4050_s26, 0 }
 0xad0   :  { %4054 = shalt.err (%p4209_p0)  }

</bundles_post_ra>
